<compile_context>
chip_gen: v6e
topology: v6e:2x2x1
jax: 0.10.0
libtpu: 0.0.40
codegen_flags: <defaults>
</compile_context>

<pallas_src>
import functools

import jax
import jax.numpy as jnp
import numpy as np
from jax.experimental import pallas as pl
from jax.experimental.pallas import tpu as pltpu

GROUPS = 32
GN_EPS = 1e-5


# ----------------------------------------------------------------------------
# Feature probe: single-buffered (grid-invariant) operands.
# ----------------------------------------------------------------------------
@functools.lru_cache(maxsize=None)
def _single_buffer_ok():
    """Probe pipeline_mode=pl.Buffered(1) support; fall back to default buffering."""
    try:
        def _k(x_ref, o_ref):
            o_ref[...] = x_ref[...] + 1.0

        probe = pl.pallas_call(
            _k,
            out_shape=jax.ShapeDtypeStruct((8, 128), jnp.float32),
            grid=(2,),
            in_specs=[pl.BlockSpec((8, 128), lambda i: (0, 0),
                                   pipeline_mode=pl.Buffered(1))],
            out_specs=pl.BlockSpec((8, 128), lambda i: (0, 0)),
        )
        jax.block_until_ready(probe(jnp.zeros((8, 128), jnp.float32)))
        return True
    except Exception:   # noqa: BLE001 -- any failure -> conservative fallback
        return False


def _const_spec(shape, single_buffer):
    """BlockSpec for a grid-invariant operand (constant index_map)."""
    nd = len(shape)
    idx = lambda n, bb: (0,) * nd
    if single_buffer:
        return pl.BlockSpec(shape, idx, pipeline_mode=pl.Buffered(1))
    return pl.BlockSpec(shape, idx)


# ----------------------------------------------------------------------------
# Kernel: per (image, H-band): affine-GN + SiLU + 3x3 conv (+ optional residual).
# ----------------------------------------------------------------------------
def _gn_silu_conv3x3_kernel(*refs, residual, band_h, width):
    if residual == "none":
        (x_ref, halo_ref, sc_ref, sh_ref, lm_ref, rm_ref,
         w_ref, b_ref, o_ref, pad_ref) = refs
        res_ref = wres_ref = bres_ref = None
    elif residual == "identity":
        (x_ref, halo_ref, sc_ref, sh_ref, lm_ref, rm_ref,
         w_ref, b_ref, res_ref, o_ref, pad_ref) = refs
        wres_ref = bres_ref = None
    else:   # "proj": 1x1-conv residual
        (x_ref, halo_ref, sc_ref, sh_ref, lm_ref, rm_ref,
         w_ref, b_ref, res_ref, wres_ref, bres_ref, o_ref, pad_ref) = refs

    BH, W = band_h, width
    cin = x_ref.shape[3]
    cout = o_ref.shape[3]
    bhw = BH * W

    scale = sc_ref[0]            # (1, cin) f32: gamma * rsqrt(var + eps)
    shift = sh_ref[0]            # (1, cin) f32: beta - mean * scale

    def gn_silu(v):              # f32 affine GroupNorm + SiLU (VPU / EUP)
        y = v * scale + shift
        return y * jax.nn.sigmoid(y)

    # Band interior.
    x2d = x_ref[0].astype(jnp.float32).reshape(bhw, cin)
    y32 = gn_silu(x2d)
    y16 = y32.astype(jnp.bfloat16)

    # Halo rows (row above / below the band).  Conv zero-padding acts on the
    # *activated* signal, so boundary halos are zeroed after GN+SiLU.
    bidx = pl.program_id(1)
    top_valid = (bidx > 0).astype(jnp.float32)
    bot_valid = (bidx < pl.num_programs(1) - 1).astype(jnp.float32)
    top = (gn_silu(halo_ref[0, 0].astype(jnp.float32)) * top_valid).astype(jnp.bfloat16)
    bot = (gn_silu(halo_ref[0, 1].astype(jnp.float32)) * bot_valid).astype(jnp.bfloat16)

    # (band_h + 2, W, cin) bf16 scratch: halos + interior, channels stored once.
    pad_ref[0, :, :] = top
    pad_ref[BH + 1, :, :] = bot
    pad_ref[1:BH + 1, :, :] = y16.reshape(BH, W, cin)

    lmask = lm_ref[...]          # (bhw, 1) f32, 0 where w == 0
    rmask = rm_ref[...]          # (bhw, 1) f32, 0 where w == W - 1

    acc = jnp.zeros((bhw, cout), jnp.float32)
    for dh in range(3):
        if dh == 1:
            slab32, slab16 = y32, y16          # reuse the just-stored interior rows
        else:
            slab16 = pad_ref[dh:dh + BH, :, :].reshape(bhw, cin)
            slab32 = slab16.astype(jnp.float32)
        # dw taps via sublane rolls (XLU) + boundary masks; stacked along channels
        # so each MXU call sees K = 3*cin.
        left = (pltpu.roll(slab32, 1, 0) * lmask).astype(jnp.bfloat16)       # x[., w-1]
        right = (pltpu.roll(slab32, bhw - 1, 0) * rmask).astype(jnp.bfloat16)  # x[., w+1]
        patch = jnp.concatenate([left, slab16, right], axis=1)               # (bhw, 3*cin)
        w_tap = w_ref[dh * 3 * cin:(dh + 1) * 3 * cin, :]
        acc = acc + jnp.dot(patch, w_tap, preferred_element_type=jnp.float32)
    h = acc + b_ref[...]

    if residual == "identity":
        h = h + res_ref[0].astype(jnp.float32).reshape(bhw, cout)
    elif residual == "proj":
        cres = res_ref.shape[3]
        r2d = res_ref[0].astype(jnp.bfloat16).reshape(bhw, cres)
        h = h + jnp.dot(r2d, wres_ref[...], preferred_element_type=jnp.float32) + bres_ref[...]

    o_ref[0] = h.reshape(BH, W, cout).astype(o_ref.dtype)


# ----------------------------------------------------------------------------
# Host-side helpers.
# ----------------------------------------------------------------------------
def _gn_scale_shift(h, gamma, beta, groups=GROUPS, eps=GN_EPS):
    """Two-pass GroupNorm stats (XLA), folded into a per-(n, channel) affine."""
    N, H, W, C = h.shape
    cpg = C // groups
    hf = h.astype(jnp.float32).reshape(N, H * W, groups, cpg)
    mean = hf.mean(axis=(1, 3))                                   # (N, G)
    var = jnp.square(hf - mean[:, None, :, None]).mean(axis=(1, 3))
    inv = jax.lax.rsqrt(var + eps)
    mean_c = jnp.repeat(mean, cpg, axis=1)                        # (N, C)
    inv_c = jnp.repeat(inv, cpg, axis=1)
    gamma = gamma.reshape(1, C).astype(jnp.float32)
    beta = beta.reshape(1, C).astype(jnp.float32)
    scale = inv_c * gamma
    shift = beta - mean_c * scale
    return scale.reshape(N, 1, C), shift.reshape(N, 1, C)


def _make_halos(x, band_h):
    """Rows just above / below every H-band: (N * num_bands, 2, W, C)."""
    N, H, W, C = x.shape
    nb = H // band_h
    zero = jnp.zeros((N, 1, W, C), x.dtype)
    above = jnp.concatenate([zero, x[:, band_h - 1:H - 1:band_h]], axis=1)  # row b*BH - 1
    below = jnp.concatenate([x[:, band_h:H:band_h], zero], axis=1)          # row (b+1)*BH
    return jnp.stack([above, below], axis=2).reshape(N * nb, 2, W, C)


def _edge_masks(band_h, W):
    """(band_h*W, 1) f32 masks: 0 where the w-1 / w+1 neighbour falls off the image."""
    w_ids = np.arange(band_h * W) % W
    lm = (w_ids != 0).astype(np.float32).reshape(-1, 1)
    rm = (w_ids != W - 1).astype(np.float32).reshape(-1, 1)
    return jnp.asarray(lm), jnp.asarray(rm)


def _pick_band_h(H):
    best = 1
    for cand in range(1, min(H, 32) + 1):
        if H % cand == 0:
            best = cand
    return best


def _vmem_limit_bytes(band_h, W, cin, cout, act_bytes):
    bhw = band_h * W
    est = (2 * bhw * cin * act_bytes            # input band, double-buffered
           + 2 * bhw * cout * act_bytes         # output band, double-buffered
           + 9 * cin * cout * 2                 # conv weights (single-buffered, bf16)
           + cin * cout * 2 + 4 * cout * 4      # residual weights + biases
           + (band_h + 2) * W * cin * 2         # pad scratch (bf16)
           + bhw * (4 * cin + 6 * cin + 6 * cout) * 2   # compiler temporaries, 2x slack
           + (2 << 20))
    return int(min(max(est, 32 << 20), 96 << 20))


def _gn_silu_conv_band_call(x, halos, scale, shift, lmask, rmask, w, b, *,
                            band_h, residual, res=None, wres=None, bres=None,
                            out_dtype):
    N, H, W, Cin = x.shape
    Cout = w.shape[-1]
    nb = H // band_h
    bhw = band_h * W
    single = _single_buffer_ok()
    cspec = lambda shape: _const_spec(shape, single)

    inputs = [x, halos, scale, shift, lmask, rmask, w, b]
    in_specs = [
        pl.BlockSpec((1, band_h, W, Cin), lambda n, bb: (n, bb, 0, 0)),
        pl.BlockSpec((1, 2, W, Cin), lambda n, bb: (n * nb + bb, 0, 0, 0)),
        pl.BlockSpec((1, 1, Cin), lambda n, bb: (n, 0, 0)),
        pl.BlockSpec((1, 1, Cin), lambda n, bb: (n, 0, 0)),
        cspec((bhw, 1)),
        cspec((bhw, 1)),
        cspec((9 * Cin, Cout)),
        cspec((1, Cout)),
    ]
    if residual != "none":
        cres = res.shape[-1]
        inputs.append(res)
        in_specs.append(pl.BlockSpec((1, band_h, W, cres), lambda n, bb: (n, bb, 0, 0)))
    if residual == "proj":
        inputs += [wres, bres]
        in_specs += [cspec((wres.shape[0], Cout)), cspec((1, Cout))]

    kernel = functools.partial(_gn_silu_conv3x3_kernel, residual=residual,
                               band_h=band_h, width=W)
    return pl.pallas_call(
        kernel,
        out_shape=jax.ShapeDtypeStruct((N, H, W, Cout), out_dtype),
        grid=(N, nb),
        in_specs=in_specs,
        out_specs=pl.BlockSpec((1, band_h, W, Cout), lambda n, bb: (n, bb, 0, 0)),
        scratch_shapes=[pltpu.VMEM((band_h + 2, W, Cin), jnp.bfloat16)],
        compiler_params=pltpu.CompilerParams(
            dimension_semantics=("parallel", "parallel"),
            vmem_limit_bytes=_vmem_limit_bytes(band_h, W, Cin, Cout,
                                               jnp.dtype(x.dtype).itemsize)),
    )(*inputs)


# ----------------------------------------------------------------------------
# Public entry points.
# ----------------------------------------------------------------------------
def residual_block_pallas_nhwc(x, params, *, band_h=None):
    N, H, W, Cin = x.shape
    Cout = params["w2"].shape[-1]
    identity = "wres" not in params
    if band_h is None:
        band_h = _pick_band_h(H)
    assert H % band_h == 0, "band_h must divide H"
    assert W % 8 == 0, "W must be a multiple of 8 (sublane-aligned reshapes)"
    assert Cin % GROUPS == 0 and Cout % GROUPS == 0

    act_dtype = x.dtype   # bf16 input -> bf16 intermediate & output (halves HBM traffic)
    w1 = params["w1"].reshape(9 * Cin, Cout).astype(jnp.bfloat16)   # [dh][dw][cin] x cout
    w2 = params["w2"].reshape(9 * Cout, Cout).astype(jnp.bfloat16)
    lmask, rmask = _edge_masks(band_h, W)

    # GN1 (two-pass stats in XLA) -> SiLU -> conv1, banded over H.
    s1, t1 = _gn_scale_shift(x, params["gn1_gamma"], params["gn1_beta"])
    h1 = _gn_silu_conv_band_call(
        x, _make_halos(x, band_h), s1, t1, lmask, rmask, w1, params["b1"],
        band_h=band_h, residual="none", out_dtype=act_dtype)

    # GN2 over the conv1 output -> SiLU -> conv2 + residual, banded over H.
    s2, t2 = _gn_scale_shift(h1, params["gn2_gamma"], params["gn2_beta"])
    if identity:
        return _gn_silu_conv_band_call(
            h1, _make_halos(h1, band_h), s2, t2, lmask, rmask, w2, params["b2"],
            band_h=band_h, residual="identity", res=x, out_dtype=act_dtype)
    return _gn_silu_conv_band_call(
        h1, _make_halos(h1, band_h), s2, t2, lmask, rmask, w2, params["b2"],
        band_h=band_h, residual="proj", res=x,
        wres=params["wres"].astype(jnp.bfloat16), bres=params["bres"],
        out_dtype=act_dtype)


@functools.partial(jax.jit, static_argnames=("band_h",))
def residual_block_pallas(x_nchw, params, band_h=None):
    # PyTorch-layout (NCHW) entry point.
    # TODO(synk): keep the surrounding model in NHWC and call the _nhwc variant
    # directly to avoid these two full HBM transpose passes.
    x_nhwc = jnp.transpose(x_nchw, (0, 2, 3, 1))
    out = residual_block_pallas_nhwc(x_nhwc, params, band_h=band_h)
    return jnp.transpose(out, (0, 3, 1, 2))


# ----------------------------------------------------------------------------
# Parameters + pure-JAX reference (mirrors the PyTorch forward).
# ----------------------------------------------------------------------------
def init_params(key, Cin, Cout):
    ks = jax.random.split(key, 10)
    p = {
        "gn1_gamma": 1.0 + 0.1 * jax.random.normal(ks[0], (1, Cin), jnp.float32),
        "gn1_beta": 0.1 * jax.random.normal(ks[1], (1, Cin), jnp.float32),
        "w1": 0.05 * jax.random.normal(ks[2], (3, 3, Cin, Cout), jnp.float32),   # HWIO
        "b1": 0.05 * jax.random.normal(ks[3], (1, Cout), jnp.float32),
        "gn2_gamma": 1.0 + 0.1 * jax.random.normal(ks[4], (1, Cout), jnp.float32),
        "gn2_beta": 0.1 * jax.random.normal(ks[5], (1, Cout), jnp.float32),
        "w2": 0.05 * jax.random.normal(ks[6], (3, 3, Cout, Cout), jnp.float32),
        "b2": 0.05 * jax.random.normal(ks[7], (1, Cout), jnp.float32),
    }
    if Cin != Cout:   # 1x1-conv residual path; nn.Identity otherwise (no params)
        p["wres"] = 0.05 * jax.random.normal(ks[8], (Cin, Cout), jnp.float32)
        p["bres"] = 0.05 * jax.random.normal(ks[9], (1, Cout), jnp.float32)
    return p


def reference_nchw(x_nchw, p):
    x = jnp.transpose(x_nchw, (0, 2, 3, 1))  # NHWC

    def gn(h, gamma, beta):
        N, H, W, C = h.shape
        hg = h.reshape(N, H, W, GROUPS, C // GROUPS)
        mean = hg.mean(axis=(1, 2, 4), keepdims=True)
        var = ((hg - mean) ** 2).mean(axis=(1, 2, 4), keepdims=True)
        hn = ((hg - mean) / jnp.sqrt(var + GN_EPS)).reshape(N, H, W, C)
        return hn * gamma.reshape(1, 1, 1, C) + beta.reshape(1, 1, 1, C)

    def conv(h, w, b):
        y = jax.lax.conv_general_dilated(h, w, (1, 1), ((1, 1), (1, 1)),
                                         dimension_numbers=("NHWC", "HWIO", "NHWC"))
        return y + b.reshape(1, 1, 1, -1)

    h = jax.nn.silu(gn(x, p["gn1_gamma"], p["gn1_beta"]))
    h = conv(h, p["w1"], p["b1"])
    h = jax.nn.silu(gn(h, p["gn2_gamma"], p["gn2_beta"]))
    h = conv(h, p["w2"], p["b2"])
    if "wres" in p:
        res = jnp.einsum("nhwc,cd->nhwd", x, p["wres"]) + p["bres"].reshape(1, 1, 1, -1)
    else:
        res = x
    return jnp.transpose(h + res, (0, 3, 1, 2))


if __name__ == "__main__":
    # GroupNorm(32, C) requires C to be a multiple of 32 -> smallest sensible shapes.
    key = jax.random.PRNGKey(0)
    N, H, W = 2, 16, 16
    cases = [(32, 64, 8),    # 1x1-conv residual, 2 H-bands (halo path exercised)
             (32, 32, 8),    # identity residual, 2 H-bands
             (32, 32, 16)]   # identity residual, single band (nb == 1 path)
    for (Cin, Cout, band_h) in cases:
        kx, kp, key = jax.random.split(key, 3)
        x = jax.random.normal(kx, (N, Cin, H, W), jnp.float32)   # NCHW, like PyTorch
        params = init_params(kp, Cin, Cout)

        out = jax.block_until_ready(residual_block_pallas(x, params, band_h=band_h))
        ref = jax.block_until_ready(reference_nchw(x, params))
        # bf16 MXU inputs with f32 accumulation vs. pure-f32 reference.
        np.testing.assert_allclose(np.asarray(out), np.asarray(ref), rtol=2e-2, atol=2e-2)

    print("KERNEL_OK")
</pallas_src>

<mosaic_0001>
module attributes {stable_mosaic.version = 11 : i64} {
  func.func @_gn_silu_conv3x3_kernel(%arg0: i32, %arg1: i32, %arg2: memref<1x8x16x32xf32, #tpu.memory_space<vmem>>, %arg3: memref<1x2x16x32xf32, #tpu.memory_space<vmem>>, %arg4: memref<1x1x32xf32, #tpu.memory_space<vmem>>, %arg5: memref<1x1x32xf32, #tpu.memory_space<vmem>>, %arg6: memref<128x1xf32, #tpu.memory_space<vmem>>, %arg7: memref<128x1xf32, #tpu.memory_space<vmem>>, %arg8: memref<288x64xbf16, #tpu.memory_space<vmem>>, %arg9: memref<1x64xf32, #tpu.memory_space<vmem>>, %arg10: memref<1x8x16x64xf32, #tpu.memory_space<vmem>>, %arg11: memref<10x16x32xbf16, #tpu.memory_space<vmem>>) attributes {dimension_semantics = [#tpu.dimension_semantics<parallel>, #tpu.dimension_semantics<parallel>], iteration_bounds = array<i64: 2, 2>, scalar_prefetch = 0 : i64, scratch_operands = 1 : i64, tpu.core_type = #tpu.core_type<tc>, window_params = [{transform_indices = @transform_0, window_bounds = array<i64: 1, 8, 16, 32>}, {transform_indices = @transform_1, window_bounds = array<i64: 1, 2, 16, 32>}, {transform_indices = @transform_2, window_bounds = array<i64: 1, 1, 32>}, {transform_indices = @transform_3, window_bounds = array<i64: 1, 1, 32>}, {pipeline_mode = #tpu.pipeline_mode<synchronous>, transform_indices = @transform_4, window_bounds = array<i64: 128, 1>}, {pipeline_mode = #tpu.pipeline_mode<synchronous>, transform_indices = @transform_5, window_bounds = array<i64: 128, 1>}, {pipeline_mode = #tpu.pipeline_mode<synchronous>, transform_indices = @transform_6, window_bounds = array<i64: 288, 64>}, {pipeline_mode = #tpu.pipeline_mode<synchronous>, transform_indices = @transform_7, window_bounds = array<i64: 1, 64>}, {transform_indices = @transform_8, window_bounds = array<i64: 1, 8, 16, 64>}]} {
    %c0 = arith.constant 0 : index
    %c0_0 = arith.constant 0 : index
    %c0_1 = arith.constant 0 : index
    %0 = vector.load %arg4[%c0, %c0_0, %c0_1] : memref<1x1x32xf32, #tpu.memory_space<vmem>>, vector<1x1x32xf32>
    %1 = vector.shape_cast %0 : vector<1x1x32xf32> to vector<1x32xf32>
    %c0_2 = arith.constant 0 : index
    %c0_3 = arith.constant 0 : index
    %c0_4 = arith.constant 0 : index
    %2 = vector.load %arg5[%c0_2, %c0_3, %c0_4] : memref<1x1x32xf32, #tpu.memory_space<vmem>>, vector<1x1x32xf32>
    %3 = vector.shape_cast %2 : vector<1x1x32xf32> to vector<1x32xf32>
    %c0_5 = arith.constant 0 : index
    %c0_6 = arith.constant 0 : index
    %c0_7 = arith.constant 0 : index
    %c0_8 = arith.constant 0 : index
    %4 = vector.load %arg2[%c0_5, %c0_6, %c0_7, %c0_8] : memref<1x8x16x32xf32, #tpu.memory_space<vmem>>, vector<1x8x16x32xf32>
    %5 = vector.shape_cast %4 : vector<1x8x16x32xf32> to vector<8x16x32xf32>
    %6 = vector.shape_cast %5 : vector<8x16x32xf32> to vector<128x32xf32>
    %7 = vector.broadcast %1 : vector<1x32xf32> to vector<128x32xf32>
    %8 = arith.mulf %6, %7 : vector<128x32xf32>
    %9 = vector.broadcast %3 : vector<1x32xf32> to vector<128x32xf32>
    %10 = arith.addf %8, %9 : vector<128x32xf32>
    %11 = arith.negf %10 : vector<128x32xf32>
    %12 = math.exp %11 : vector<128x32xf32>
    %cst = arith.constant 1.000000e+00 : f32
    %13 = vector.broadcast %cst : f32 to vector<128x32xf32>
    %14 = arith.addf %13, %12 : vector<128x32xf32>
    %15 = arith.divf %13, %14 : vector<128x32xf32>
    %16 = arith.mulf %10, %15 : vector<128x32xf32>
    %17 = arith.truncf %16 : vector<128x32xf32> to vector<128x32xbf16>
    %c0_i32 = arith.constant 0 : i32
    %18 = arith.cmpi sgt, %arg1, %c0_i32 : i32
    %19 = arith.extui %18 : i1 to i32
    %20 = arith.sitofp %19 : i32 to f32
    %c1_i32 = arith.constant 1 : i32
    %21 = arith.cmpi slt, %arg1, %c1_i32 : i32
    %22 = arith.extui %21 : i1 to i32
    %23 = arith.sitofp %22 : i32 to f32
    %c0_9 = arith.constant 0 : index
    %c0_10 = arith.constant 0 : index
    %c0_11 = arith.constant 0 : index
    %c0_12 = arith.constant 0 : index
    %24 = vector.load %arg3[%c0_9, %c0_10, %c0_11, %c0_12] : memref<1x2x16x32xf32, #tpu.memory_space<vmem>>, vector<1x1x16x32xf32>
    %25 = vector.shape_cast %24 : vector<1x1x16x32xf32> to vector<16x32xf32>
    %26 = vector.broadcast %1 : vector<1x32xf32> to vector<16x32xf32>
    %27 = arith.mulf %25, %26 : vector<16x32xf32>
    %28 = vector.broadcast %3 : vector<1x32xf32> to vector<16x32xf32>
    %29 = arith.addf %27, %28 : vector<16x32xf32>
    %30 = arith.negf %29 : vector<16x32xf32>
    %31 = math.exp %30 : vector<16x32xf32>
    %cst_13 = arith.constant 1.000000e+00 : f32
    %32 = vector.broadcast %cst_13 : f32 to vector<16x32xf32>
    %33 = arith.addf %32, %31 : vector<16x32xf32>
    %34 = arith.divf %32, %33 : vector<16x32xf32>
    %35 = arith.mulf %29, %34 : vector<16x32xf32>
    %36 = vector.broadcast %20 : f32 to vector<16x32xf32>
    %37 = arith.mulf %35, %36 : vector<16x32xf32>
    %38 = arith.truncf %37 : vector<16x32xf32> to vector<16x32xbf16>
    %c0_14 = arith.constant 0 : index
    %c1 = arith.constant 1 : index
    %c0_15 = arith.constant 0 : index
    %c0_16 = arith.constant 0 : index
    %39 = vector.load %arg3[%c0_14, %c1, %c0_15, %c0_16] : memref<1x2x16x32xf32, #tpu.memory_space<vmem>>, vector<1x1x16x32xf32>
    %40 = vector.shape_cast %39 : vector<1x1x16x32xf32> to vector<16x32xf32>
    %41 = vector.broadcast %1 : vector<1x32xf32> to vector<16x32xf32>
    %42 = arith.mulf %40, %41 : vector<16x32xf32>
    %43 = vector.broadcast %3 : vector<1x32xf32> to vector<16x32xf32>
    %44 = arith.addf %42, %43 : vector<16x32xf32>
    %45 = arith.negf %44 : vector<16x32xf32>
    %46 = math.exp %45 : vector<16x32xf32>
    %cst_17 = arith.constant 1.000000e+00 : f32
    %47 = vector.broadcast %cst_17 : f32 to vector<16x32xf32>
    %48 = arith.addf %47, %46 : vector<16x32xf32>
    %49 = arith.divf %47, %48 : vector<16x32xf32>
    %50 = arith.mulf %44, %49 : vector<16x32xf32>
    %51 = vector.broadcast %23 : f32 to vector<16x32xf32>
    %52 = arith.mulf %50, %51 : vector<16x32xf32>
    %53 = arith.truncf %52 : vector<16x32xf32> to vector<16x32xbf16>
    %c0_18 = arith.constant 0 : index
    %c0_19 = arith.constant 0 : index
    %c0_20 = arith.constant 0 : index
    %54 = vector.load %arg11[%c0_18, %c0_19, %c0_20] : memref<10x16x32xbf16, #tpu.memory_space<vmem>>, vector<1x16x32xbf16>
    %55 = vector.shape_cast %54 : vector<1x16x32xbf16> to vector<16x32xbf16>
    %56 = vector.shape_cast %38 : vector<16x32xbf16> to vector<1x16x32xbf16>
    tpu.vector_store %arg11[%c0_18, %c0_19, %c0_20], %56 {strides = array<i32>} : memref<10x16x32xbf16, #tpu.memory_space<vmem>>, vector<1x16x32xbf16>,
    %c9 = arith.constant 9 : index
    %c0_21 = arith.constant 0 : index
    %c0_22 = arith.constant 0 : index
    %57 = vector.load %arg11[%c9, %c0_21, %c0_22] : memref<10x16x32xbf16, #tpu.memory_space<vmem>>, vector<1x16x32xbf16>
    %58 = vector.shape_cast %57 : vector<1x16x32xbf16> to vector<16x32xbf16>
    %59 = vector.shape_cast %53 : vector<16x32xbf16> to vector<1x16x32xbf16>
    tpu.vector_store %arg11[%c9, %c0_21, %c0_22], %59 {strides = array<i32>} : memref<10x16x32xbf16, #tpu.memory_space<vmem>>, vector<1x16x32xbf16>,
    %60 = vector.shape_cast %17 : vector<128x32xbf16> to vector<8x16x32xbf16>
    %c1_23 = arith.constant 1 : index
    %c0_24 = arith.constant 0 : index
    %c0_25 = arith.constant 0 : index
    %61 = vector.load %arg11[%c1_23, %c0_24, %c0_25] : memref<10x16x32xbf16, #tpu.memory_space<vmem>>, vector<8x16x32xbf16>
    tpu.vector_store %arg11[%c1_23, %c0_24, %c0_25], %60 {strides = array<i32>} : memref<10x16x32xbf16, #tpu.memory_space<vmem>>, vector<8x16x32xbf16>,
    %c0_26 = arith.constant 0 : index
    %c0_27 = arith.constant 0 : index
    %62 = vector.load %arg6[%c0_26, %c0_27] : memref<128x1xf32, #tpu.memory_space<vmem>>, vector<128x1xf32>
    %c0_28 = arith.constant 0 : index
    %c0_29 = arith.constant 0 : index
    %63 = vector.load %arg7[%c0_28, %c0_29] : memref<128x1xf32, #tpu.memory_space<vmem>>, vector<128x1xf32>
    %cst_30 = arith.constant 0.000000e+00 : f32
    %64 = vector.broadcast %cst_30 : f32 to vector<128x64xf32>
    %c0_31 = arith.constant 0 : index
    %c0_32 = arith.constant 0 : index
    %c0_33 = arith.constant 0 : index
    %65 = vector.load %arg11[%c0_31, %c0_32, %c0_33] : memref<10x16x32xbf16, #tpu.memory_space<vmem>>, vector<8x16x32xbf16>
    %66 = vector.shape_cast %65 : vector<8x16x32xbf16> to vector<128x32xbf16>
    %67 = arith.extf %66 : vector<128x32xbf16> to vector<128x32xf32>
    %c1_i32_34 = arith.constant 1 : i32
    %68 = tpu.dynamic_rotate %67 by %c1_i32_34 dim 0 : vector<128x32xf32>, i32 -> vector<128x32xf32>
    %69 = vector.broadcast %62 : vector<128x1xf32> to vector<128x32xf32>
    %70 = arith.mulf %68, %69 : vector<128x32xf32>
    %71 = arith.truncf %70 : vector<128x32xf32> to vector<128x32xbf16>
    %c127_i32 = arith.constant 127 : i32
    %72 = tpu.dynamic_rotate %67 by %c127_i32 dim 0 : vector<128x32xf32>, i32 -> vector<128x32xf32>
    %73 = vector.broadcast %63 : vector<128x1xf32> to vector<128x32xf32>
    %74 = arith.mulf %72, %73 : vector<128x32xf32>
    %75 = arith.truncf %74 : vector<128x32xf32> to vector<128x32xbf16>
    %76 = tpu.concatenate %71, %66, %75 in 1 : vector<128x32xbf16>, vector<128x32xbf16>, vector<128x32xbf16> -> vector<128x96xbf16>
    %c0_35 = arith.constant 0 : index
    %c0_36 = arith.constant 0 : index
    %77 = vector.load %arg8[%c0_35, %c0_36] : memref<288x64xbf16, #tpu.memory_space<vmem>>, vector<96x64xbf16>
    %cst_37 = arith.constant dense<0.000000e+00> : vector<128x64xf32>
    %78 = tpu.matmul %76, %77, %cst_37 {dimension_numbers = #tpu.dot_dimension_numbers<[1], [0], [0], [1], [0, 0, 1, 1], [], []>} : vector<128x96xbf16>, vector<96x64xbf16>, vector<128x64xf32> -> vector<128x64xf32>
    %79 = arith.addf %64, %78 : vector<128x64xf32>
    %c1_i32_38 = arith.constant 1 : i32
    %80 = tpu.dynamic_rotate %16 by %c1_i32_38 dim 0 : vector<128x32xf32>, i32 -> vector<128x32xf32>
    %81 = vector.broadcast %62 : vector<128x1xf32> to vector<128x32xf32>
    %82 = arith.mulf %80, %81 : vector<128x32xf32>
    %83 = arith.truncf %82 : vector<128x32xf32> to vector<128x32xbf16>
    %c127_i32_39 = arith.constant 127 : i32
    %84 = tpu.dynamic_rotate %16 by %c127_i32_39 dim 0 : vector<128x32xf32>, i32 -> vector<128x32xf32>
    %85 = vector.broadcast %63 : vector<128x1xf32> to vector<128x32xf32>
    %86 = arith.mulf %84, %85 : vector<128x32xf32>
    %87 = arith.truncf %86 : vector<128x32xf32> to vector<128x32xbf16>
    %88 = tpu.concatenate %83, %17, %87 in 1 : vector<128x32xbf16>, vector<128x32xbf16>, vector<128x32xbf16> -> vector<128x96xbf16>
    %c96 = arith.constant 96 : index
    %c0_40 = arith.constant 0 : index
    %89 = vector.load %arg8[%c96, %c0_40] : memref<288x64xbf16, #tpu.memory_space<vmem>>, vector<96x64xbf16>
    %cst_41 = arith.constant dense<0.000000e+00> : vector<128x64xf32>
    %90 = tpu.matmul %88, %89, %cst_41 {dimension_numbers = #tpu.dot_dimension_numbers<[1], [0], [0], [1], [0, 0, 1, 1], [], []>} : vector<128x96xbf16>, vector<96x64xbf16>, vector<128x64xf32> -> vector<128x64xf32>
    %91 = arith.addf %79, %90 : vector<128x64xf32>
    %c2 = arith.constant 2 : index
    %c0_42 = arith.constant 0 : index
    %c0_43 = arith.constant 0 : index
    %92 = vector.load %arg11[%c2, %c0_42, %c0_43] : memref<10x16x32xbf16, #tpu.memory_space<vmem>>, vector<8x16x32xbf16>
    %93 = vector.shape_cast %92 : vector<8x16x32xbf16> to vector<128x32xbf16>
    %94 = arith.extf %93 : vector<128x32xbf16> to vector<128x32xf32>
    %c1_i32_44 = arith.constant 1 : i32
    %95 = tpu.dynamic_rotate %94 by %c1_i32_44 dim 0 : vector<128x32xf32>, i32 -> vector<128x32xf32>
    %96 = vector.broadcast %62 : vector<128x1xf32> to vector<128x32xf32>
    %97 = arith.mulf %95, %96 : vector<128x32xf32>
    %98 = arith.truncf %97 : vector<128x32xf32> to vector<128x32xbf16>
    %c127_i32_45 = arith.constant 127 : i32
    %99 = tpu.dynamic_rotate %94 by %c127_i32_45 dim 0 : vector<128x32xf32>, i32 -> vector<128x32xf32>
    %100 = vector.broadcast %63 : vector<128x1xf32> to vector<128x32xf32>
    %101 = arith.mulf %99, %100 : vector<128x32xf32>
    %102 = arith.truncf %101 : vector<128x32xf32> to vector<128x32xbf16>
    %103 = tpu.concatenate %98, %93, %102 in 1 : vector<128x32xbf16>, vector<128x32xbf16>, vector<128x32xbf16> -> vector<128x96xbf16>
    %c192 = arith.constant 192 : index
    %c0_46 = arith.constant 0 : index
    %104 = vector.load %arg8[%c192, %c0_46] : memref<288x64xbf16, #tpu.memory_space<vmem>>, vector<96x64xbf16>
    %cst_47 = arith.constant dense<0.000000e+00> : vector<128x64xf32>
    %105 = tpu.matmul %103, %104, %cst_47 {dimension_numbers = #tpu.dot_dimension_numbers<[1], [0], [0], [1], [0, 0, 1, 1], [], []>} : vector<128x96xbf16>, vector<96x64xbf16>, vector<128x64xf32> -> vector<128x64xf32>
    %106 = arith.addf %91, %105 : vector<128x64xf32>
    %c0_48 = arith.constant 0 : index
    %c0_49 = arith.constant 0 : index
    %107 = vector.load %arg9[%c0_48, %c0_49] : memref<1x64xf32, #tpu.memory_space<vmem>>, vector<1x64xf32>
    %108 = vector.broadcast %107 : vector<1x64xf32> to vector<128x64xf32>
    %109 = arith.addf %106, %108 : vector<128x64xf32>
    %110 = vector.shape_cast %109 : vector<128x64xf32> to vector<8x16x64xf32>
    %c0_50 = arith.constant 0 : index
    %c0_51 = arith.constant 0 : index
    %c0_52 = arith.constant 0 : index
    %c0_53 = arith.constant 0 : index
    %111 = vector.load %arg10[%c0_50, %c0_51, %c0_52, %c0_53] : memref<1x8x16x64xf32, #tpu.memory_space<vmem>>, vector<1x8x16x64xf32>
    %112 = vector.shape_cast %111 : vector<1x8x16x64xf32> to vector<8x16x64xf32>
    %113 = vector.shape_cast %110 : vector<8x16x64xf32> to vector<1x8x16x64xf32>
    tpu.vector_store %arg10[%c0_50, %c0_51, %c0_52, %c0_53], %113 {strides = array<i32>} : memref<1x8x16x64xf32, #tpu.memory_space<vmem>>, vector<1x8x16x64xf32>,
    return
  }
  func.func @transform_0(%arg0: i32, %arg1: i32) -> (i32, i32, i32, i32) {
    %c0_i32 = arith.constant 0 : i32
    %c0_i32_0 = arith.constant 0 : i32
    %c0_i32_1 = arith.constant 0 : i32
    return %arg0, %arg1, %c0_i32, %c0_i32_0 : i32, i32, i32, i32
  }
  func.func @transform_1(%arg0: i32, %arg1: i32) -> (i32, i32, i32, i32) {
    %c2_i32 = arith.constant 2 : i32
    %0 = arith.muli %arg0, %c2_i32 : i32
    %1 = arith.addi %0, %arg1 : i32
    %c0_i32 = arith.constant 0 : i32
    %c0_i32_0 = arith.constant 0 : i32
    %c0_i32_1 = arith.constant 0 : i32
    %c0_i32_2 = arith.constant 0 : i32
    return %1, %c0_i32, %c0_i32_0, %c0_i32_1 : i32, i32, i32, i32
  }
  func.func @transform_2(%arg0: i32, %arg1: i32) -> (i32, i32, i32) {
    %c0_i32 = arith.constant 0 : i32
    %c0_i32_0 = arith.constant 0 : i32
    %c0_i32_1 = arith.constant 0 : i32
    return %arg0, %c0_i32, %c0_i32_0 : i32, i32, i32
  }
  func.func @transform_3(%arg0: i32, %arg1: i32) -> (i32, i32, i32) {
    %c0_i32 = arith.constant 0 : i32
    %c0_i32_0 = arith.constant 0 : i32
    %c0_i32_1 = arith.constant 0 : i32
    return %arg0, %c0_i32, %c0_i32_0 : i32, i32, i32
  }
  func.func @transform_4(%arg0: i32, %arg1: i32) -> (i32, i32) {
    %c0_i32 = arith.constant 0 : i32
    %c0_i32_0 = arith.constant 0 : i32
    %c0_i32_1 = arith.constant 0 : i32
    return %c0_i32, %c0_i32_0 : i32, i32
  }
  func.func @transform_5(%arg0: i32, %arg1: i32) -> (i32, i32) {
    %c0_i32 = arith.constant 0 : i32
    %c0_i32_0 = arith.constant 0 : i32
    %c0_i32_1 = arith.constant 0 : i32
    return %c0_i32, %c0_i32_0 : i32, i32
  }
  func.func @transform_6(%arg0: i32, %arg1: i32) -> (i32, i32) {
    %c0_i32 = arith.constant 0 : i32
    %c0_i32_0 = arith.constant 0 : i32
    %c0_i32_1 = arith.constant 0 : i32
    return %c0_i32, %c0_i32_0 : i32, i32
  }
  func.func @transform_7(%arg0: i32, %arg1: i32) -> (i32, i32) {
    %c0_i32 = arith.constant 0 : i32
    %c0_i32_0 = arith.constant 0 : i32
    %c0_i32_1 = arith.constant 0 : i32
    return %c0_i32, %c0_i32_0 : i32, i32
  }
  func.func @transform_8(%arg0: i32, %arg1: i32) -> (i32, i32, i32, i32) {
    %c0_i32 = arith.constant 0 : i32
    %c0_i32_0 = arith.constant 0 : i32
    %c0_i32_1 = arith.constant 0 : i32
    return %arg0, %arg1, %c0_i32, %c0_i32_0 : i32, i32, i32, i32
  }
}

module attributes {stable_mosaic.version = 11 : i64} {
  func.func @_gn_silu_conv3x3_kernel(%arg0: i32, %arg1: i32, %arg2: memref<1x8x16x64xf32, #tpu.memory_space<vmem>>, %arg3: memref<1x2x16x64xf32, #tpu.memory_space<vmem>>, %arg4: memref<1x1x64xf32, #tpu.memory_space<vmem>>, %arg5: memref<1x1x64xf32, #tpu.memory_space<vmem>>, %arg6: memref<128x1xf32, #tpu.memory_space<vmem>>, %arg7: memref<128x1xf32, #tpu.memory_space<vmem>>, %arg8: memref<576x64xbf16, #tpu.memory_space<vmem>>, %arg9: memref<1x64xf32, #tpu.memory_space<vmem>>, %arg10: memref<1x8x16x32xf32, #tpu.memory_space<vmem>>, %arg11: memref<32x64xbf16, #tpu.memory_space<vmem>>, %arg12: memref<1x64xf32, #tpu.memory_space<vmem>>, %arg13: memref<1x8x16x64xf32, #tpu.memory_space<vmem>>, %arg14: memref<10x16x64xbf16, #tpu.memory_space<vmem>>) attributes {dimension_semantics = [#tpu.dimension_semantics<parallel>, #tpu.dimension_semantics<parallel>], iteration_bounds = array<i64: 2, 2>, scalar_prefetch = 0 : i64, scratch_operands = 1 : i64, tpu.core_type = #tpu.core_type<tc>, window_params = [{transform_indices = @transform_0, window_bounds = array<i64: 1, 8, 16, 64>}, {transform_indices = @transform_1, window_bounds = array<i64: 1, 2, 16, 64>}, {transform_indices = @transform_2, window_bounds = array<i64: 1, 1, 64>}, {transform_indices = @transform_3, window_bounds = array<i64: 1, 1, 64>}, {pipeline_mode = #tpu.pipeline_mode<synchronous>, transform_indices = @transform_4, window_bounds = array<i64: 128, 1>}, {pipeline_mode = #tpu.pipeline_mode<synchronous>, transform_indices = @transform_5, window_bounds = array<i64: 128, 1>}, {pipeline_mode = #tpu.pipeline_mode<synchronous>, transform_indices = @transform_6, window_bounds = array<i64: 576, 64>}, {pipeline_mode = #tpu.pipeline_mode<synchronous>, transform_indices = @transform_7, window_bounds = array<i64: 1, 64>}, {transform_indices = @transform_8, window_bounds = array<i64: 1, 8, 16, 32>}, {pipeline_mode = #tpu.pipeline_mode<synchronous>, transform_indices = @transform_9, window_bounds = array<i64: 32, 64>}, {pipeline_mode = #tpu.pipeline_mode<synchronous>, transform_indices = @transform_10, window_bounds = array<i64: 1, 64>}, {transform_indices = @transform_11, window_bounds = array<i64: 1, 8, 16, 64>}]} {
    %c0 = arith.constant 0 : index
    %c0_0 = arith.constant 0 : index
    %c0_1 = arith.constant 0 : index
    %0 = vector.load %arg4[%c0, %c0_0, %c0_1] : memref<1x1x64xf32, #tpu.memory_space<vmem>>, vector<1x1x64xf32>
    %1 = vector.shape_cast %0 : vector<1x1x64xf32> to vector<1x64xf32>
    %c0_2 = arith.constant 0 : index
    %c0_3 = arith.constant 0 : index
    %c0_4 = arith.constant 0 : index
    %2 = vector.load %arg5[%c0_2, %c0_3, %c0_4] : memref<1x1x64xf32, #tpu.memory_space<vmem>>, vector<1x1x64xf32>
    %3 = vector.shape_cast %2 : vector<1x1x64xf32> to vector<1x64xf32>
    %c0_5 = arith.constant 0 : index
    %c0_6 = arith.constant 0 : index
    %c0_7 = arith.constant 0 : index
    %c0_8 = arith.constant 0 : index
    %4 = vector.load %arg2[%c0_5, %c0_6, %c0_7, %c0_8] : memref<1x8x16x64xf32, #tpu.memory_space<vmem>>, vector<1x8x16x64xf32>
    %5 = vector.shape_cast %4 : vector<1x8x16x64xf32> to vector<8x16x64xf32>
    %6 = vector.shape_cast %5 : vector<8x16x64xf32> to vector<128x64xf32>
    %7 = vector.broadcast %1 : vector<1x64xf32> to vector<128x64xf32>
    %8 = arith.mulf %6, %7 : vector<128x64xf32>
    %9 = vector.broadcast %3 : vector<1x64xf32> to vector<128x64xf32>
    %10 = arith.addf %8, %9 : vector<128x64xf32>
    %11 = arith.negf %10 : vector<128x64xf32>
    %12 = math.exp %11 : vector<128x64xf32>
    %cst = arith.constant 1.000000e+00 : f32
    %13 = vector.broadcast %cst : f32 to vector<128x64xf32>
    %14 = arith.addf %13, %12 : vector<128x64xf32>
    %15 = arith.divf %13, %14 : vector<128x64xf32>
    %16 = arith.mulf %10, %15 : vector<128x64xf32>
    %17 = arith.truncf %16 : vector<128x64xf32> to vector<128x64xbf16>
    %c0_i32 = arith.constant 0 : i32
    %18 = arith.cmpi sgt, %arg1, %c0_i32 : i32
    %19 = arith.extui %18 : i1 to i32
    %20 = arith.sitofp %19 : i32 to f32
    %c1_i32 = arith.constant 1 : i32
    %21 = arith.cmpi slt, %arg1, %c1_i32 : i32
    %22 = arith.extui %21 : i1 to i32
    %23 = arith.sitofp %22 : i32 to f32
    %c0_9 = arith.constant 0 : index
    %c0_10 = arith.constant 0 : index
    %c0_11 = arith.constant 0 : index
    %c0_12 = arith.constant 0 : index
    %24 = vector.load %arg3[%c0_9, %c0_10, %c0_11, %c0_12] : memref<1x2x16x64xf32, #tpu.memory_space<vmem>>, vector<1x1x16x64xf32>
    %25 = vector.shape_cast %24 : vector<1x1x16x64xf32> to vector<16x64xf32>
    %26 = vector.broadcast %1 : vector<1x64xf32> to vector<16x64xf32>
    %27 = arith.mulf %25, %26 : vector<16x64xf32>
    %28 = vector.broadcast %3 : vector<1x64xf32> to vector<16x64xf32>
    %29 = arith.addf %27, %28 : vector<16x64xf32>
    %30 = arith.negf %29 : vector<16x64xf32>
    %31 = math.exp %30 : vector<16x64xf32>
    %cst_13 = arith.constant 1.000000e+00 : f32
    %32 = vector.broadcast %cst_13 : f32 to vector<16x64xf32>
    %33 = arith.addf %32, %31 : vector<16x64xf32>
    %34 = arith.divf %32, %33 : vector<16x64xf32>
    %35 = arith.mulf %29, %34 : vector<16x64xf32>
    %36 = vector.broadcast %20 : f32 to vector<16x64xf32>
    %37 = arith.mulf %35, %36 : vector<16x64xf32>
    %38 = arith.truncf %37 : vector<16x64xf32> to vector<16x64xbf16>
    %c0_14 = arith.constant 0 : index
    %c1 = arith.constant 1 : index
    %c0_15 = arith.constant 0 : index
    %c0_16 = arith.constant 0 : index
    %39 = vector.load %arg3[%c0_14, %c1, %c0_15, %c0_16] : memref<1x2x16x64xf32, #tpu.memory_space<vmem>>, vector<1x1x16x64xf32>
    %40 = vector.shape_cast %39 : vector<1x1x16x64xf32> to vector<16x64xf32>
    %41 = vector.broadcast %1 : vector<1x64xf32> to vector<16x64xf32>
    %42 = arith.mulf %40, %41 : vector<16x64xf32>
    %43 = vector.broadcast %3 : vector<1x64xf32> to vector<16x64xf32>
    %44 = arith.addf %42, %43 : vector<16x64xf32>
    %45 = arith.negf %44 : vector<16x64xf32>
    %46 = math.exp %45 : vector<16x64xf32>
    %cst_17 = arith.constant 1.000000e+00 : f32
    %47 = vector.broadcast %cst_17 : f32 to vector<16x64xf32>
    %48 = arith.addf %47, %46 : vector<16x64xf32>
    %49 = arith.divf %47, %48 : vector<16x64xf32>
    %50 = arith.mulf %44, %49 : vector<16x64xf32>
    %51 = vector.broadcast %23 : f32 to vector<16x64xf32>
    %52 = arith.mulf %50, %51 : vector<16x64xf32>
    %53 = arith.truncf %52 : vector<16x64xf32> to vector<16x64xbf16>
    %c0_18 = arith.constant 0 : index
    %c0_19 = arith.constant 0 : index
    %c0_20 = arith.constant 0 : index
    %54 = vector.load %arg14[%c0_18, %c0_19, %c0_20] : memref<10x16x64xbf16, #tpu.memory_space<vmem>>, vector<1x16x64xbf16>
    %55 = vector.shape_cast %54 : vector<1x16x64xbf16> to vector<16x64xbf16>
    %56 = vector.shape_cast %38 : vector<16x64xbf16> to vector<1x16x64xbf16>
    tpu.vector_store %arg14[%c0_18, %c0_19, %c0_20], %56 {strides = array<i32>} : memref<10x16x64xbf16, #tpu.memory_space<vmem>>, vector<1x16x64xbf16>,
    %c9 = arith.constant 9 : index
    %c0_21 = arith.constant 0 : index
    %c0_22 = arith.constant 0 : index
    %57 = vector.load %arg14[%c9, %c0_21, %c0_22] : memref<10x16x64xbf16, #tpu.memory_space<vmem>>, vector<1x16x64xbf16>
    %58 = vector.shape_cast %57 : vector<1x16x64xbf16> to vector<16x64xbf16>
    %59 = vector.shape_cast %53 : vector<16x64xbf16> to vector<1x16x64xbf16>
    tpu.vector_store %arg14[%c9, %c0_21, %c0_22], %59 {strides = array<i32>} : memref<10x16x64xbf16, #tpu.memory_space<vmem>>, vector<1x16x64xbf16>,
    %60 = vector.shape_cast %17 : vector<128x64xbf16> to vector<8x16x64xbf16>
    %c1_23 = arith.constant 1 : index
    %c0_24 = arith.constant 0 : index
    %c0_25 = arith.constant 0 : index
    %61 = vector.load %arg14[%c1_23, %c0_24, %c0_25] : memref<10x16x64xbf16, #tpu.memory_space<vmem>>, vector<8x16x64xbf16>
    tpu.vector_store %arg14[%c1_23, %c0_24, %c0_25], %60 {strides = array<i32>} : memref<10x16x64xbf16, #tpu.memory_space<vmem>>, vector<8x16x64xbf16>,
    %c0_26 = arith.constant 0 : index
    %c0_27 = arith.constant 0 : index
    %62 = vector.load %arg6[%c0_26, %c0_27] : memref<128x1xf32, #tpu.memory_space<vmem>>, vector<128x1xf32>
    %c0_28 = arith.constant 0 : index
    %c0_29 = arith.constant 0 : index
    %63 = vector.load %arg7[%c0_28, %c0_29] : memref<128x1xf32, #tpu.memory_space<vmem>>, vector<128x1xf32>
    %cst_30 = arith.constant 0.000000e+00 : f32
    %64 = vector.broadcast %cst_30 : f32 to vector<128x64xf32>
    %c0_31 = arith.constant 0 : index
    %c0_32 = arith.constant 0 : index
    %c0_33 = arith.constant 0 : index
    %65 = vector.load %arg14[%c0_31, %c0_32, %c0_33] : memref<10x16x64xbf16, #tpu.memory_space<vmem>>, vector<8x16x64xbf16>
    %66 = vector.shape_cast %65 : vector<8x16x64xbf16> to vector<128x64xbf16>
    %67 = arith.extf %66 : vector<128x64xbf16> to vector<128x64xf32>
    %c1_i32_34 = arith.constant 1 : i32
    %68 = tpu.dynamic_rotate %67 by %c1_i32_34 dim 0 : vector<128x64xf32>, i32 -> vector<128x64xf32>
    %69 = vector.broadcast %62 : vector<128x1xf32> to vector<128x64xf32>
    %70 = arith.mulf %68, %69 : vector<128x64xf32>
    %71 = arith.truncf %70 : vector<128x64xf32> to vector<128x64xbf16>
    %c127_i32 = arith.constant 127 : i32
    %72 = tpu.dynamic_rotate %67 by %c127_i32 dim 0 : vector<128x64xf32>, i32 -> vector<128x64xf32>
    %73 = vector.broadcast %63 : vector<128x1xf32> to vector<128x64xf32>
    %74 = arith.mulf %72, %73 : vector<128x64xf32>
    %75 = arith.truncf %74 : vector<128x64xf32> to vector<128x64xbf16>
    %76 = tpu.concatenate %71, %66, %75 in 1 : vector<128x64xbf16>, vector<128x64xbf16>, vector<128x64xbf16> -> vector<128x192xbf16>
    %c0_35 = arith.constant 0 : index
    %c0_36 = arith.constant 0 : index
    %77 = vector.load %arg8[%c0_35, %c0_36] : memref<576x64xbf16, #tpu.memory_space<vmem>>, vector<192x64xbf16>
    %cst_37 = arith.constant dense<0.000000e+00> : vector<128x64xf32>
    %78 = tpu.matmul %76, %77, %cst_37 {dimension_numbers = #tpu.dot_dimension_numbers<[1], [0], [0], [1], [0, 0, 1, 1], [], []>} : vector<128x192xbf16>, vector<192x64xbf16>, vector<128x64xf32> -> vector<128x64xf32>
    %79 = arith.addf %64, %78 : vector<128x64xf32>
    %c1_i32_38 = arith.constant 1 : i32
    %80 = tpu.dynamic_rotate %16 by %c1_i32_38 dim 0 : vector<128x64xf32>, i32 -> vector<128x64xf32>
    %81 = vector.broadcast %62 : vector<128x1xf32> to vector<128x64xf32>
    %82 = arith.mulf %80, %81 : vector<128x64xf32>
    %83 = arith.truncf %82 : vector<128x64xf32> to vector<128x64xbf16>
    %c127_i32_39 = arith.constant 127 : i32
    %84 = tpu.dynamic_rotate %16 by %c127_i32_39 dim 0 : vector<128x64xf32>, i32 -> vector<128x64xf32>
    %85 = vector.broadcast %63 : vector<128x1xf32> to vector<128x64xf32>
    %86 = arith.mulf %84, %85 : vector<128x64xf32>
    %87 = arith.truncf %86 : vector<128x64xf32> to vector<128x64xbf16>
    %88 = tpu.concatenate %83, %17, %87 in 1 : vector<128x64xbf16>, vector<128x64xbf16>, vector<128x64xbf16> -> vector<128x192xbf16>
    %c192 = arith.constant 192 : index
    %c0_40 = arith.constant 0 : index
    %89 = vector.load %arg8[%c192, %c0_40] : memref<576x64xbf16, #tpu.memory_space<vmem>>, vector<192x64xbf16>
    %cst_41 = arith.constant dense<0.000000e+00> : vector<128x64xf32>
    %90 = tpu.matmul %88, %89, %cst_41 {dimension_numbers = #tpu.dot_dimension_numbers<[1], [0], [0], [1], [0, 0, 1, 1], [], []>} : vector<128x192xbf16>, vector<192x64xbf16>, vector<128x64xf32> -> vector<128x64xf32>
    %91 = arith.addf %79, %90 : vector<128x64xf32>
    %c2 = arith.constant 2 : index
    %c0_42 = arith.constant 0 : index
    %c0_43 = arith.constant 0 : index
    %92 = vector.load %arg14[%c2, %c0_42, %c0_43] : memref<10x16x64xbf16, #tpu.memory_space<vmem>>, vector<8x16x64xbf16>
    %93 = vector.shape_cast %92 : vector<8x16x64xbf16> to vector<128x64xbf16>
    %94 = arith.extf %93 : vector<128x64xbf16> to vector<128x64xf32>
    %c1_i32_44 = arith.constant 1 : i32
    %95 = tpu.dynamic_rotate %94 by %c1_i32_44 dim 0 : vector<128x64xf32>, i32 -> vector<128x64xf32>
    %96 = vector.broadcast %62 : vector<128x1xf32> to vector<128x64xf32>
    %97 = arith.mulf %95, %96 : vector<128x64xf32>
    %98 = arith.truncf %97 : vector<128x64xf32> to vector<128x64xbf16>
    %c127_i32_45 = arith.constant 127 : i32
    %99 = tpu.dynamic_rotate %94 by %c127_i32_45 dim 0 : vector<128x64xf32>, i32 -> vector<128x64xf32>
    %100 = vector.broadcast %63 : vector<128x1xf32> to vector<128x64xf32>
    %101 = arith.mulf %99, %100 : vector<128x64xf32>
    %102 = arith.truncf %101 : vector<128x64xf32> to vector<128x64xbf16>
    %103 = tpu.concatenate %98, %93, %102 in 1 : vector<128x64xbf16>, vector<128x64xbf16>, vector<128x64xbf16> -> vector<128x192xbf16>
    %c384 = arith.constant 384 : index
    %c0_46 = arith.constant 0 : index
    %104 = vector.load %arg8[%c384, %c0_46] : memref<576x64xbf16, #tpu.memory_space<vmem>>, vector<192x64xbf16>
    %cst_47 = arith.constant dense<0.000000e+00> : vector<128x64xf32>
    %105 = tpu.matmul %103, %104, %cst_47 {dimension_numbers = #tpu.dot_dimension_numbers<[1], [0], [0], [1], [0, 0, 1, 1], [], []>} : vector<128x192xbf16>, vector<192x64xbf16>, vector<128x64xf32> -> vector<128x64xf32>
    %106 = arith.addf %91, %105 : vector<128x64xf32>
    %c0_48 = arith.constant 0 : index
    %c0_49 = arith.constant 0 : index
    %107 = vector.load %arg9[%c0_48, %c0_49] : memref<1x64xf32, #tpu.memory_space<vmem>>, vector<1x64xf32>
    %108 = vector.broadcast %107 : vector<1x64xf32> to vector<128x64xf32>
    %109 = arith.addf %106, %108 : vector<128x64xf32>
    %c0_50 = arith.constant 0 : index
    %c0_51 = arith.constant 0 : index
    %c0_52 = arith.constant 0 : index
    %c0_53 = arith.constant 0 : index
    %110 = vector.load %arg10[%c0_50, %c0_51, %c0_52, %c0_53] : memref<1x8x16x32xf32, #tpu.memory_space<vmem>>, vector<1x8x16x32xf32>
    %111 = vector.shape_cast %110 : vector<1x8x16x32xf32> to vector<8x16x32xf32>
    %112 = arith.truncf %111 : vector<8x16x32xf32> to vector<8x16x32xbf16>
    %113 = vector.shape_cast %112 : vector<8x16x32xbf16> to vector<128x32xbf16>
    %c0_54 = arith.constant 0 : index
    %c0_55 = arith.constant 0 : index
    %114 = vector.load %arg11[%c0_54, %c0_55] : memref<32x64xbf16, #tpu.memory_space<vmem>>, vector<32x64xbf16>
    %cst_56 = arith.constant dense<0.000000e+00> : vector<128x64xf32>
    %115 = tpu.matmul %113, %114, %cst_56 {dimension_numbers = #tpu.dot_dimension_numbers<[1], [0], [0], [1], [0, 0, 1, 1], [], []>} : vector<128x32xbf16>, vector<32x64xbf16>, vector<128x64xf32> -> vector<128x64xf32>
    %116 = arith.addf %109, %115 : vector<128x64xf32>
    %c0_57 = arith.constant 0 : index
    %c0_58 = arith.constant 0 : index
    %117 = vector.load %arg12[%c0_57, %c0_58] : memref<1x64xf32, #tpu.memory_space<vmem>>, vector<1x64xf32>
    %118 = vector.broadcast %117 : vector<1x64xf32> to vector<128x64xf32>
    %119 = arith.addf %116, %118 : vector<128x64xf32>
    %120 = vector.shape_cast %119 : vector<128x64xf32> to vector<8x16x64xf32>
    %c0_59 = arith.constant 0 : index
    %c0_60 = arith.constant 0 : index
    %c0_61 = arith.constant 0 : index
    %c0_62 = arith.constant 0 : index
    %121 = vector.load %arg13[%c0_59, %c0_60, %c0_61, %c0_62] : memref<1x8x16x64xf32, #tpu.memory_space<vmem>>, vector<1x8x16x64xf32>
    %122 = vector.shape_cast %121 : vector<1x8x16x64xf32> to vector<8x16x64xf32>
    %123 = vector.shape_cast %120 : vector<8x16x64xf32> to vector<1x8x16x64xf32>
    tpu.vector_store %arg13[%c0_59, %c0_60, %c0_61, %c0_62], %123 {strides = array<i32>} : memref<1x8x16x64xf32, #tpu.memory_space<vmem>>, vector<1x8x16x64xf32>,
    return
  }
  func.func @transform_0(%arg0: i32, %arg1: i32) -> (i32, i32, i32, i32) {
    %c0_i32 = arith.constant 0 : i32
    %c0_i32_0 = arith.constant 0 : i32
    %c0_i32_1 = arith.constant 0 : i32
    return %arg0, %arg1, %c0_i32, %c0_i32_0 : i32, i32, i32, i32
  }
  func.func @transform_1(%arg0: i32, %arg1: i32) -> (i32, i32, i32, i32) {
    %c2_i32 = arith.constant 2 : i32
    %0 = arith.muli %arg0, %c2_i32 : i32
    %1 = arith.addi %0, %arg1 : i32
    %c0_i32 = arith.constant 0 : i32
    %c0_i32_0 = arith.constant 0 : i32
    %c0_i32_1 = arith.constant 0 : i32
    %c0_i32_2 = arith.constant 0 : i32
    return %1, %c0_i32, %c0_i32_0, %c0_i32_1 : i32, i32, i32, i32
  }
  func.func @transform_2(%arg0: i32, %arg1: i32) -> (i32, i32, i32) {
    %c0_i32 = arith.constant 0 : i32
    %c0_i32_0 = arith.constant 0 : i32
    %c0_i32_1 = arith.constant 0 : i32
    return %arg0, %c0_i32, %c0_i32_0 : i32, i32, i32
  }
  func.func @transform_3(%arg0: i32, %arg1: i32) -> (i32, i32, i32) {
    %c0_i32 = arith.constant 0 : i32
    %c0_i32_0 = arith.constant 0 : i32
    %c0_i32_1 = arith.constant 0 : i32
    return %arg0, %c0_i32, %c0_i32_0 : i32, i32, i32
  }
  func.func @transform_4(%arg0: i32, %arg1: i32) -> (i32, i32) {
    %c0_i32 = arith.constant 0 : i32
    %c0_i32_0 = arith.constant 0 : i32
    %c0_i32_1 = arith.constant 0 : i32
    return %c0_i32, %c0_i32_0 : i32, i32
  }
  func.func @transform_5(%arg0: i32, %arg1: i32) -> (i32, i32) {
    %c0_i32 = arith.constant 0 : i32
    %c0_i32_0 = arith.constant 0 : i32
    %c0_i32_1 = arith.constant 0 : i32
    return %c0_i32, %c0_i32_0 : i32, i32
  }
  func.func @transform_6(%arg0: i32, %arg1: i32) -> (i32, i32) {
    %c0_i32 = arith.constant 0 : i32
    %c0_i32_0 = arith.constant 0 : i32
    %c0_i32_1 = arith.constant 0 : i32
    return %c0_i32, %c0_i32_0 : i32, i32
  }
  func.func @transform_7(%arg0: i32, %arg1: i32) -> (i32, i32) {
    %c0_i32 = arith.constant 0 : i32
    %c0_i32_0 = arith.constant 0 : i32
    %c0_i32_1 = arith.constant 0 : i32
    return %c0_i32, %c0_i32_0 : i32, i32
  }
  func.func @transform_8(%arg0: i32, %arg1: i32) -> (i32, i32, i32, i32) {
    %c0_i32 = arith.constant 0 : i32
    %c0_i32_0 = arith.constant 0 : i32
    %c0_i32_1 = arith.constant 0 : i32
    return %arg0, %arg1, %c0_i32, %c0_i32_0 : i32, i32, i32, i32
  }
  func.func @transform_9(%arg0: i32, %arg1: i32) -> (i32, i32) {
    %c0_i32 = arith.constant 0 : i32
    %c0_i32_0 = arith.constant 0 : i32
    %c0_i32_1 = arith.constant 0 : i32
    return %c0_i32, %c0_i32_0 : i32, i32
  }
  func.func @transform_10(%arg0: i32, %arg1: i32) -> (i32, i32) {
    %c0_i32 = arith.constant 0 : i32
    %c0_i32_0 = arith.constant 0 : i32
    %c0_i32_1 = arith.constant 0 : i32
    return %c0_i32, %c0_i32_0 : i32, i32
  }
  func.func @transform_11(%arg0: i32, %arg1: i32) -> (i32, i32, i32, i32) {
    %c0_i32 = arith.constant 0 : i32
    %c0_i32_0 = arith.constant 0 : i32
    %c0_i32_1 = arith.constant 0 : i32
    return %arg0, %arg1, %c0_i32, %c0_i32_0 : i32, i32, i32, i32
  }
}

</mosaic_0001>

<bundles_post_ra>
// kernel: residual_block_pallas.2
= control target key start
LH: loop header
LB: loop body
LE: loop exit
PB: predicated region body
PF: predicated region fallthrough
CT: control target
= control target key end

     0   :  { %s2868_s27 = smov 0   ;;  %s2870_s28 = smov 0   ;;  %s4693_s0 = inlined_call_operand.vmem [shape: f32[2,16,16,32], index: 0, kind: input, shape index: {}]   ;;  %s4694_s1 = inlined_call_operand.vmem [shape: f32[4,2,16,32], index: 1, kind: input, shape index: {}]   ;;  %s4695_s2 = inlined_call_operand.vmem [shape: f32[2,1,32], index: 2, kind: input, shape index: {}]   ;;  %s4696_s3 = inlined_call_operand.vmem [shape: f32[2,1,32], index: 3, kind: input, shape index: {}]   ;;  %s4697_s4 = inlined_call_operand.vmem [shape: f32[128,1], index: 4, kind: input, shape index: {}]   ;;  %s4698_s5 = inlined_call_operand.vmem [shape: f32[128,1], index: 5, kind: input, shape index: {}]   ;;  %s4699_s6 = inlined_call_operand.vmem [shape: bf16[288,64], index: 6, kind: input, shape index: {}]   ;;  %s4700_s7 = inlined_call_operand.vmem [shape: f32[1,64], index: 7, kind: input, shape index: {}]   ;;  %s4701_s8 = inlined_call_operand.vmem [shape: f32[2,16,16,64], index: 8, kind: output, shape index: {}]  }
   0x1   :  { %s2872_s29 = smov 0   ;;  %s2874_s30 = smov 0  }
   0x2   :  { %s2876_s9 = smov 0  }
   0x3 LB: > { %s27_s10 = sadd.s32 1, %s2810_s29  ;;  %s30_s11 = sadd.s32 1, %s2814_s30  ;;  %s2818_s9 = sphi %s2876_s9, %s18_s9   ;;  %s2814_s30 = sphi %s2874_s30, %s4959_s30   ;;  %s2810_s29 = sphi %s2872_s29, %s4958_s29   ;;  %s2806_s28 = sphi %s2870_s28, %s4957_s28   ;;  %s2802_s27 = sphi %s2868_s27, %s4956_s27  }
   0x4   : > { %p28_p0 = scmp.ge.s32.totalorder %s27_s10, 2  ;;  %p2336_p1 = scmp.ge.s32.totalorder %s2818_s9, 1 }
   0x5   : > { %p318_p2 = scmp.lt.s32.totalorder %s2818_s9, 5 }
   0x6   : > { %s4961_s10 = smov (%p28_p0, %s27_s10), 0  ;;  %s4963_s11 = smov (!%p28_p0, %s30_s11), %s2814_s30 }
   0x7   : > { %p319_p3 = pnand %p2336_p1, %p318_p2  ;;  %p32_p4 = scmp.ge.s32.totalorder %s4963_s11, 2 }
   0x9   : > { %s4965_s11 = smov (%p32_p4, %s4963_s11), 0  ;;  %322 = sbr.rel (%p319_p3) target bundleno = 541 (0x21d), region = 52 }
   0xa   : > { %4746 = sst [smem:[#allocation3_spill]] %s4965_s11 }
   0xe   : > { %v761_v0 = vld [vmem:[%s4698_s5 + $0x10] sm:$0xff]  ;;  %v759_v1 = vld [vmem:[%s4698_s5] sm:$0xff]  ;;  %s2337_s16 = sshll.u32 %s2802_s27, 3  ;;  %p376_p5 = scmp.lt.s32.totalorder %s2806_s28, 1  ;;  %v2820_v2 = vmov 0   ;;  %v762_v3 = vld [vmem:[%s4698_s5 + $0x18] sm:$0xff] }
   0xf   : > { %2656 = vset.pattern.permute.xlu1 %v2820_v2  ;;  %2655 = vset.pattern.permute.xlu0 %v2820_v2  ;;  %p378_p6 = scmp.lt.s32.totalorder %s2337_s16, 15  ;;  %v760_v4 = vld [vmem:[%s4698_s5 + $0x8] sm:$0xff]  ;;  %s2341_s18 = sshll.u32 %s2806_s28, 1  ;;  %v763_v6 = vld [vmem:[%s4698_s5 + $0x20] sm:$0xff]  ;;  %v766_v12 = vld [vmem:[%s4698_s5 + $0x38] sm:$0xff]  ;;  %vm657_vm0 = vcmask 257024  }
  0x10   : > { %991 = vperm.xlu1 %2656, %v761_v0   ;;  %981 = vperm.xlu0 %2655, %v759_v1   ;;  %s377_s17 = scalar_select %p376_p5, %s2806_s28, 1  ;;  %v764_v5 = vld [vmem:[%s4698_s5 + $0x28] sm:$0xff]  ;;  %v765_v17 = vld [vmem:[%s4698_s5 + $0x30] sm:$0xff]  ;;  %v767_v27 = vld [vmem:[%s4698_s5 + $0x40] sm:$0xff]  ;;  %vm1163_vm3 = vcmask 261120   ;;  %vm1188_vm4 = vcmask 523264  }
  0x11   : > { %s4967_s16 = smov (!%p378_p6, %s2337_s16), 15  ;;  %s387_s23 = sadd.s32 %s2802_s27, %s2341_s18  ;;  %v768_v26 = vld [vmem:[%s4698_s5 + $0x48] sm:$0xff]  ;;  %v770_v46 = vld [vmem:[%s4698_s5 + $0x58] sm:$0xff]  ;;  %v769_v47 = vld [vmem:[%s4698_s5 + $0x50] sm:$0xff]  ;;  %vm1457_vm5 = vcmask 785408  }
  0x12   : > { %s2339_s22 = sshll.u32 %s377_s17, 5  ;;  %s397_s25 = scalar_lea.vmem %s4695_s2, %s377_s17  ;;  %v772_v0 = vld [vmem:[%s4698_s5 + $0x68] sm:$0xff]  ;;  %v771_v1 = vld [vmem:[%s4698_s5 + $0x60] sm:$0xff] }
  0x13   : > { %s2338_s26 = sshll.u32 %s4967_s16, 1  ;;  %s400_s14 = scalar_lea.vmem %s4696_s3, %s377_s17  ;;  %v2941_v7 = vld [vmem:[%s397_s25] ss:$0 sm:$0xff] }
  0x14   : > { %996 = vperm.xlu1 %2656, %v762_v3   ;;  %986 = vperm.xlu0 %2655, %v760_v4   ;;  %s2923_s15 = sadd.s32 %s2339_s22, %s2338_s26  ;;  %v2943_v8 = vld [vmem:[%s400_s14] ss:$0 sm:$0xff]  ;;  %p388_p7 = scmp.lt.s32.totalorder %s387_s23, 3 }
  0x15   : > { %s2340_s16 = sshll.u32 %s2923_s15, 3  ;;  %p595_p8 = scmp.gt.s32.totalorder %s2802_s27, 0 }
  0x16   : > { %s2939_s12 = scalar_lea.vmem %s4693_s0, %s2340_s16  ;;  %s4969_s23 = smov (!%p388_p7, %s387_s23), 3 }
  0x17   : > { %v417_v9 = vld [vmem:[%s2939_s12 + $0x10] sm:$0xff]  ;;  %v418_v10 = vld [vmem:[%s2939_s12 + $0x18] sm:$0xff]  ;;  %v415_v11 = vld [vmem:[%s2939_s12] sm:$0xff]  ;;  %s2453_s26 = sshll.u32 %s4969_s23, 5  ;;  %s2821_s11 = smov 32  }
  0x18   : > { %1006 = vperm.xlu1 %2656, %v764_v5   ;;  %1001 = vperm.xlu0 %2655, %v763_v6   ;;  %v439_v13 = vmul.f32 %v2941_v7, %v417_v9  ;;  %v440_v14 = vmul.f32 %v2941_v7, %v418_v10  ;;  %v416_v15 = vld [vmem:[%s2939_s12 + $0x8] sm:$0xff]  ;;  %v437_v16 = vmul.f32 %v2941_v7, %v415_v11  ;;  %v419_v19 = vld [vmem:[%s2939_s12 + $0x20] sm:$0xff]  ;;  %v421_v25 = vld [vmem:[%s2939_s12 + $0x30] sm:$0xff]  ;;  %s2985_s24 = scalar_lea.vmem %s4694_s1, %s2453_s26  ;;  %p598_p9 = scmp.lt.s32.totalorder %s2802_s27, 1 }
  0x19   : > { %v438_v18 = vmul.f32 %v2941_v7, %v416_v15  ;;  %v420_v20 = vld [vmem:[%s2939_s12 + $0x28] sm:$0xff]  ;;  %v441_v24 = vmul.f32 %v2941_v7, %v419_v19  ;;  %v422_v30 = vld [vmem:[%s2939_s12 + $0x38] sm:$0xff]  ;;  %v443_v31 = vmul.f32 %v2941_v7, %v421_v25  ;;  %v601_v38 = vld [vmem:[%s2985_s24] sm:$0xff]  ;;  %s3106_s19 = scalar_select %p595_p8, 1, 0 }
  0x1a   : > { %v2962_v21 = vadd.f32 %v2943_v8, %v439_v13  ;;  %v2965_v22 = vadd.f32 %v2943_v8, %v440_v14  ;;  %v2968_v23 = vadd.f32 %v2943_v8, %v437_v16  ;;  %v442_v29 = vmul.f32 %v2941_v7, %v420_v20  ;;  %v602_v39 = vld [vmem:[%s2985_s24 + $0x8] sm:$0xff]  ;;  %v423_v41 = vld [vmem:[%s2939_s12 + $0x40] sm:$0xff]  ;;  %v425_v56 = vld [vmem:[%s2939_s12 + $0x50] sm:$0xff]  ;;  %s599_s27 = scalar_select %p598_p9, 1, 0 }
  0x1b   : > { %v2979_v28 = vadd.f32 %v2943_v8, %v438_v18  ;;  %v2993_v35 = vadd.f32 %v2943_v8, %v441_v24  ;;  %v444_v40 = vmul.f32 %v2941_v7, %v422_v30  ;;  %v603_v43 = vmul.f32 %v2941_v7, %v601_v38  ;;  %v424_v45 = vld [vmem:[%s2939_s12 + $0x48] sm:$0xff]  ;;  %v427_v51 = vld [vmem:[%s2939_s12 + $0x60] sm:$0xff]  ;;  %v426_v57 = vld [vmem:[%s2939_s12 + $0x58] sm:$0xff]  ;;  %s597_s28 = scvt.s32.f32 %s3106_s19 }
  0x1c   : > { %1016 = vperm.xlu1 %2656, %v766_v12   ;;  %1011 = vperm.xlu0 %2655, %v765_v17   ;;  %v2352_v32 = vmul.f32 -1.442695, %v2962_v21  ;;  %v2353_v33 = vmul.f32 -1.442695, %v2965_v22  ;;  %v2350_v34 = vmul.f32 -1.442695, %v2968_v23  ;;  %v2997_v37 = vadd.f32 %v2943_v8, %v442_v29  ;;  %s600_s17 = scvt.s32.f32 %s599_s27 }
  0x1d   : > { %v2351_v36 = vmul.f32 -1.442695, %v2979_v28  ;;  %v2354_v42 = vmul.f32 -1.442695, %v2993_v35  ;;  %v604_v44 = vmul.f32 %v2941_v7, %v602_v39  ;;  %v3015_v49 = vadd.f32 %v2943_v8, %v443_v31  ;;  %v428_v55 = vld [vmem:[%s2939_s12 + $0x68] sm:$0xff]  ;;  %v2369_v13 = vld [vmem:[%s2985_s24 + $0x18] sm:$0xff] }
  0x1e   : > { %2700 = vpow2.f32 %v2352_v32  ;;  %v2355_v48 = vmul.f32 -1.442695, %v2997_v37  ;;  %v3018_v50 = vadd.f32 %v2943_v8, %v444_v40  ;;  %v3022_v52 = vadd.f32 %v2943_v8, %v603_v43  ;;  %v774_v16 = vld [vmem:[%s4698_s5 + $0x78] sm:$0xff]  ;;  %v773_v17 = vld [vmem:[%s4698_s5 + $0x70] sm:$0xff]  ;;  %v744_v32 = vld [vmem:[%s4697_s4 + $0x8] sm:$0xff]  ;;  %s2822_s27 = smov 64  }
  0x1f   : > { %2702 = vpow2.f32 %v2353_v33  ;;  %v3025_v53 = vadd.f32 %v2943_v8, %v604_v44  ;;  %v445_v54 = vmul.f32 %v2941_v7, %v423_v41  ;;  %v2356_v58 = vmul.f32 -1.442695, %v3015_v49  ;;  %v743_v33 = vld [vmem:[%s4697_s4] sm:$0xff]  ;;  %v746_v40 = vld [vmem:[%s4697_s4 + $0x18] sm:$0xff]  ;;  %v745_v41 = vld [vmem:[%s4697_s4 + $0x10] sm:$0xff] }
  0x20   : > { %1026 = vperm.xlu1 %2656, %v768_v26   ;;  %1021 = vperm.xlu0 %2655, %v767_v27   ;;  %2704 = vpow2.f32 %v2350_v34  ;;  %v2357_v59 = vmul.f32 -1.442695, %v3018_v50  ;;  %v446_v60 = vmul.f32 %v2941_v7, %v424_v45  ;;  %v2366_v61 = vmul.f32 -1.442695, %v3022_v52  ;;  %v429_v43 = vld [vmem:[%s2939_s12 + $0x70] sm:$0xff] }
  0x21   : > { %2706 = vpow2.f32 %v2351_v36  ;;  %v2367_v62 = vmul.f32 -1.442695, %v3025_v53  ;;  %v3037_v63 = vadd.f32 %v2943_v8, %v445_v54  ;;  %v449_v3 = vmul.f32 %v2941_v7, %v427_v51 }
  0x22   : > { %2708 = vpow2.f32 %v2354_v42  ;;  %v3046_v2 = vadd.f32 %v2943_v8, %v446_v60  ;;  %v450_v4 = vmul.f32 %v2941_v7, %v428_v55  ;;  %v447_v6 = vmul.f32 %v2941_v7, %v425_v56 }
  0x23   : > { %2710 = vpow2.f32 %v2355_v48  ;;  %v2358_v5 = vmul.f32 -1.442695, %v3037_v63  ;;  %v448_v9 = vmul.f32 %v2941_v7, %v426_v57  ;;  %v3055_v11 = vadd.f32 %v2943_v8, %v449_v3 }
  0x24   : > { %1036 = vperm.xlu1 %2656, %v770_v46   ;;  %1031 = vperm.xlu0 %2655, %v769_v47   ;;  %2712 = vpow2.f32 %v2366_v61  ;;  %v2359_v10 = vmul.f32 -1.442695, %v3046_v2  ;;  %v3058_v12 = vadd.f32 %v2943_v8, %v450_v4  ;;  %v3062_v14 = vadd.f32 %v2943_v8, %v447_v6  ;;  %v430_v46 = vld [vmem:[%s2939_s12 + $0x78] sm:$0xff] }
  0x25   : > { %2714 = vpow2.f32 %v2367_v62  ;;  %v3065_v15 = vadd.f32 %v2943_v8, %v448_v9  ;;  %v2362_v18 = vmul.f32 -1.442695, %v3055_v11  ;;  %v629_v25 = vmul.f32 %v2369_v13, %v2941_v7  ;;  %v748_v62 = vld [vmem:[%s4697_s4 + $0x28] sm:$0xff] }
  0x26   : > { %2716 = vpow2.f32 %v2356_v58  ;;  %v2363_v19 = vmul.f32 -1.442695, %v3058_v12  ;;  %v2360_v20 = vmul.f32 -1.442695, %v3062_v14  ;;  %v451_v55 = vmul.f32 %v2941_v7, %v429_v43 }
  0x27   : > { %2718 = vpow2.f32 %v2357_v59  ;;  %v2361_v24 = vmul.f32 -1.442695, %v3065_v15  ;;  %v3079_v30 = vadd.f32 %v2943_v8, %v629_v25  ;;  %v452_v58 = vmul.f32 %v2941_v7, %v430_v46 }
  0x28   : > { %1046 = vperm.xlu1 %2656, %v772_v0   ;;  %1041 = vperm.xlu0 %2655, %v771_v1   ;;  %2720 = vpow2.f32 %v2358_v5  ;;  %v747_v0 = vld [vmem:[%s4697_s4 + $0x20] sm:$0xff]  ;;  %v823_v3 = vlaneseq  ;;  %v3109_v6 = vadd.f32 %v2943_v8, %v451_v55 }
  0x29   : > { %2722 = vpow2.f32 %v2359_v10  ;;  %v3112_v13 = vadd.f32 %v2943_v8, %v452_v58 }
  0x2a   : > { %2724 = vpow2.f32 %v2362_v18  ;;  %v3121_v25 = vshrl.u32 %v823_v3, 7 }
  0x2b   : > { %v2701_v26 = vpop.eup %2700  ;;  %2726 = vpow2.f32 %v2363_v19  ;;  %v750_v19 = vld [vmem:[%s4697_s4 + $0x38] sm:$0xff] }
  0x2c   : > { %v2703_v27 = vpop.eup %2702  ;;  %1056 = vperm.xlu1 %2656, %v774_v16   ;;  %1051 = vperm.xlu0 %2655, %v773_v17   ;;  %v525_v29 = vadd.f32 1.0, %v2701_v26  ;;  %2728 = vpow2.f32 %v2360_v20  ;;  %v749_v20 = vld [vmem:[%s4697_s4 + $0x30] sm:$0xff]  ;;  %vm962_vm1 = vcmp.lt.s32.totalorder %v3121_v25, 7  ;;  %vm825_vm2 = vcmp.lt.s32.totalorder %v3121_v25, 1 }
  0x2d   : > { %v2705_v31 = vpop.eup %2704  ;;  %v526_v34 = vadd.f32 1.0, %v2703_v27  ;;  %2730 = vpow2.f32 %v2361_v24 }
  0x2e   : > { %v2707_v36 = vpop.eup %2706  ;;  %2732 = vrcp.f32 %v525_v29  ;;  %v523_v38 = vadd.f32 1.0, %v2705_v31  ;;  %v2364_v29 = vmul.f32 -1.442695, %v3109_v6 }
  0x2f   : > { %v2709_v39 = vpop.eup %2708  ;;  %2734 = vrcp.f32 %v526_v34  ;;  %v524_v42 = vadd.f32 1.0, %v2707_v36 }
  0x30   : > { %v2711_v44 = vpop.eup %2710  ;;  %849 = vperm.xlu1 %2656, %v744_v32   ;;  %844 = vperm.xlu0 %2655, %v743_v33   ;;  %2736 = vrcp.f32 %v523_v38  ;;  %v527_v45 = vadd.f32 1.0, %v2709_v39  ;;  %v2365_v33 = vmul.f32 -1.442695, %v3112_v13 }
  0x31   : > { %v2713_v47 = vpop.eup %2712  ;;  %2738 = vrcp.f32 %v524_v42  ;;  %v528_v48 = vadd.f32 1.0, %v2711_v44 }
  0x32   : > { %v2715_v51 = vpop.eup %2714  ;;  %2740 = vrcp.f32 %v527_v45  ;;  %v613_v54 = vadd.f32 1.0, %v2713_v47 }
  0x33   : > { %v2717_v56 = vpop.eup %2716  ;;  %2742 = vrcp.f32 %v528_v48  ;;  %v614_v57 = vadd.f32 1.0, %v2715_v51 }
  0x34   : > { %v2719_v59 = vpop.eup %2718  ;;  %859 = vperm.xlu1 %2656, %v746_v40   ;;  %854 = vperm.xlu0 %2655, %v745_v41   ;;  %2744 = vrcp.f32 %v613_v54  ;;  %v529_v60 = vadd.f32 1.0, %v2717_v56  ;;  %v621_v40 = vstv %s597_s28 }
  0x35   : > { %v2721_v61 = vpop.eup %2720  ;;  %2746 = vrcp.f32 %v614_v57  ;;  %v530_v1 = vadd.f32 1.0, %v2719_v59  ;;  %v751_v59 = vld [vmem:[%s4697_s4 + $0x40] sm:$0xff] }
  0x36   : > { %v2723_v4 = vpop.eup %2722  ;;  %2748 = vrcp.f32 %v529_v60  ;;  %v531_v5 = vadd.f32 1.0, %v2721_v61 }
  0x37   : > { %v2725_v9 = vpop.eup %2724  ;;  %2750 = vrcp.f32 %v530_v1  ;;  %v532_v10 = vadd.f32 1.0, %v2723_v4 }
  0x38   : > { %v2727_v16 = vpop.eup %2726  ;;  %869 = vperm.xlu1 %2656, %v748_v62   ;;  %864 = vperm.xlu0 %2655, %v747_v0   ;;  %2752 = vrcp.f32 %v531_v5  ;;  %v535_v17 = vadd.f32 1.0, %v2725_v9  ;;  %v752_v5 = vld [vmem:[%s4697_s4 + $0x48] sm:$0xff] }
  0x39   : > { %v2729_v18 = vpop.eup %2728  ;;  %2754 = vrcp.f32 %v532_v10  ;;  %v536_v24 = vadd.f32 1.0, %v2727_v16 }
  0x3a   : > { %v2731_v26 = vpop.eup %2730  ;;  %2756 = vrcp.f32 %v535_v17  ;;  %v533_v27 = vadd.f32 1.0, %v2729_v18 }
  0x3b   : > { %v2733_v31 = vpop.eup %2732  ;;  %2758 = vrcp.f32 %v536_v24  ;;  %v534_v32 = vadd.f32 1.0, %v2731_v26 }
  0x3c   : > { %v2735_v34 = vpop.eup %2734  ;;  %879 = vperm.xlu1 %2656, %v750_v19   ;;  %874 = vperm.xlu0 %2655, %v749_v20   ;;  %v3126_v36 = vmul.f32 %v2733_v31, %v2962_v21  ;;  %2760 = vrcp.f32 %v533_v27 }
  0x3d   : > { %v2737_v38 = vpop.eup %2736  ;;  %v3129_v39 = vmul.f32 %v2735_v34, %v2965_v22  ;;  %2762 = vrcp.f32 %v534_v32 }
  0x3e   : > { %v2739_v41 = vpop.eup %2738  ;;  %v2460_v42 = vpack.c.bf16 %v3126_v36, %v3126_v36  ;;  %v3135_v43 = vmul.f32 %v2737_v38, %v2968_v23  ;;  %2764 = vpow2.f32 %v2364_v29  ;;  %v1275_v21 = vrot.slane %v3126_v36, 1  ;;  %v754_v38 = vld [vmem:[%s4697_s4 + $0x58] sm:$0xff] }
  0x3f   : > { %v2741_v44 = vpop.eup %2740  ;;  %v588_v45 = vpack.c.bf16 %v3129_v39, %v3126_v36  ;;  %v2461_v22 = vpack.c.bf16 %v3129_v39, %v3129_v39  ;;  %v3143_v46 = vmul.f32 %v2739_v41, %v2979_v28  ;;  %2766 = vpow2.f32 %v2365_v33 }
  0x40   : > { %v2743_v47 = vpop.eup %2742  ;;  %729 = vst.msk [vmem:[#allocation2 + $0x10] sm:$0xf] %vm657_vm0, %v2460_v42  ;;  %v2458_v23 = vpack.c.bf16 %v3135_v43, %v3135_v43  ;;  %v3149_v48 = vmul.f32 %v2741_v44, %v2993_v35  ;;  %v1276_v51 = vrot.slane %v3129_v39, 1  ;;  %v4714_v54 = vrot.slane %v3135_v43, 1 }
  0x41   : > { %v2745_v55 = vpop.eup %2744  ;;  %730 = vst.msk [vmem:[#allocation2 + $0x14] sm:$0xf] %vm657_vm0, %v2461_v22  ;;  %1331 = vrot.lane.b32.xlu0 %v588_v45, %s2821_s11  ;;  %v587_v28 = vpack.c.bf16 %v3143_v46, %v3135_v43  ;;  %v2459_v56 = vpack.c.bf16 %v3143_v46, %v3143_v46  ;;  %v3160_v57 = vmul.f32 %v2743_v47, %v2997_v37  ;;  %v1274_v35 = vrot.slane %v3143_v46, 1 }
  0x42   : > { %v2747_v58 = vpop.eup %2746  ;;  %727 = vst.msk [vmem:[#allocation2 + $0x8] sm:$0xf] %vm657_vm0, %v2458_v23  ;;  %v2462_v60 = vpack.c.bf16 %v3149_v48, %v3149_v48  ;;  %v619_v61 = vmul.f32 %v2745_v55, %v3022_v52  ;;  %v3172_v62 = vsel %vm962_vm1, %v1275_v21, %v1276_v51  ;;  %v1277_v37 = vrot.slane %v3149_v48, 1 }
  0x43   : > { %v2749_v0 = vpop.eup %2748  ;;  %728 = vst.msk [vmem:[#allocation2 + $0xc] sm:$0xf] %vm657_vm0, %v2459_v56  ;;  %1329 = vrot.lane.b32.xlu1 %v587_v28, %s2821_s11  ;;  %v2463_v1 = vpack.c.bf16 %v3160_v57, %v3160_v57  ;;  %v620_v3 = vmul.f32 %v2747_v58, %v3025_v53  ;;  %v3184_v52 = vsel %vm962_vm1, %v4714_v54, %v1274_v35  ;;  %v1278_v20 = vrot.slane %v3160_v57, 1 }
  0x44   : > { %4747 = vst [vmem:[#allocation4_spill] sm:$0xff] %v3184_v52  ;;  %v2751_v4 = vpop.eup %2750  ;;  %731 = vst.msk [vmem:[#allocation2 + $0x18] sm:$0xf] %vm657_vm0, %v2462_v60  ;;  %v622_v9 = vmul.f32 %v621_v40, %v619_v61  ;;  %v3191_v10 = vmul.f32 %v2749_v0, %v3015_v49  ;;  %v3195_v53 = vsel %vm962_vm1, %v1276_v51, %v1277_v37  ;;  %v2368_v51 = vld [vmem:[%s2985_s24 + $0x10] sm:$0xff]  ;;  %v758_v0 = vld [vmem:[%s4697_s4 + $0x78] sm:$0xff] }
  0x45   : > { %v3199_v16 = vsel %vm962_vm1, %v1274_v35, %v1275_v21  ;;  %v2753_v17 = vpop.eup %2752  ;;  %884 = vperm.xlu0 %2655, %v751_v59   ;;  %732 = vst.msk [vmem:[#allocation2 + $0x1c] sm:$0xf] %vm657_vm0, %v2463_v1  ;;  %v623_v18 = vmul.f32 %v621_v40, %v620_v3  ;;  %v3203_v19 = vmul.f32 %v2751_v4, %v3018_v50  ;;  %v756_v59 = vld [vmem:[%s4697_s4 + $0x68] sm:$0xff] }
  0x46   : > { %4748 = vst [vmem:[#allocation5_spill] sm:$0xff] %v3199_v16  ;;  %v2755_v49 = vpop.eup %2754  ;;  %v2454_v24 = vpack.c.bf16 %v622_v9, %v622_v9  ;;  %v2464_v26 = vpack.c.bf16 %v3191_v10, %v3191_v10  ;;  %v3209_v27 = vmul.f32 %v2753_v17, %v3037_v63  ;;  %v1279_v29 = vrot.slane %v3191_v10, 1 }
  0x47   : > { %v2757_v31 = vpop.eup %2756  ;;  %889 = vperm.xlu1 %2656, %v752_v5   ;;  %v2455_v32 = vpack.c.bf16 %v623_v18, %v623_v18  ;;  %v2465_v33 = vpack.c.bf16 %v3203_v19, %v3203_v19  ;;  %v3215_v50 = vmul.f32 %v2755_v49, %v3046_v2  ;;  %v3235_v41 = vsel %vm962_vm1, %v1277_v37, %v1278_v20  ;;  %v753_v37 = vld [vmem:[%s4697_s4 + $0x50] sm:$0xff] }
  0x48   : > { %v2759_v34 = vpop.eup %2758  ;;  %658 = vst.msk [vmem:[#allocation2] sm:$0xf] %vm657_vm0, %v2454_v24  ;;  %733 = vst.msk [vmem:[#allocation2 + $0x20] sm:$0xf] %vm657_vm0, %v2464_v26  ;;  %v2466_v63 = vpack.c.bf16 %v3209_v27, %v3209_v27  ;;  %v3225_v40 = vmul.f32 %v2757_v31, %v3055_v11  ;;  %v3231_v2 = vsel %vm962_vm1, %v1278_v20, %v1279_v29  ;;  %v3290_v1 = vld [vmem:[#allocation2 + $0x10] sm:$0xff]   ;;  %v3308_v24 = vstv %s600_s17  ;;  %s4618_s17 = scalar_lea.vmem %s4701_s8, %s2340_s16 }
  0x49   : > { %4749 = vst [vmem:[#allocation6_spill] sm:$0xff] %v3231_v2  ;;  %4750 = vst [vmem:[#allocation7_spill] sm:$0xff] %v3235_v41  ;;  %v2761_v42 = vpop.eup %2760  ;;  %v2467_v11 = vpack.c.bf16 %v3215_v50, %v3215_v50  ;;  %v589_v47 = vpack.c.bf16 %v3160_v57, %v3149_v48  ;;  %v3254_v28 = vmul.f32 %v2759_v34, %v3058_v12  ;;  %v4707_v9 = vunpack.c.l.bf16 %v3290_v1 }
  0x4a   : > { %659 = vst.msk [vmem:[#allocation2 + $0x4] sm:$0xf] %vm657_vm0, %v2455_v32  ;;  %734 = vst.msk [vmem:[#allocation2 + $0x24] sm:$0xf] %vm657_vm0, %v2465_v33  ;;  %v2763_v21 = vpop.eup %2762  ;;  %v3239_v44 = vld [vmem:[#allocation2 + $0x8] sm:$0xff]   ;;  %v2470_v45 = vpack.c.bf16 %v3225_v40, %v3225_v40  ;;  %v3249_v23 = vmul.f32 %v2761_v42, %v3062_v14  ;;  %v628_v35 = vmul.f32 %v2368_v51, %v2941_v7  ;;  %v4703_v17 = vunpack.c.h.bf16 %v3290_v1 }
  0x4b   : > { %735 = vst.msk [vmem:[#allocation2 + $0x28] sm:$0xf] %vm657_vm0, %v2466_v63  ;;  %v2765_v22 = vpop.eup %2764  ;;  %899 = vperm.xlu1 %2656, %v754_v38   ;;  %736 = vst.msk [vmem:[#allocation2 + $0x2c] sm:$0xf] %vm657_vm0, %v2467_v11  ;;  %1125 = vrot.lane.b32.xlu0 %v3239_v44, %s2821_s11  ;;  %v2471_v56 = vpack.c.bf16 %v3254_v28, %v3254_v28  ;;  %v3264_v14 = vmul.f32 %v2763_v21, %v3065_v15  ;;  %v4711_v20 = vunpack.c.h.bf16 %v3239_v44 }
  0x4c   : > { %v2767_v55 = vpop.eup %2766  ;;  %739 = vst.msk [vmem:[#allocation2 + $0x38] sm:$0xf] %vm657_vm0, %v2470_v45  ;;  %v2468_v58 = vpack.c.bf16 %v3249_v23, %v3249_v23  ;;  %v537_v7 = vadd.f32 1.0, %v2765_v22  ;;  %v3279_v61 = vadd.f32 %v2943_v8, %v628_v35  ;;  %v591_v3 = vpack.c.bf16 %v3215_v50, %v3209_v27  ;;  %v3295_v4 = vld [vmem:[#allocation2 + $0x18] sm:$0xff]  }
  0x4d   : > { %740 = vst.msk [vmem:[#allocation2 + $0x3c] sm:$0xf] %vm657_vm0, %v2471_v56  ;;  %v2469_v60 = vpack.c.bf16 %v3264_v14, %v3264_v14  ;;  %v538_v15 = vadd.f32 1.0, %v2767_v55  ;;  %v593_v5 = vpack.c.bf16 %v3254_v28, %v3225_v40  ;;  %v4710_v49 = vunpack.c.l.bf16 %v3239_v44 }
  0x4e   : > { %737 = vst.msk [vmem:[#allocation2 + $0x30] sm:$0xf] %vm657_vm0, %v2468_v58  ;;  %2768 = vrcp.f32 %v537_v7  ;;  %v2370_v8 = vmul.f32 -1.442695, %v3279_v61  ;;  %v3311_v26 = vmul.f32 -1.442695, %v3079_v30  ;;  %v4702_v33 = vunpack.c.l.bf16 %v3295_v4 }
  0x4f   : > { %1333 = vrot.lane.b32.xlu1 %v589_v47, %s2821_s11  ;;  %738 = vst.msk [vmem:[#allocation2 + $0x34] sm:$0xf] %vm657_vm0, %v2469_v60  ;;  %2770 = vrcp.f32 %v538_v15  ;;  %v3315_v31 = vrot.slane %v4707_v9, 7  ;;  %v3319_v32 = vrot.slane %v4703_v17, 7  ;;  %v590_v34 = vpack.c.bf16 %v3203_v19, %v3191_v10  ;;  %v3354_v58 = vld [vmem:[#allocation2 + $0x18] sm:$0xff]   ;;  %v3395_v9 = vld [vmem:[#allocation2 + $0x10] sm:$0xff]  }
  0x50   : > { %2772 = vpow2.f32 %v2370_v8  ;;  %v3328_v63 = vrot.slane %v4711_v20, 7  ;;  %v3332_v42 = vrot.slane %v4710_v49, 7  ;;  %v4706_v21 = vunpack.c.h.bf16 %v3295_v4 }
  0x51   : > { %v3268_v12 = vld [vmem:[#allocation2] sm:$0xff]   ;;  %v3342_v22 = vrot.slane %v4702_v33, 7  ;;  %v1281_v33 = vrot.slane %v3209_v27, 1  ;;  %v1282_v20 = vrot.slane %v3215_v50, 1  ;;  %v4767_v52 = vunpack.c.h.bf16 %v3395_v9 }
  0x52   : > { %1123 = vrot.lane.b32.xlu0 %v3268_v12, %s2821_s11  ;;  %v3324_v38 = vld [vmem:[#allocation2 + $0x20] sm:$0xff]   ;;  %v4709_v11 = vunpack.c.l.bf16 %v3268_v12  ;;  %v4708_v45 = vunpack.c.h.bf16 %v3268_v12  ;;  %v3347_v51 = vrot.slane %v4706_v21, 7  ;;  %v3350_v56 = vld [vmem:[#allocation2 + $0x28] sm:$0xff]  }
  0x53   : > { %909 = vperm.xlu1 %2656, %v756_v59   ;;  %v4704_v47 = vunpack.c.l.bf16 %v3324_v38  ;;  %v4705_v55 = vunpack.c.h.bf16 %v3324_v38  ;;  %v4713_v17 = vunpack.c.h.bf16 %v3350_v56  ;;  %v3434_v54 = vsel %vm962_vm1, %v1281_v33, %v1282_v20  ;;  %v3470_v41 = vld [vmem:[#allocation2 + $0x20] sm:$0xff]  }
  0x54   : > { %v3358_v60 = vrot.slane %v4709_v11, 7  ;;  %v3362_v7 = vrot.slane %v4708_v45, 7  ;;  %4754 = vst [vmem:[#allocation11_spill] sm:$0xff] %v3434_v54 }
  0x55   : > { %v3366_v15 = vrot.slane %v4704_v47, 7  ;;  %v3374_v8 = vrot.slane %v4705_v55, 7  ;;  %v3386_v47 = vld [vmem:[#allocation2 + $0x38] sm:$0xff]  }
  0x56   : > { %894 = vperm.xlu0 %2655, %v753_v37   ;;  %v3304_v18 = vld [vmem:[#allocation2 + $0x30] sm:$0xff]   ;;  %v1280_v37 = vrot.slane %v3203_v19, 1 }
  0x57   : > { %919 = vperm.xlu1 %2656, %v758_v0   ;;  %4751 = vst [vmem:[#allocation8_spill] sm:$0xff] %v3304_v18 }
  0x58   : > { %v3399_v45 = vsel %vm962_vm1, %v1280_v37, %v1281_v33  ;;  %v3405_v11 = vsel %vm962_vm1, %v1279_v29, %v1280_v37  ;;  %v4716_v29 = vunpack.c.h.bf16 %v3386_v47  ;;  %v1283_v37 = vrot.slane %v3249_v23, 1 }
  0x59   : > { %4752 = vst [vmem:[#allocation9_spill] sm:$0xff] %v3399_v45  ;;  %4753 = vst [vmem:[#allocation10_spill] sm:$0xff] %v3405_v11  ;;  %v4718_v45 = vunpack.c.h.bf16 %v3304_v18 }
  0x5a   : > { %1127 = vrot.lane.b32.xlu0 %v3290_v1, %s2821_s11  ;;  %v3440_v11 = vrot.slane %v4716_v29, 7 }
  0x5b   : > { %1337 = vrot.lane.b32.xlu1 %v591_v3, %s2821_s11  ;;  %v2769_v59 = vpop.eup %2768  ;;  %v4712_v3 = vunpack.c.l.bf16 %v3350_v56 }
  0x5c   : > { %v2771_v0 = vpop.eup %2770 }
  0x5d   : > { %v3389_v55 = vmul.f32 %v2771_v0, %v3112_v13  ;;  %v3409_v13 = vrot.slane %v4712_v3, 7  ;;  %v4715_v0 = vunpack.c.l.bf16 %v3386_v47  ;;  %v2773_v35 = vpop.eup %2772  ;;  %v757_v3 = vld [vmem:[%s4697_s4 + $0x70] sm:$0xff] }
  0x5e   : > { %1129 = vrot.lane.b32.xlu0 %v3295_v4, %s2821_s11  ;;  %v638_v54 = vadd.f32 1.0, %v2773_v35 }
  0x5f   : > { %1341 = vrot.lane.b32.xlu1 %v593_v5, %s2821_s11  ;;  %v3378_v5 = vmul.f32 %v2769_v59, %v3109_v6  ;;  %v2473_v49 = vpack.c.bf16 %v3389_v55, %v3389_v55  ;;  %v3417_v59 = vrot.slane %v4713_v17, 7  ;;  %v3427_v21 = vrot.slane %v4715_v0, 7 }
  0x60   : > { %v3444_v0 = vsel %vm962_vm1, %v1282_v20, %v1283_v37  ;;  %v4717_v17 = vunpack.c.l.bf16 %v3304_v18  ;;  %2774 = vrcp.f32 %v638_v54 }
  0x61   : > { %v2472_v6 = vpack.c.bf16 %v3378_v5, %v3378_v5  ;;  %742 = vst.msk [vmem:[#allocation2 + $0x44] sm:$0xf] %vm657_vm0, %v2473_v49  ;;  %4755 = vst [vmem:[#allocation12_spill] sm:$0xff] %v3444_v0  ;;  %v1284_v49 = vrot.slane %v3264_v14, 1  ;;  %v1286_v0 = vrot.slane %v3254_v28, 1  ;;  %v1287_v35 = vrot.slane %v3378_v5, 1 }
  0x62   : > { %1335 = vrot.lane.b32.xlu0 %v590_v34, %s2821_s11  ;;  %v755_v34 = vld [vmem:[%s4697_s4 + $0x60] sm:$0xff]  ;;  %v3463_v2 = vrot.slane %v4717_v17, 7  ;;  %2776 = vpow2.f32 %v3311_v26  ;;  %v3498_v26 = vld [vmem:[#allocation2 + $0x28] sm:$0xff]  }
  0x63   : > { %1913 = vrot.lane.b32.xlu1 %v3304_v18, %s2821_s11  ;;  %741 = vst.msk [vmem:[#allocation2 + $0x40] sm:$0xf] %vm657_vm0, %v2472_v6  ;;  %v3436_v6 = vld [vmem:[#allocation2 + $0x30] sm:$0xff]   ;;  %v3458_v20 = vsel %vm962_vm1, %v1283_v37, %v1284_v49  ;;  %v1288_v37 = vrot.slane %v3389_v55, 1  ;;  %v1217_v18 = vrot.slane %v3135_v43, 7 }
  0x64   : > { %4757 = vst [vmem:[#allocation14_spill] sm:$0xff] %v3458_v20  ;;  %v4760_v54 = vunpack.c.h.bf16 %v3436_v6 }
  0x66   : > { %904 = vperm.xlu0 %2655, %v755_v34   ;;  %v1285_v34 = vrot.slane %v3225_v40, 1  ;;  %v3484_v20 = vrot.slane %v4760_v54, 7 }
  0x68   : > { %v3454_v29 = vsel %vm962_vm1, %v1284_v49, %v1285_v34  ;;  %v3474_v33 = vsel %vm962_vm1, %v1285_v34, %v1286_v0  ;;  %v4759_v49 = vunpack.c.l.bf16 %v3436_v6  ;;  %v3494_v34 = vsel %vm825_vm2, %v3358_v60, %v3362_v7 }
  0x69   : > { %4756 = vst [vmem:[#allocation13_spill] sm:$0xff] %v3454_v29  ;;  %4758 = vst [vmem:[#allocation15_spill] sm:$0xff] %v3474_v33  ;;  %v1218_v33 = vrot.slane %v3143_v46, 7  ;;  %v4766_v29 = vunpack.c.l.bf16 %v3395_v9  ;;  %v4721_v46 = vrot.slane %v3389_v55, 7 }
  0x6a   : > { %914 = vperm.xlu0 %2655, %v757_v3   ;;  %v3468_v3 = vrot.slane %v4718_v45, 7  ;;  %v3480_v17 = vrot.slane %v4759_v49, 7  ;;  %v3488_v45 = vsel %vm962_vm1, %v1286_v0, %v1287_v35  ;;  %4762 = vst [vmem:[#allocation17_spill] sm:$0xff] %v3494_v34  ;;  %v4763_v49 = vrot.slane %v3135_v43, 1 }
  0x6b   : > { %4761 = vst [vmem:[#allocation16_spill] sm:$0xff] %v3488_v45  ;;  %v3508_v0 = vsel %vm962_vm1, %v1287_v35, %v1288_v37  ;;  %v3516_v16 = vrot.slane %v4766_v29, 7  ;;  %v3524_v35 = vsel %vm825_vm2, %v1217_v18, %v1218_v33  ;;  %v3530_v43 = vsel %vm825_vm2, %v3440_v11, %v3358_v60 }
  0x6c   : > { %v3504_v54 = vsel %vm962_vm1, %v1288_v37, %v4763_v49  ;;  %4765 = vst [vmem:[#allocation19_spill] sm:$0xff] %v3508_v0  ;;  %v1754_v49 = vrot.slane %v4767_v52, 7  ;;  %4768 = vst [vmem:[#allocation20_spill] sm:$0xff] %v3524_v35  ;;  %v3537_v29 = vsel %vm825_vm2, %v3332_v42, %v3328_v63  ;;  %v1219_v60 = vrot.slane %v3126_v36, 7  ;;  %v2667_v36 = vld [vmem:[%s4699_s6 + $0x28] sm:$0xff]  }
  0x6d   : > { %4764 = vst [vmem:[#allocation18_spill] sm:$0xff] %v3504_v54  ;;  %v3520_v54 = vld [vmem:[#allocation2 + $0x38] sm:$0xff]   ;;  %4769 = vst [vmem:[#allocation21_spill] sm:$0xff] %v3530_v43  ;;  %v3553_v34 = vsel %vm825_vm2, %v4721_v46, %v1217_v18  ;;  %v1220_v52 = vrot.slane %v3129_v39, 7  ;;  %v4772_v37 = vunpack.c.l.bf16 %v3354_v58  ;;  %v4773_v43 = vunpack.c.h.bf16 %v3354_v58  ;;  %2544 = vmatprep.subr.bf16.mxu1 %v2667_v36 }
  0x6e   : > { %1131 = vrot.lane.b32.xlu0 %v3324_v38, %s2821_s11  ;;  %4770 = vst [vmem:[#allocation22_spill] sm:$0xff] %v3537_v29  ;;  %v3544_v45 = vsel %vm825_vm2, %v3516_v16, %v1754_v49  ;;  %v3570_v39 = vsel %vm825_vm2, %v3362_v7, %v3332_v42  ;;  %v3574_v18 = vsel %vm825_vm2, %v1218_v33, %v1219_v60  ;;  %v1221_v7 = vrot.slane %v3149_v48, 7 }
  0x6f   : > { %4771 = vst [vmem:[#allocation23_spill] sm:$0xff] %v3544_v45  ;;  %v1755_v29 = vrot.slane %v4772_v37, 7  ;;  %v1756_v35 = vrot.slane %v4773_v43, 7  ;;  %4774 = vst [vmem:[#allocation24_spill] sm:$0xff] %v3574_v18  ;;  %v3579_v37 = vsel %vm825_vm2, %v1219_v60, %v1220_v52  ;;  %v3593_v42 = vsel %vm825_vm2, %v3315_v31, %v3319_v32  ;;  %2545 = vmatpush3.bf16.msra.mxu1 %v2667_v36 }
  0x70   : > { %4776 = vst [vmem:[#allocation26_spill] sm:$0xff] %v3593_v42  ;;  %v1222_v33 = vrot.slane %v3160_v57, 7  ;;  %v4777_v60 = vunpack.c.l.bf16 %v3470_v41  ;;  %v4779_v0 = vunpack.c.h.bf16 %v3470_v41  ;;  %v3611_v48 = vsel %vm825_vm2, %v3328_v63, %v3315_v31 }
  0x71   : > { %v3583_v46 = vsel %vm825_vm2, %v1755_v29, %v1756_v35  ;;  %v3587_v45 = vsel %vm825_vm2, %v1754_v49, %v1755_v29  ;;  %v4778_v49 = vpack.c.bf16 %v3264_v14, %v3249_v23  ;;  %v3603_v29 = vld [vmem:[#allocation2 + $0x40] sm:$0xff]   ;;  %4780 = vst [vmem:[#allocation27_spill] sm:$0xff] %v3611_v48  ;;  %v3617_v57 = vsel %vm825_vm2, %v3342_v22, %v3347_v51 }
  0x72   : > { %1133 = vrot.lane.b32.xlu0 %v3350_v56, %s2821_s11  ;;  %4775 = vst [vmem:[#allocation25_spill] sm:$0xff] %v3587_v45  ;;  %v1757_v43 = vrot.slane %v4777_v60, 7  ;;  %v1758_v45 = vrot.slane %v4779_v0, 7  ;;  %4781 = vst [vmem:[#allocation28_spill] sm:$0xff] %v3617_v57  ;;  %v1223_v36 = vrot.slane %v3191_v10, 7  ;;  %v2668_v60 = vld [vmem:[%s4699_s6 + $0x20] sm:$0xff]   ;;  %v3625_v0 = vsel %vm825_vm2, %v1221_v7, %v1222_v33  ;;  %v2775_v57 = vpop.eup %2774 }
  0x73   : > { %4782 = vst [vmem:[#allocation29_spill] sm:$0xff] %v3625_v0  ;;  %v3629_v31 = vsel %vm825_vm2, %v1220_v52, %v1221_v7  ;;  %v4783_v48 = vunpack.c.l.bf16 %v3498_v26  ;;  %v4784_v0 = vunpack.c.h.bf16 %v3498_v26  ;;  %v3648_v52 = vsel %vm825_vm2, %v3319_v32, %v3342_v22  ;;  %2546 = vmatprep.subr.bf16.mxu1 %v2668_v60 }
  0x74   : > { %v3633_v63 = vsel %vm825_vm2, %v1756_v35, %v1757_v43  ;;  %v3638_v10 = vsel %vm825_vm2, %v1757_v43, %v1758_v45  ;;  %v2777_v35 = vpop.eup %2776  ;;  %v644_v7 = vmul.f32 %v2775_v57, %v3279_v61  ;;  %2547 = vmatpush3.bf16.msra.mxu1 %v2668_v60  ;;  %v3674_v57 = vsel %vm825_vm2, %v3347_v51, %v3366_v15 }
  0x75   : > { %v1759_v42 = vrot.slane %v4783_v48, 7  ;;  %v1760_v18 = vrot.slane %v4784_v0, 7  ;;  %v3658_v48 = vsel %vm825_vm2, %v1222_v33, %v1223_v36  ;;  %v639_v32 = vadd.f32 1.0, %v2777_v35  ;;  %v2669_v33 = vld [vmem:[%s4699_s6 + $0x58] sm:$0xff]  }
  0x76   : > { %1339 = vrot.lane.b32.xlu0 %v4778_v49, %s2821_s11  ;;  %v1224_v49 = vrot.slane %v3203_v19, 7  ;;  %v647_v60 = vmul.f32 %v3308_v24, %v644_v7  ;;  %v1225_v0 = vrot.slane %v3209_v27, 7  ;;  %v3693_v51 = vsel %vm825_vm2, %v3366_v15, %v3374_v8  ;;  %2516 = vmatprep.subr.bf16.mxu0 %v2669_v33 }
  0x77   : > { %v3664_v22 = vsel %vm825_vm2, %v1759_v42, %v1760_v18  ;;  %v3668_v61 = vsel %vm825_vm2, %v1758_v45, %v1759_v42  ;;  %v3687_v45 = vsel %vm825_vm2, %v1760_v18, %v3463_v2  ;;  %4785 = vst [vmem:[#allocation30_spill] sm:$0xff] %v3693_v51  ;;  %2778 = vrcp.f32 %v639_v32  ;;  %2517 = vmatpush3.bf16.msra.mxu0 %v2669_v33  ;;  %v2672_v33 = vld [vmem:[%s4699_s6 + $0x10] sm:$0xff]  }
  0x78   : > { %v3654_v43 = vsel %vm825_vm2, %v1223_v36, %v1224_v49  ;;  %v2670_v36 = vld [vmem:[%s4699_s6 + $0x18] sm:$0xff]   ;;  %v1226_v35 = vrot.slane %v3215_v50, 7  ;;  %v3701_v27 = vsel %vm825_vm2, %v3463_v2, %v3468_v3  ;;  %v2456_v18 = vpack.c.bf16 %v647_v60, %v647_v60 }
  0x79   : > { %4786 = vst [vmem:[#allocation31_spill] sm:$0xff] %v3701_v27  ;;  %2548 = vmatprep.subr.bf16.mxu1 %v2670_v36  ;;  %v3705_v7 = vsel %vm825_vm2, %v1224_v49, %v1225_v0  ;;  %v3711_v15 = vsel %vm825_vm2, %v3409_v13, %v3417_v59  ;;  %v1227_v50 = vrot.slane %v3249_v23, 7  ;;  %v1228_v49 = vrot.slane %v3264_v14, 7  ;;  %v2671_v23 = vld [vmem:[%s4699_s6 + $0x50] sm:$0xff]  }
  0x7a   : > { %1135 = vrot.lane.b32.xlu0 %v3436_v6, %s2821_s11  ;;  %4787 = vst [vmem:[#allocation32_spill] sm:$0xff] %v3711_v15  ;;  %2549 = vmatpush3.bf16.msra.mxu1 %v2670_v36  ;;  %v3718_v2 = vsel %vm825_vm2, %v1225_v0, %v1226_v35  ;;  %v4789_v32 = vunpack.c.l.bf16 %v3520_v54  ;;  %v4790_v42 = vunpack.c.h.bf16 %v3520_v54  ;;  %668 = vst.msk [vmem:[#allocation2 + $0x48] sm:$0xf] %vm657_vm0, %v2456_v18  ;;  %v1229_v36 = vrot.slane %v3225_v40, 7 }
  0x7b   : > { %4788 = vst [vmem:[#allocation33_spill] sm:$0xff] %v3718_v2  ;;  %v3736_v14 = vsel %vm825_vm2, %v3480_v17, %v3484_v20  ;;  %v1230_v0 = vrot.slane %v3254_v28, 7  ;;  %v4794_v18 = vunpack.c.l.bf16 %v3603_v29  ;;  %v4795_v27 = vunpack.c.h.bf16 %v3603_v29  ;;  %2518 = vmatprep.subr.bf16.mxu0 %v2671_v23  ;;  %2550 = vmatprep.subr.bf16.mxu1 %v2672_v33 }
  0x7c   : > { %v1763_v60 = vrot.slane %v4789_v32, 7  ;;  %v1764_v19 = vrot.slane %v4790_v42, 7  ;;  %4791 = vst [vmem:[#allocation34_spill] sm:$0xff] %v3736_v14  ;;  %v3742_v42 = vsel %vm825_vm2, %v1227_v50, %v1228_v49  ;;  %v3760_v28 = vsel %vm825_vm2, %v3374_v8, %v3409_v13  ;;  %2519 = vmatpush3.bf16.msra.mxu0 %v2671_v23  ;;  %v2675_v23 = vld [vmem:[%s4699_s6 + $0x40] sm:$0xff]  }
  0x7d   : > { %4792 = vst [vmem:[#allocation35_spill] sm:$0xff] %v3742_v42  ;;  %v1765_v15 = vrot.slane %v4794_v18, 7  ;;  %v1766_v2 = vrot.slane %v4795_v27, 7  ;;  %v3754_v40 = vsel %vm825_vm2, %v1229_v36, %v1230_v0  ;;  %4797 = vst [vmem:[#allocation38_spill] sm:$0xff] %v3760_v28  ;;  %v3764_v14 = vsel %vm825_vm2, %v1226_v35, %v1227_v50  ;;  %v2674_v35 = vld [vmem:[%s4699_s6 + $0x8] sm:$0xff]   ;;  %v4823_v42 = vld [vmem:[#allocation6_spill] sm:$0xff] }
  0x7e   : > { %1137 = vrot.lane.b32.xlu0 %v3386_v47, %s2821_s11  ;;  %v3746_v32 = vsel %vm825_vm2, %v1763_v60, %v1764_v19  ;;  %4796 = vst [vmem:[#allocation37_spill] sm:$0xff] %v3754_v40  ;;  %4798 = vst [vmem:[#allocation39_spill] sm:$0xff] %v3764_v14  ;;  %v3769_v27 = vsel %vm825_vm2, %v3468_v3, %v1763_v60  ;;  %v4800_v18 = vpack.c.bf16 %v3389_v55, %v3378_v5  ;;  %v2673_v3 = vld [vmem:[%s4699_s6 + $0x48] sm:$0xff]  }
  0x7f   : > { %4793 = vst [vmem:[#allocation36_spill] sm:$0xff] %v3746_v32  ;;  %4799 = vst [vmem:[#allocation40_spill] sm:$0xff] %v3769_v27  ;;  %v3777_v40 = vsel %vm825_vm2, %v1765_v15, %v1766_v2  ;;  %v3783_v8 = vsel %vm825_vm2, %v3427_v21, %v3440_v11  ;;  %v1231_v13 = vrot.slane %v3378_v5, 7  ;;  %2551 = vmatpush3.bf16.msra.mxu1 %v2672_v33  ;;  %2520 = vmatprep.subr.bf16.mxu0 %v2673_v3 }
  0x80   : > { %4801 = vst [vmem:[#allocation41_spill] sm:$0xff] %v3777_v40  ;;  %4802 = vst [vmem:[#allocation42_spill] sm:$0xff] %v3783_v8  ;;  %v3796_v50 = vsel %vm825_vm2, %v3417_v59, %v3480_v17  ;;  %v3800_v11 = vsel %vm825_vm2, %v1228_v49, %v1229_v36  ;;  %v3804_v5 = vsel %vm825_vm2, %v1764_v19, %v1765_v15  ;;  %v2676_v17 = vld [vmem:[%s4699_s6] sm:$0xff]   ;;  %v4807_v59 = vrot.slane %v3389_v55, 7  ;;  %v2677_v36 = vld [vmem:[%s4699_s6 + $0x38] sm:$0xff]  }
  0x81   : > { %4803 = vst [vmem:[#allocation43_spill] sm:$0xff] %v3796_v50  ;;  %4804 = vst [vmem:[#allocation44_spill] sm:$0xff] %v3800_v11  ;;  %v3810_v60 = vsel %vm825_vm2, %v3484_v20, %v3427_v21  ;;  %v3826_v15 = vsel %vm825_vm2, %v1230_v0, %v1231_v13  ;;  %2552 = vmatprep.subr.bf16.mxu1 %v2674_v35  ;;  %2521 = vmatpush3.bf16.msra.mxu0 %v2673_v3  ;;  %v4810_v21 = vunpack.c.h.bf16 %v3239_v44  ;;  %v3834_v55 = vld [vmem:[#allocation2 + $0x48] sm:$0xf]  ;;  %v4820_v11 = vld [vmem:[#allocation5_spill] sm:$0xff] }
  0x82   : > { %1343 = vrot.lane.b32.xlu0 %v4800_v18, %s2821_s11  ;;  %4805 = vst [vmem:[#allocation45_spill] sm:$0xff] %v3804_v5  ;;  %4806 = vst [vmem:[#allocation46_spill] sm:$0xff] %v3810_v60  ;;  %v3822_v19 = vsel %vm825_vm2, %v1231_v13, %v4807_v59  ;;  %v4811_v49 = vunpack.c.l.bf16 %v3239_v44  ;;  %2522 = vmatprep.subr.bf16.mxu0 %v2675_v23  ;;  %v4813_v0 = vunpack.c.l.bf16 %v3268_v12  ;;  %v4814_v13 = vunpack.c.h.bf16 %v3268_v12  ;;  %v2678_v12 = vld [vmem:[%s4699_s6 + $0x30] sm:$0xff]  }
  0x83   : > { %4808 = vst [vmem:[#allocation47_spill] sm:$0xff] %v3822_v19  ;;  %4809 = vst [vmem:[#allocation48_spill] sm:$0xff] %v3826_v15  ;;  %v949_v20 = vrot.slane %v4810_v21, 1  ;;  %2553 = vmatpush3.bf16.msra.mxu1 %v2674_v35  ;;  %v4815_v3 = vunpack.c.l.bf16 %v3290_v1  ;;  %v4856_v32 = vunpack.c.h.bf16 %v3436_v6 }
  0x84   : > { %v948_v33 = vrot.slane %v4811_v49, 1  ;;  %4812 = vst [vmem:[#allocation49_spill] sm:$0xff] %v3834_v55  ;;  %2554 = vmatprep.subr.bf16.mxu1 %v2676_v17  ;;  %v3841_v18 = vrot.slane %v4813_v0, 1  ;;  %v947_v44 = vrot.slane %v4814_v13, 1  ;;  %v2779_v21 = vpop.eup %2778  ;;  %v4722_v49 = vunpack.c.l.bf16 %v3834_v55 }
  0x85   : > { %v950_v59 = vrot.slane %v4815_v3, 1  ;;  %2523 = vmatpush3.bf16.msra.mxu0 %v2675_v23  ;;  %v645_v0 = vmul.f32 %v2779_v21, %v3079_v30 }
  0x86   : > { %1905 = vrot.lane.b32.xlu0 %v3395_v9, %s2821_s11  ;;  %v975_v15 = vsel %vm962_vm1, %v948_v33, %v949_v20  ;;  %2524 = vmatprep.subr.bf16.mxu0 %v2677_v36  ;;  %v3860_v13 = vrot.slane %v4722_v49, 7  ;;  %v977_v23 = vsel %vm962_vm1, %v3841_v18, %v947_v44  ;;  %v976_v30 = vsel %vm962_vm1, %v947_v44, %v948_v33 }
  0x87   : > { %2555 = vmatpush3.bf16.msra.mxu1 %v2676_v17  ;;  %v974_v3 = vsel %vm962_vm1, %v949_v20, %v950_v59  ;;  %v648_v17 = vmul.f32 %v3308_v24, %v645_v0  ;;  %v4817_v44 = vunpack.c.h.bf16 %v3295_v4 }
  0x88   : > { %v3876_v49 = vsel %vm825_vm2, %v1766_v2, %v3860_v13 }
  0x89   : > { %4816 = vst [vmem:[#allocation50_spill] sm:$0xff] %v3876_v49  ;;  %2525 = vmatpush3.bf16.msra.mxu0 %v2677_v36  ;;  %v2457_v20 = vpack.c.bf16 %v648_v17, %v648_v17  ;;  %v953_v2 = vrot.slane %v4817_v44, 1  ;;  %v4818_v36 = vunpack.c.l.bf16 %v3324_v38  ;;  %v4819_v49 = vld [vmem:[#allocation4_spill] sm:$0xff]  ;;  %v4822_v44 = vunpack.c.l.bf16 %v3295_v4 }
  0x8a   : > { %2526 = vmatprep.subr.bf16.mxu0 %v2678_v12 }
  0x8b   : > { %v3848_v35 = vpop.permute.xlu1 %991  ;;  %v3852_v60 = vpop.permute.xlu0 %981  ;;  %v3891_v0 = vrot.slane %v4818_v36, 1  ;;  %669 = vst.msk [vmem:[#allocation2 + $0x4c] sm:$0xf] %vm657_vm0, %v2457_v20  ;;  %v952_v14 = vrot.slane %v4822_v44, 1  ;;  %v4830_v44 = vld [vmem:[#allocation10_spill] sm:$0xff] }
  0x8c   : > { %v1061_v21 = vmul.f32 %v3848_v35, %v975_v15  ;;  %v1307_v19 = vmul.f32 %v3172_v62, %v3848_v35  ;;  %v1059_v33 = vmul.f32 %v3852_v60, %v977_v23  ;;  %v1305_v17 = vmul.f32 %v4819_v49, %v3852_v60 }
  0x8d   : > { %2527 = vmatpush3.bf16.msra.mxu0 %v2678_v12  ;;  %v971_v4 = vsel %vm962_vm1, %v952_v14, %v953_v2 }
  0x8f   : > { %v3878_v8 = vpop.permute.xlu1 %996  ;;  %v3880_v5 = vpop.permute.xlu0 %986 }
  0x90   : > { %v1062_v24 = vmul.f32 %v3878_v8, %v974_v3  ;;  %v1308_v15 = vmul.f32 %v3195_v53, %v3878_v8  ;;  %v1060_v62 = vmul.f32 %v3880_v5, %v976_v30  ;;  %v1306_v23 = vmul.f32 %v4820_v11, %v3880_v5 }
  0x91   : > { %v4821_v30 = vunpack.c.h.bf16 %v3290_v1  ;;  %v970_v1 = vsel %vm962_vm1, %v953_v2, %v3891_v0 }
  0x92   : > { %v1076_v3 = vpack.c.bf16 %v1062_v24, %v1061_v21  ;;  %v1075_v50 = vpack.c.bf16 %v1060_v62, %v1059_v33  ;;  %v1322_v53 = vpack.c.bf16 %v1308_v15, %v1307_v19  ;;  %v1321_v49 = vpack.c.bf16 %v1306_v23, %v1305_v17  ;;  %v4824_v19 = vld [vmem:[#allocation7_spill] sm:$0xff]  ;;  %v4826_v15 = vld [vmem:[#allocation9_spill] sm:$0xff] }
  0x93   : > { %v951_v27 = vrot.slane %v4821_v30, 1  ;;  %v3902_v36 = vpop.permute.xlu1 %1006  ;;  %v3904_v28 = vpop.permute.xlu0 %1001  ;;  %v3931_v2 = vld [vmem:[#allocation2 + $0x4c] sm:$0xf] }
  0x94   : > { %v1310_v11 = vmul.f32 %v4823_v42, %v3902_v36  ;;  %1149 = vrot.lane.b32.xlu0 %v1076_v3, %s2822_s27  ;;  %v1309_v12 = vmul.f32 %v4824_v19, %v3904_v28  ;;  %1147 = vrot.lane.b32.xlu1 %v1075_v50, %s2822_s27  ;;  %4827 = vst [vmem:[#allocation5_spill] sm:$0xff] %v3931_v2  ;;  %v4829_v3 = vunpack.c.l.bf16 %v3436_v6  ;;  %v4858_v6 = vld [vmem:[#allocation17_spill] sm:$0xff] }
  0x95   : > { %v972_v21 = vsel %vm962_vm1, %v951_v27, %v952_v14  ;;  %v973_v24 = vsel %vm962_vm1, %v950_v59, %v951_v27  ;;  %v4828_v14 = vunpack.c.h.bf16 %v3350_v56  ;;  %v4723_v59 = vunpack.c.l.bf16 %v3931_v2  ;;  %v4842_v2 = vld [vmem:[#allocation14_spill] sm:$0xff] }
  0x96   : > { %v1323_v33 = vpack.c.bf16 %v1310_v11, %v1309_v12  ;;  %v3937_v30 = vrot.slane %v4829_v3, 1  ;;  %v4831_v11 = vunpack.c.l.bf16 %v3350_v56  ;;  %v4835_v56 = vld [vmem:[#allocation11_spill] sm:$0xff] }
  0x97   : > { %v3919_v20 = vpop.permute.xlu1 %1016  ;;  %v3921_v42 = vpop.permute.xlu0 %1011  ;;  %v957_v23 = vrot.slane %v4828_v14, 1 }
  0x98   : > { %4825 = vst [vmem:[#allocation4_spill] sm:$0xff] %v3921_v42  ;;  %v1066_v50 = vmul.f32 %v3919_v20, %v970_v1  ;;  %v3928_v62 = vmul.f32 %v4826_v15, %v3919_v20  ;;  %v1065_v17 = vmul.f32 %v3921_v42, %v971_v4  ;;  %v1311_v27 = vmul.f32 %v4830_v44, %v3921_v42 }
  0x99   : > { %1353 = vrot.lane.b32.xlu1 %v1321_v49, %s2822_s27  ;;  %v956_v19 = vrot.slane %v4831_v11, 1  ;;  %v1064_v1 = vmul.f32 %v3902_v36, %v972_v21  ;;  %v1063_v4 = vmul.f32 %v3904_v28, %v973_v24  ;;  %v1768_v44 = vrot.slane %v4723_v59, 7  ;;  %v4834_v49 = vld [vmem:[#allocation12_spill] sm:$0xff] }
  0x9a   : > { %v1078_v12 = vpack.c.bf16 %v1066_v50, %v1065_v17  ;;  %v1324_v3 = vpack.c.bf16 %v3928_v62, %v1311_v27  ;;  %v966_v24 = vsel %vm962_vm1, %v957_v23, %v3937_v30 }
  0x9b   : > { %v3947_v15 = vpop.permute.xlu1 %1026  ;;  %v3949_v14 = vpop.permute.xlu0 %1021  ;;  %v967_v50 = vsel %vm962_vm1, %v956_v19, %v957_v23  ;;  %v1784_v62 = vsel %vm825_vm2, %v1768_v44, %v3516_v16  ;;  %v3975_v17 = vsel %vm825_vm2, %v3860_v13, %v1768_v44  ;;  %v4840_v16 = vld [vmem:[#allocation13_spill] sm:$0xff]  ;;  %v4841_v44 = vunpack.c.h.bf16 %v3386_v47 }
  0x9c   : > { %4832 = vst [vmem:[#allocation6_spill] sm:$0xff] %v3947_v15  ;;  %4833 = vst [vmem:[#allocation7_spill] sm:$0xff] %v3949_v14  ;;  %v3956_v40 = vmul.f32 %v4834_v49, %v3947_v15  ;;  %1153 = vrot.lane.b32.xlu0 %v1078_v12, %s2822_s27  ;;  %v3961_v21 = vmul.f32 %v4835_v56, %v3949_v14  ;;  %v4839_v49 = vunpack.c.h.bf16 %v3324_v38  ;;  %v4843_v38 = vunpack.c.l.bf16 %v3386_v47  ;;  %v4845_v47 = vld [vmem:[#allocation15_spill] sm:$0xff] }
  0x9d   : > { %1355 = vrot.lane.b32.xlu1 %v1322_v53, %s2822_s27  ;;  %4836 = vst [vmem:[#allocation9_spill] sm:$0xff] %v3975_v17  ;;  %v1077_v53 = vpack.c.bf16 %v1064_v1, %v1063_v4  ;;  %v961_v17 = vrot.slane %v4841_v44, 1 }
  0x9e   : > { %v955_v23 = vrot.slane %v4839_v49, 1  ;;  %v960_v49 = vrot.slane %v4843_v38, 1  ;;  %v4849_v38 = vunpack.c.h.bf16 %v3395_v9 }
  0x9f   : > { %v3977_v27 = vpop.permute.xlu1 %1036  ;;  %v3979_v11 = vpop.permute.xlu0 %1031 }
  0xa0   : > { %4837 = vst [vmem:[#allocation10_spill] sm:$0xff] %v3977_v27  ;;  %4838 = vst [vmem:[#allocation12_spill] sm:$0xff] %v3979_v11  ;;  %v1070_v56 = vmul.f32 %v3977_v27, %v966_v24  ;;  %v3988_v59 = vmul.f32 %v4840_v16, %v3977_v27  ;;  %v1069_v13 = vmul.f32 %v3979_v11, %v967_v50 }
  0xa1   : > { %v3995_v1 = vmul.f32 %v4842_v2, %v3979_v11  ;;  %1151 = vrot.lane.b32.xlu1 %v1077_v53, %s2822_s27  ;;  %v968_v16 = vsel %vm962_vm1, %v955_v23, %v956_v19  ;;  %v969_v2 = vsel %vm962_vm1, %v3891_v0, %v955_v23  ;;  %v4844_v53 = vld [vmem:[#allocation16_spill] sm:$0xff]  ;;  %v978_v19 = vsel %vm962_vm1, %v961_v17, %v3841_v18  ;;  %v4029_v0 = vld [vmem:[%s4699_s6 + $0x88] sm:$0xff]  }
  0xa2   : > { %v1080_v4 = vpack.c.bf16 %v1070_v56, %v1069_v13  ;;  %v963_v44 = vsel %vm962_vm1, %v960_v49, %v961_v17  ;;  %4846 = vst [vmem:[#allocation11_spill] sm:$0xff] %v4029_v0  ;;  %v4847_v23 = vunpack.c.l.bf16 %v3395_v9  ;;  %v1068_v18 = vmul.f32 %v3947_v15, %v968_v16  ;;  %2572 = vmatprep.subr.bf16.mxu0 %v4029_v0  ;;  %v4855_v11 = vld [vmem:[#allocation19_spill] sm:$0xff] }
  0xa3   : > { %v4000_v24 = vpop.permute.xlu1 %1046  ;;  %v4002_v12 = vpop.permute.xlu0 %1041  ;;  %v1067_v50 = vmul.f32 %v3949_v14, %v969_v2  ;;  %2600 = vmatprep.subr.bf16.mxu1 %v4029_v0  ;;  %v4854_v2 = vunpack.c.h.bf16 %v3354_v58  ;;  %v959_v0 = vrot.slane %v4856_v32, 1  ;;  %v4859_v14 = vld [vmem:[#allocation20_spill] sm:$0xff] }
  0xa4   : > { %v4013_v56 = vmul.f32 %v4844_v53, %v4000_v24  ;;  %1157 = vrot.lane.b32.xlu0 %v1080_v4, %s2822_s27  ;;  %v4018_v13 = vmul.f32 %v4845_v47, %v4002_v12  ;;  %v4033_v4 = vrot.slane %v4847_v23, 1  ;;  %v1810_v53 = vrot.slane %v4849_v38, 1  ;;  %v4853_v23 = vld [vmem:[#allocation18_spill] sm:$0xff] }
  0xa5   : > { %1357 = vrot.lane.b32.xlu1 %v1323_v33, %s2822_s27  ;;  %v4850_v33 = vunpack.c.l.bf16 %v3354_v58 }
  0xa6   : > { %4848 = vst [vmem:[#allocation13_spill] sm:$0xff] %v4033_v4 }
  0xa7   : > { %v1811_v47 = vrot.slane %v4850_v33, 1  ;;  %v4041_v17 = vpop.permute.xlu1 %1056  ;;  %v4043_v55 = vpop.permute.xlu0 %1051  ;;  %v1812_v33 = vrot.slane %v4854_v2, 1 }
  0xa8   : > { %4851 = vst [vmem:[#allocation14_spill] sm:$0xff] %v4041_v17  ;;  %4852 = vst [vmem:[#allocation16_spill] sm:$0xff] %v4043_v55  ;;  %v1074_v9 = vmul.f32 %v4041_v17, %v978_v19  ;;  %v4052_v38 = vmul.f32 %v4853_v23, %v4041_v17  ;;  %v1073_v16 = vmul.f32 %v4043_v55, %v963_v44  ;;  %v4857_v23 = vunpack.c.l.bf16 %v3470_v41 }
  0xa9   : > { %v4059_v27 = vmul.f32 %v4855_v11, %v4043_v55  ;;  %1359 = vrot.lane.b32.xlu1 %v1324_v3, %s2822_s27  ;;  %v1839_v19 = vsel %vm962_vm1, %v4033_v4, %v1810_v53  ;;  %v1838_v2 = vsel %vm962_vm1, %v1810_v53, %v1811_v47  ;;  %v1079_v55 = vpack.c.bf16 %v1068_v18, %v1067_v50  ;;  %v4860_v4 = vld [vmem:[#allocation23_spill] sm:$0xff] }
  0xaa   : > { %v4069_v17 = vrot.slane %v4857_v23, 1  ;;  %v1082_v44 = vpack.c.bf16 %v1074_v9, %v1073_v16  ;;  %v4861_v23 = vld [vmem:[#allocation21_spill] sm:$0xff]  ;;  %v1837_v50 = vsel %vm962_vm1, %v1811_v47, %v1812_v33  ;;  %v1841_v47 = vmul.f32 %v1839_v19, %v3852_v60 }
  0xab   : > { %v850_v51 = vpop.permute.xlu1 %849  ;;  %v845_v11 = vpop.permute.xlu0 %844  ;;  %v1328_v3 = vpack.c.bf16 %v4052_v38, %v4059_v27  ;;  %v4864_v19 = vld [vmem:[#allocation25_spill] sm:$0xff]  ;;  %v4904_v38 = vld [vmem:[#allocation40_spill] sm:$0xff] }
  0xac   : > { %v4076_v32 = vmul.f32 %v850_v51, %v4858_v6  ;;  %v4079_v15 = vmul.f32 %v4859_v14, %v850_v51  ;;  %v4082_v42 = vmul.f32 %v4860_v4, %v850_v51  ;;  %v4085_v9 = vmul.f32 %v845_v11, %v4861_v23  ;;  %1161 = vrot.lane.b32.xlu0 %v1082_v44, %s2822_s27  ;;  %v4862_v44 = vld [vmem:[#allocation22_spill] sm:$0xff] }
  0xad   : > { %v4091_v53 = vmul.f32 %v3553_v34, %v845_v11  ;;  %v4093_v18 = vmul.f32 %v1784_v62, %v845_v11  ;;  %1155 = vrot.lane.b32.xlu1 %v1079_v55, %s2822_s27  ;;  %v1836_v51 = vsel %vm962_vm1, %v1812_v33, %v4069_v17  ;;  %v1842_v14 = vmul.f32 %v1838_v2, %v3880_v5 }
  0xae   : > { %v964_v4 = vsel %vm962_vm1, %v959_v0, %v960_v49  ;;  %v965_v34 = vsel %vm962_vm1, %v3937_v30, %v959_v0  ;;  %v4863_v30 = vld [vmem:[#allocation24_spill] sm:$0xff]  ;;  %v4865_v23 = vpack.c.bf16 %v3956_v40, %v3961_v21  ;;  %v4866_v40 = vld [vmem:[#allocation26_spill] sm:$0xff] }
  0xaf   : > { %v860_v33 = vpop.permute.xlu1 %859  ;;  %v855_v5 = vpop.permute.xlu0 %854  ;;  %v4910_v25 = vld [vmem:[#allocation16_spill] sm:$0xff] }
  0xb0   : > { %v4113_v2 = vmul.f32 %v860_v33, %v4862_v44  ;;  %v1252_v49 = vmul.f32 %v3579_v37, %v860_v33  ;;  %v4117_v11 = vmul.f32 %v3583_v46, %v860_v33  ;;  %v4120_v60 = vmul.f32 %v855_v5, %v3570_v39  ;;  %1907 = vrot.lane.b32.xlu0 %v3354_v58, %s2821_s11 }
  0xb1   : > { %v1251_v0 = vmul.f32 %v4863_v30, %v855_v5  ;;  %v4126_v6 = vmul.f32 %v4864_v19, %v855_v5  ;;  %1361 = vrot.lane.b32.xlu1 %v4865_v23, %s2822_s27  ;;  %v1843_v37 = vmul.f32 %v1837_v50, %v3848_v35  ;;  %v1844_v46 = vmul.f32 %v1836_v51, %v3878_v8  ;;  %v4867_v35 = vld [vmem:[#allocation29_spill] sm:$0xff]  ;;  %v4868_v51 = vld [vmem:[#allocation27_spill] sm:$0xff] }
  0xb2   : > { %v1857_v33 = vpack.c.bf16 %v1842_v14, %v1841_v47  ;;  %v1072_v58 = vmul.f32 %v4000_v24, %v964_v4  ;;  %v1071_v44 = vmul.f32 %v4002_v12, %v965_v34  ;;  %v4869_v34 = vpack.c.bf16 %v3988_v59, %v3995_v1  ;;  %v4872_v1 = vld [vmem:[#allocation28_spill] sm:$0xff] }
  0xb3   : > { %v1266_v30 = vpack.c.bf16 %v1252_v49, %v1251_v0  ;;  %v870_v19 = vpop.permute.xlu1 %869  ;;  %v865_v62 = vpop.permute.xlu0 %864  ;;  %v4870_v49 = vunpack.c.h.bf16 %v3470_v41  ;;  %v4871_v0 = vunpack.c.l.bf16 %v3498_v26 }
  0xb4   : > { %v4141_v21 = vmul.f32 %v870_v19, %v4866_v40  ;;  %v4144_v50 = vmul.f32 %v4867_v35, %v870_v19  ;;  %v4147_v8 = vmul.f32 %v3638_v10, %v870_v19  ;;  %v4150_v14 = vmul.f32 %v865_v62, %v4868_v51  ;;  %1929 = vrot.lane.b32.xlu0 %v1857_v33, %s2822_s27 }
  0xb5   : > { %v4154_v4 = vmul.f32 %v3629_v31, %v865_v62  ;;  %v4157_v47 = vmul.f32 %v3633_v63, %v865_v62  ;;  %1363 = vrot.lane.b32.xlu1 %v4869_v34, %s2822_s27  ;;  %v1814_v10 = vrot.slane %v4870_v49, 1  ;;  %v1815_v23 = vrot.slane %v4871_v0, 1  ;;  %v4888_v31 = vld [vmem:[#allocation31_spill] sm:$0xff] }
  0xb6   : > { %v1858_v19 = vpack.c.bf16 %v1844_v46, %v1843_v37  ;;  %v1081_v59 = vpack.c.bf16 %v1072_v58, %v1071_v44  ;;  %v4874_v46 = vld [vmem:[#allocation8_spill] sm:$0xff] }
  0xb7   : > { %v880_v62 = vpop.permute.xlu1 %879  ;;  %v875_v40 = vpop.permute.xlu0 %874  ;;  %v4875_v49 = vunpack.c.l.bf16 %v4874_v46  ;;  %v1835_v44 = vsel %vm962_vm1, %v4069_v17, %v1814_v10 }
  0xb8   : > { %v4174_v35 = vmul.f32 %v880_v62, %v4872_v1  ;;  %v4177_v51 = vmul.f32 %v3654_v43, %v880_v62  ;;  %v4180_v34 = vmul.f32 %v3664_v22, %v880_v62  ;;  %v4183_v37 = vmul.f32 %v875_v40, %v3648_v52  ;;  %1931 = vrot.lane.b32.xlu0 %v1858_v19, %s2822_s27 }
  0xb9   : > { %v1817_v0 = vrot.slane %v4875_v49, 1  ;;  %v4189_v63 = vmul.f32 %v3658_v48, %v875_v40  ;;  %v4192_v58 = vmul.f32 %v3668_v61, %v875_v40  ;;  %1159 = vrot.lane.b32.xlu1 %v1081_v59, %s2822_s27  ;;  %v4877_v43 = vunpack.c.h.bf16 %v4874_v46 }
  0xba   : > { %4873 = vst [vmem:[#allocation15_spill] sm:$0xff] %v4180_v34  ;;  %v1834_v52 = vsel %vm962_vm1, %v1814_v10, %v1815_v23  ;;  %v4878_v19 = vunpack.c.h.bf16 %v3498_v26  ;;  %v4879_v62 = vunpack.c.l.bf16 %v3520_v54  ;;  %v4880_v10 = vpack.c.bf16 %v4013_v56, %v4018_v13 }
  0xbb   : > { %4876 = vst [vmem:[#allocation18_spill] sm:$0xff] %v4192_v58  ;;  %v1818_v22 = vrot.slane %v4877_v43, 1  ;;  %v1332_v46 = vpop.permute.xlu0 %1331  ;;  %v4215_v17 = vpop.permute.xlu1 %1329  ;;  %v1846_v43 = vmul.f32 %v1834_v52, %v3902_v36  ;;  %v4881_v1 = vunpack.c.h.bf16 %v3520_v54  ;;  %v4882_v13 = vunpack.c.l.bf16 %v3603_v29 }
  0xbc   : > { %v1816_v61 = vrot.slane %v4878_v19, 1  ;;  %v1819_v40 = vrot.slane %v4879_v62, 1  ;;  %v4213_v49 = vsel %vm1163_vm3, %v1266_v30, %v1332_v46  ;;  %1909 = vrot.lane.b32.xlu0 %v3470_v41, %s2821_s11  ;;  %v1845_v19 = vmul.f32 %v1835_v44, %v3904_v28 }
  0xbd   : > { %1365 = vrot.lane.b32.xlu1 %v4880_v10, %s2822_s27  ;;  %v1831_v41 = vsel %vm962_vm1, %v1817_v0, %v1818_v22  ;;  %v1820_v56 = vrot.slane %v4881_v1, 1  ;;  %v1821_v36 = vrot.slane %v4882_v13, 1  ;;  %v4884_v1 = vld [vmem:[#allocation6_spill] sm:$0xff]  ;;  %v4885_v13 = vld [vmem:[#allocation7_spill] sm:$0xff] }
  0xbe   : > { %v1832_v62 = vsel %vm962_vm1, %v1816_v61, %v1817_v0  ;;  %v1833_v30 = vsel %vm962_vm1, %v1815_v23, %v1816_v61  ;;  %v1830_v46 = vsel %vm962_vm1, %v1818_v22, %v1819_v40  ;;  %v4883_v22 = vld [vmem:[#allocation4_spill] sm:$0xff]  ;;  %v1849_v5 = vmul.f32 %v1831_v41, %v4885_v13 }
  0xbf   : > { %v1848_v0 = vmul.f32 %v1832_v62, %v3919_v20  ;;  %v1847_v61 = vmul.f32 %v1833_v30, %v4883_v22  ;;  %v1828_v20 = vsel %vm962_vm1, %v1820_v56, %v1821_v36  ;;  %v1829_v27 = vsel %vm962_vm1, %v1819_v40, %v1820_v56  ;;  %v4889_v62 = vld [vmem:[#allocation10_spill] sm:$0xff]  ;;  %v4891_v41 = vld [vmem:[#allocation36_spill] sm:$0xff] }
  0xc0   : > { %v885_v52 = vpop.permute.xlu0 %884  ;;  %1911 = vrot.lane.b32.xlu0 %v3498_v26, %s2821_s11  ;;  %v1850_v26 = vmul.f32 %v1830_v46, %v4884_v1  ;;  %v1852_v30 = vmul.f32 %v1828_v20, %v4889_v62  ;;  %v4890_v46 = vld [vmem:[#allocation12_spill] sm:$0xff]  ;;  %v4898_v62 = vld [vmem:[#allocation5_spill] sm:$0xff] }
  0xc1   : > { %v4240_v28 = vmul.f32 %v885_v52, %v3674_v57  ;;  %v4243_v23 = vmul.f32 %v3705_v7, %v885_v52  ;;  %v4246_v44 = vmul.f32 %v3687_v45, %v885_v52  ;;  %1367 = vrot.lane.b32.xlu1 %v1328_v3, %s2822_s27  ;;  %v1859_v57 = vpack.c.bf16 %v1846_v43, %v1845_v19  ;;  %v4886_v7 = vld [vmem:[#allocation30_spill] sm:$0xff]  ;;  %v4887_v45 = vld [vmem:[#allocation33_spill] sm:$0xff]  ;;  %v4903_v3 = vld [vmem:[#allocation39_spill] sm:$0xff] }
  0xc2   : > { %v890_v10 = vpop.permute.xlu1 %889  ;;  %v1860_v19 = vpack.c.bf16 %v1848_v0, %v1847_v61  ;;  %v1851_v40 = vmul.f32 %v1829_v27, %v4890_v46  ;;  %v1861_v22 = vpack.c.bf16 %v1850_v26, %v1849_v5  ;;  %v4894_v0 = vld [vmem:[#allocation49_spill] sm:$0xff]  ;;  %v4899_v46 = vunpack.c.l.bf16 %v4898_v62  ;;  %v4902_v43 = vld [vmem:[#allocation38_spill] sm:$0xff] }
  0xc3   : > { %v4257_v59 = vmul.f32 %v890_v10, %v4886_v7  ;;  %v4260_v52 = vmul.f32 %v4887_v45, %v890_v10  ;;  %v4263_v48 = vmul.f32 %v4888_v31, %v890_v10  ;;  %v4895_v61 = vunpack.c.l.bf16 %v4894_v0  ;;  %v4896_v27 = vld [vmem:[#allocation41_spill] sm:$0xff] }
  0xc4   : > { %1933 = vrot.lane.b32.xlu0 %v1859_v57, %s2822_s27  ;;  %v4283_v1 = vpop.permute.xlu0 %1125  ;;  %v1862_v7 = vpack.c.bf16 %v1852_v30, %v1851_v40  ;;  %v2435_v30 = vcombine.low %v4894_v0, %v4898_v62 }
  0xc5   : > { %1915 = vrot.lane.b32.xlu1 %v3520_v54, %s2821_s11  ;;  %v4893_v54 = vunpack.c.h.bf16 %v3603_v29  ;;  %v1823_v13 = vrot.slane %v4895_v61, 1 }
  0xc6   : > { %v900_v31 = vpop.permute.xlu1 %899 }
  0xc7   : > { %v4281_v56 = vmul.f32 %v4891_v41, %v900_v31  ;;  %v1822_v57 = vrot.slane %v4893_v54, 1  ;;  %v1824_v41 = vrot.slane %v4899_v46, 1  ;;  %v4900_v54 = vld [vmem:[#allocation32_spill] sm:$0xff] }
  0xc8   : > { %1935 = vrot.lane.b32.xlu0 %v1860_v19, %s2822_s27  ;;  %v4294_v45 = vpop.permute.xlu0 %1123  ;;  %v4312_v61 = vmul.f32 %v900_v31, %v4900_v54  ;;  %v4909_v54 = vld [vmem:[#allocation14_spill] sm:$0xff] }
  0xc9   : > { %4892 = vst [vmem:[#allocation19_spill] sm:$0xff] %v4281_v56  ;;  %1937 = vrot.lane.b32.xlu1 %v1861_v22, %s2822_s27  ;;  %v1826_v26 = vsel %vm962_vm1, %v1822_v57, %v1823_v13  ;;  %v1827_v20 = vsel %vm962_vm1, %v1821_v36, %v1822_v57 }
  0xca   : > { %v4287_v10 = vpop.permute.xlu1 %1333  ;;  %v1854_v40 = vmul.f32 %v1826_v26, %v4000_v24  ;;  %v1853_v22 = vmul.f32 %v1827_v20, %v4002_v12  ;;  %v4906_v24 = vld [vmem:[#allocation13_spill] sm:$0xff]  ;;  %v1825_v26 = vsel %vm962_vm1, %v1823_v13, %v1824_v41 }
  0xcb   : > { %v1840_v12 = vsel %vm962_vm1, %v1824_v41, %v4906_v24  ;;  %v4907_v20 = vld [vmem:[#allocation9_spill] sm:$0xff]  ;;  %v1855_v13 = vmul.f32 %v1825_v26, %v4910_v25 }
  0xcc   : > { %v1863_v41 = vpack.c.bf16 %v1854_v40, %v1853_v22  ;;  %v4914_v40 = vld [vmem:[#allocation44_spill] sm:$0xff]  ;;  %v4915_v26 = vld [vmem:[#allocation45_spill] sm:$0xff] }
  0xcd   : > { %1939 = vrot.lane.b32.xlu1 %v1862_v7, %s2822_s27  ;;  %v4901_v7 = vld [vmem:[#allocation35_spill] sm:$0xff] }
  0xce   : > { %v910_v5 = vpop.permute.xlu1 %909 }
  0xcf   : > { %v4301_v19 = vmul.f32 %v4896_v27, %v910_v5  ;;  %v4315_v27 = vmul.f32 %v4901_v7, %v900_v31 }
  0xd1   : > { %4897 = vst [vmem:[#allocation17_spill] sm:$0xff] %v4301_v19  ;;  %1917 = vrot.lane.b32.xlu1 %v3603_v29, %s2821_s11  ;;  %v895_v36 = vpop.permute.xlu0 %894  ;;  %v4924_v19 = vpack.c.bf16 %v4076_v32, %v4085_v9 }
  0xd2   : > { %v920_v57 = vpop.permute.xlu1 %919  ;;  %v4318_v46 = vmul.f32 %v895_v36, %v4902_v43  ;;  %v4321_v29 = vmul.f32 %v4903_v3, %v895_v36  ;;  %v4324_v0 = vmul.f32 %v4904_v38, %v895_v36  ;;  %v1856_v36 = vmul.f32 %v1840_v12, %v4909_v54  ;;  %v4911_v3 = vld [vmem:[#allocation34_spill] sm:$0xff]  ;;  %v4912_v43 = vld [vmem:[#allocation37_spill] sm:$0xff]  ;;  %v4913_v12 = vld [vmem:[#allocation43_spill] sm:$0xff] }
  0xd3   : > { %v4332_v62 = vmul.f32 %v4907_v20, %v920_v57  ;;  %v4352_v38 = vmul.f32 %v910_v5, %v4911_v3  ;;  %v4355_v33 = vmul.f32 %v4912_v43, %v910_v5  ;;  %v4917_v5 = vld [vmem:[#allocation42_spill] sm:$0xff]  ;;  %v1166_v58 = vsel %vm1163_vm3, %v4924_v19, %v4294_v45 }
  0xd4   : > { %4905 = vst [vmem:[#allocation20_spill] sm:$0xff] %v4324_v0  ;;  %v1864_v24 = vpack.c.bf16 %v1856_v36, %v1855_v13  ;;  %v4373_v43 = vmul.f32 %v920_v57, %v4917_v5  ;;  %v4921_v36 = vld [vmem:[#allocation50_spill] sm:$0xff]  ;;  %v4923_v13 = vpack.c.bf16 %v4113_v2, %v4120_v60  ;;  %v4925_v60 = vpack.c.bf16 %v4079_v15, %v4091_v53  ;;  %v2682_v53 = vld [vmem:[%s4699_s6 + $0x70] sm:$0xff]  }
  0xd5   : > { %4908 = vst [vmem:[#allocation23_spill] sm:$0xff] %v4332_v62  ;;  %1919 = vrot.lane.b32.xlu1 %v2435_v30, %s2821_s11  ;;  %v4341_v31 = vpop.permute.xlu0 %1127  ;;  %v2680_v2 = vld [vmem:[%s4699_s6 + $0x80] sm:$0xff]  }
  0xd6   : > { %v4401_v39 = vpop.permute.xlu1 %1337  ;;  %v1371_v32 = vsel %vm1163_vm3, %v4925_v60, %v4215_v17  ;;  %v4927_v17 = vpack.c.bf16 %v4141_v21, %v4150_v14  ;;  %v2683_v21 = vld [vmem:[%s4699_s6 + $0x68] sm:$0xff]   ;;  %v4929_v14 = vpack.c.bf16 %v4144_v50, %v4154_v4  ;;  %v4930_v50 = vpack.c.bf16 %v4177_v51, %v4189_v63 }
  0xd7   : > { %v4932_v63 = vpack.c.bf16 %v4312_v61, %v4318_v46 }
  0xd8   : > { %v1172_v45 = vsel %vm1163_vm3, %v4927_v17, %v4341_v31 }
  0xd9   : > { %1941 = vrot.lane.b32.xlu1 %v1863_v41, %s2822_s27  ;;  %v4346_v7 = vpop.permute.xlu0 %1129 }
  0xdd   : > { %1943 = vrot.lane.b32.xlu1 %v1864_v24, %s2822_s27  ;;  %v4349_v20 = vpop.permute.xlu0 %1335  ;;  %v4918_v24 = vld [vmem:[#allocation47_spill] sm:$0xff] }
  0xde   : > { %v1380_v4 = vsel %vm1163_vm3, %v4930_v50, %v4349_v20 }
  0xe1   : > { %v905_v30 = vpop.permute.xlu0 %904 }
  0xe2   : > { %v4358_v54 = vmul.f32 %v905_v30, %v4913_v12  ;;  %v4361_v22 = vmul.f32 %v4914_v40, %v905_v30  ;;  %v4364_v25 = vmul.f32 %v4915_v26, %v905_v30  ;;  %v4376_v12 = vmul.f32 %v4918_v24, %v920_v57  ;;  %v4919_v40 = vld [vmem:[#allocation46_spill] sm:$0xff]  ;;  %v4920_v30 = vld [vmem:[#allocation48_spill] sm:$0xff] }
  0xe4   : > { %4916 = vst [vmem:[#allocation21_spill] sm:$0xff] %v4364_v25 }
  0xe5   : > { %v915_v41 = vpop.permute.xlu0 %914 }
  0xe6   : > { %v4379_v55 = vmul.f32 %v915_v41, %v4919_v40  ;;  %v4382_v26 = vmul.f32 %v4920_v30, %v915_v41  ;;  %v4385_v16 = vmul.f32 %v4921_v36, %v915_v41  ;;  %v4405_v41 = vpop.permute.xlu1 %1341 }
  0xe8   : > { %4922 = vst [vmem:[#allocation22_spill] sm:$0xff] %v4385_v16  ;;  %v1169_v16 = vsel %vm1163_vm3, %v4923_v13, %v4283_v1  ;;  %v4926_v1 = vld [vmem:[#allocation11_spill] sm:$0xff] }
  0xe9   : > { %v4393_v57 = vpop.permute.xlu0 %1131 }
  0xea   : > { %v4411_v25 = vpop.permute.xlu1 %1913 }
  0xed   : > { %v4395_v24 = vpop.permute.xlu0 %1133 }
  0xee   : > { %v1181_v51 = vsel %vm1163_vm3, %v4932_v63, %v4395_v24  ;;  %v4934_v24 = vpack.c.bf16 %v4315_v27, %v4321_v29 }
  0xf1   : > { %v4397_v40 = vpop.permute.xlu0 %1339 }
  0xf5   : > { %v4399_v30 = vpop.permute.xlu0 %1135 }
  0xf9   : > { %v4403_v36 = vpop.permute.xlu0 %1137 }
  0xfd   : > { %v4407_v3 = vpop.permute.xlu0 %1343 }
 0x101   : > { %v4409_v5 = vpop.permute.xlu0 %1905 }
 0x106   : > { %v1150_v62 = vpop.permute.xlu0 %1149  ;;  %v1148_v0 = vpop.permute.xlu1 %1147 }
 0x107   : > { %v1192_v34 = vsel %vm1188_vm4, %v1169_v16, %v1150_v62  ;;  %v1190_v56 = vsel %vm1188_vm4, %v1166_v58, %v1148_v0 }
 0x108   : > { %2556 = vmatprep.mubr.msk.bf16.mxu1 %vm1457_vm5, %v1190_v56 }
 0x109   : > { %2557 = vmatmul.mubr.msk.bf16.vlgmr.msra.gmra.mxu1 %vm1457_vm5, %v1192_v34  ;;  %v2681_v34 = vld [vmem:[%s4699_s6 + $0x78] sm:$0xff]  }
 0x10a   : > { %2606 = vmatpush3.bf16.msra.mxu1 %v4926_v1 }
 0x10b   : > { %v1354_v9 = vpop.permute.xlu1 %1353  ;;  %2601 = vmatprep.subr.bf16.mxu1 %v2680_v2 }
 0x10c   : > { %v1394_v16 = vsel %vm1188_vm4, %v1371_v32, %v1354_v9  ;;  %v4931_v9 = vpack.c.bf16 %v4257_v59, %v4240_v28  ;;  %v4933_v28 = vpack.c.bf16 %v4260_v52, %v4243_v23  ;;  %v4935_v23 = vpack.c.bf16 %v4352_v38, %v4358_v54 }
 0x10d   : > { %2528 = vmatprep.mubr.msk.bf16.mxu0 %vm1457_vm5, %v1394_v16  ;;  %v4937_v38 = vpack.c.bf16 %v4355_v33, %v4361_v22 }
 0x10e   : > { %2607 = vmatpush3.bf16.msra.mxu1 %v2680_v2  ;;  %v1154_v15 = vpop.permute.xlu0 %1153  ;;  %v1184_v52 = vsel %vm1163_vm3, %v4935_v23, %v4399_v30 }
 0x10f   : > { %v1356_v58 = vpop.permute.xlu1 %1355  ;;  %2602 = vmatprep.subr.bf16.mxu1 %v2681_v34  ;;  %v1389_v54 = vsel %vm1163_vm3, %v4937_v38, %v4405_v41 }
 0x110   : > { %v1396_v56 = vsel %vm1188_vm4, %v4213_v49, %v1356_v58  ;;  %v4928_v49 = vpack.c.bf16 %v4174_v35, %v4183_v37  ;;  %v1377_v35 = vsel %vm1163_vm3, %v4929_v14, %v4287_v10  ;;  %v4942_v14 = vpack.c.bf16 %v4147_v8, %v4157_v47 }
 0x111   : > { %2529 = vmatmul.mubr.msk.bf16.vlgmr.msra.gmra.mxu0 %vm1457_vm5, %v1396_v56  ;;  %v1386_v56 = vsel %vm1163_vm3, %v4934_v24, %v4397_v40 }
 0x112   : > { %2573 = vmatpush3.bf16.msra.mxu0 %v4926_v1  ;;  %2608 = vmatpush3.bf16.msra.mxu1 %v2681_v34  ;;  %v1175_v0 = vsel %vm1163_vm3, %v4928_v49, %v4346_v7  ;;  %v1178_v1 = vsel %vm1163_vm3, %v4931_v9, %v4393_v57  ;;  %v1383_v57 = vsel %vm1163_vm3, %v4933_v28, %v4401_v39  ;;  %v4949_v9 = vld [vmem:[#allocation17_spill] sm:$0xff] }
 0x113   : > { %v1152_v19 = vpop.permute.xlu1 %1151  ;;  %2574 = vmatprep.subr.bf16.mxu0 %v2680_v2  ;;  %2603 = vmatprep.subr.bf16.mxu1 %v2682_v53  ;;  %v1196_v13 = vsel %vm1188_vm4, %v1175_v0, %v1154_v15  ;;  %v4939_v0 = vpack.c.bf16 %v4082_v42, %v4093_v18  ;;  %v4941_v42 = vpack.c.bf16 %v4117_v11, %v4126_v6  ;;  %v4943_v11 = vld [vmem:[#allocation19_spill] sm:$0xff]  ;;  %v4944_v6 = vld [vmem:[#allocation20_spill] sm:$0xff] }
 0x114   : > { %v1194_v62 = vsel %vm1188_vm4, %v1172_v45, %v1152_v19  ;;  %v4936_v45 = vpack.c.bf16 %v4373_v43, %v4379_v55  ;;  %v4938_v43 = vpack.c.bf16 %v4376_v12, %v4382_v26 }
 0x115   : > { %2560 = vmatprep.mubr.msk.bf16.mxu1 %vm1457_vm5, %v1194_v62  ;;  %v1947_v33 = vsel %vm1163_vm3, %v4939_v0, %v4409_v5 }
 0x116   : > { %2561 = vmatmul.mubr.msk.bf16.gmra.mxu1 %vm1457_vm5, %v1196_v13  ;;  %2575 = vmatpush3.bf16.msra.mxu0 %v2680_v2  ;;  %v1158_v7 = vpop.permute.xlu0 %1157  ;;  %v2684_v2 = vld [vmem:[%s4699_s6 + $0x60] sm:$0xff]   ;;  %v1187_v27 = vsel %vm1163_vm3, %v4936_v45, %v4403_v36  ;;  %v1392_v36 = vsel %vm1163_vm3, %v4938_v43, %v4407_v3  ;;  %v4940_v3 = vpack.c.bf16 %v4263_v48, %v4246_v44 }
 0x117   : > { %v1358_v37 = vpop.permute.xlu1 %1357  ;;  %2576 = vmatprep.subr.bf16.mxu0 %v2681_v34  ;;  %2609 = vmatpush3.bf16.msra.mxu1 %v2682_v53  ;;  %v4945_v48 = vpack.c.bf16 %v4943_v11, %v4944_v6 }
 0x118   : > { %v1398_v31 = vsel %vm1188_vm4, %v1377_v35, %v1358_v37  ;;  %2604 = vmatprep.subr.bf16.mxu1 %v2683_v21  ;;  %v1959_v26 = vsel %vm1163_vm3, %v4940_v3, %v4411_v25 }
 0x119   : > { %2532 = vmatprep.mubr.msk.bf16.mxu0 %vm1457_vm5, %v1398_v31 }
 0x11a   : > { %2577 = vmatpush3.bf16.msra.mxu0 %v2681_v34  ;;  %v1200_v34 = vsel %vm1188_vm4, %v1181_v51, %v1158_v7  ;;  %v4946_v7 = vld [vmem:[#allocation15_spill] sm:$0xff] }
 0x11b   : > { %v1360_v10 = vpop.permute.xlu1 %1359  ;;  %2578 = vmatprep.subr.bf16.mxu0 %v2682_v53  ;;  %2610 = vmatpush3.bf16.msra.mxu1 %v2683_v21 }
 0x11c   : > { %v1400_v60 = vsel %vm1188_vm4, %v1380_v4, %v1360_v10  ;;  %2605 = vmatprep.subr.bf16.mxu1 %v2684_v2 }
 0x11d   : > { %2533 = vmatmul.mubr.msk.bf16.gmra.mxu0 %vm1457_vm5, %v1400_v60 }
 0x11e   : > { %v1162_v32 = vpop.permute.xlu0 %1161  ;;  %2579 = vmatpush3.bf16.msra.mxu0 %v2682_v53 }
 0x11f   : > { %v1156_v16 = vpop.permute.xlu1 %1155  ;;  %2580 = vmatprep.subr.bf16.mxu0 %v2683_v21  ;;  %2611 = vmatpush3.bf16.msra.mxu1 %v2684_v2  ;;  %v1204_v40 = vsel %vm1188_vm4, %v1187_v27, %v1162_v32 }
 0x120   : > { %v1198_v20 = vsel %vm1188_vm4, %v1178_v1, %v1156_v16  ;;  %v4950_v1 = vld [vmem:[#allocation21_spill] sm:$0xff] }
 0x121   : > { %2564 = vmatprep.mubr.msk.bf16.mxu1 %vm1457_vm5, %v1198_v20  ;;  %v4951_v16 = vpack.c.bf16 %v4949_v9, %v4950_v1 }
 0x122   : > { %2565 = vmatmul.mubr.msk.bf16.gmra.mxu1 %vm1457_vm5, %v1200_v34  ;;  %v1908_v59 = vpop.permute.xlu0 %1907  ;;  %2581 = vmatpush3.bf16.msra.mxu0 %v2683_v21  ;;  %v4952_v34 = vld [vmem:[#allocation23_spill] sm:$0xff] }
 0x123   : > { %v1362_v58 = vpop.permute.xlu1 %1361  ;;  %2582 = vmatprep.subr.bf16.mxu0 %v2684_v2  ;;  %v1950_v18 = vsel %vm1163_vm3, %v4941_v42, %v1908_v59  ;;  %v4953_v59 = vld [vmem:[#allocation22_spill] sm:$0xff] }
 0x124   : > { %v1402_v61 = vsel %vm1188_vm4, %v1383_v57, %v1362_v58  ;;  %v4954_v28 = vpack.c.bf16 %v4952_v34, %v4953_v59 }
 0x125   : > { %2536 = vmatprep.mubr.msk.bf16.mxu0 %vm1457_vm5, %v1402_v61 }
 0x126   : > { %v1930_v46 = vpop.permute.xlu0 %1929  ;;  %2583 = vmatpush3.bf16.msra.mxu0 %v2684_v2  ;;  %v4947_v2 = vld [vmem:[#allocation18_spill] sm:$0xff] }
 0x127   : > { %v1364_v15 = vpop.permute.xlu1 %1363  ;;  %v1970_v62 = vsel %vm1188_vm4, %v1947_v33, %v1930_v46  ;;  %v4948_v50 = vpack.c.bf16 %v4946_v7, %v4947_v2 }
 0x128   : > { %v1404_v53 = vsel %vm1188_vm4, %v1386_v56, %v1364_v15 }
 0x129   : > { %2537 = vmatmul.mubr.msk.bf16.gmra.mxu0 %vm1457_vm5, %v1404_v53 }
 0x12a   : > { %v1932_v39 = vpop.permute.xlu0 %1931 }
 0x12b   : > { %v1160_v17 = vpop.permute.xlu1 %1159  ;;  %v1972_v21 = vsel %vm1188_vm4, %v1950_v18, %v1932_v39 }
 0x12c   : > { %v1202_v29 = vsel %vm1188_vm4, %v1184_v52, %v1160_v17 }
 0x12d   : > { %2568 = vmatprep.mubr.msk.bf16.mxu1 %vm1457_vm5, %v1202_v29 }
 0x12e   : > { %2569 = vmatmul.mubr.msk.bf16.gmra.mxu1 %vm1457_vm5, %v1204_v40  ;;  %v1910_v19 = vpop.permute.xlu0 %1909 }
 0x12f   : > { %v1366_v30 = vpop.permute.xlu1 %1365  ;;  %v1953_v35 = vsel %vm1163_vm3, %v4942_v14, %v1910_v19 }
 0x130   : > { %v1406_v55 = vsel %vm1188_vm4, %v1389_v54, %v1366_v30 }
 0x131   : > { %2540 = vmatprep.mubr.msk.bf16.mxu0 %vm1457_vm5, %v1406_v55 }
 0x132   : > { %v1912_v22 = vpop.permute.xlu0 %1911 }
 0x133   : > { %v1368_v49 = vpop.permute.xlu1 %1367  ;;  %v1956_v4 = vsel %vm1163_vm3, %v4948_v50, %v1912_v22 }
 0x134   : > { %v1408_v41 = vsel %vm1188_vm4, %v1392_v36, %v1368_v49 }
 0x135   : > { %2541 = vmatmul.mubr.msk.bf16.gmra.mxu0 %vm1457_vm5, %v1408_v41 }
 0x136   : > { %2584 = vmatprep.mubr.msk.bf16.mxu0 %vm1457_vm5, %v1970_v62  ;;  %v1934_v12 = vpop.permute.xlu0 %1933 }
 0x137   : > { %v1916_v13 = vpop.permute.xlu1 %1915  ;;  %v1974_v31 = vsel %vm1188_vm4, %v1953_v35, %v1934_v12 }
 0x138   : > { %v1962_v44 = vsel %vm1163_vm3, %v4945_v48, %v1916_v13 }
 0x13a   : > { %v1936_v47 = vpop.permute.xlu0 %1935 }
 0x13b   : > { %v1938_v5 = vpop.permute.xlu1 %1937  ;;  %v1976_v60 = vsel %vm1188_vm4, %v1956_v4, %v1936_v47 }
 0x13c   : > { %v1978_v37 = vsel %vm1188_vm4, %v1959_v26, %v1938_v5 }
 0x13d   : > { %2585 = vmatmul.mubr.msk.bf16.vlgmr.msra.gmra.mxu0 %vm1457_vm5, %v1972_v21  ;;  %2592 = vmatprep.mubr.msk.bf16.mxu1 %vm1457_vm5, %v1978_v37  ;;  %v4609_v21 = vld [vmem:[%s4700_s7] ss:$0 sm:$0xff] }
 0x13e   : > { %2588 = vmatprep.mubr.msk.bf16.mxu0 %vm1457_vm5, %v1974_v31 }
 0x13f   : > { %v1940_v25 = vpop.permute.xlu1 %1939 }
 0x140   : > { %v1980_v8 = vsel %vm1188_vm4, %v1962_v44, %v1940_v25 }
 0x141   : > { %2593 = vmatmul.mubr.msk.bf16.vlgmr.msra.gmra.mxu1 %vm1457_vm5, %v1980_v8 }
 0x143   : > { %v1918_v10 = vpop.permute.xlu1 %1917 }
 0x144   : > { %v1965_v63 = vsel %vm1163_vm3, %v4951_v16, %v1918_v10 }
 0x145   : > { %2589 = vmatmul.mubr.msk.bf16.gmra.mxu0 %vm1457_vm5, %v1976_v60 }
 0x147   : > { %v1920_v32 = vpop.permute.xlu1 %1919 }
 0x148   : > { %v1968_v57 = vsel %vm1163_vm3, %v4954_v28, %v1920_v32 }
 0x14b   : > { %v1942_v51 = vpop.permute.xlu1 %1941 }
 0x14c   : > { %v1982_v20 = vsel %vm1188_vm4, %v1965_v63, %v1942_v51 }
 0x14d   : > { %2596 = vmatprep.mubr.msk.bf16.mxu1 %vm1457_vm5, %v1982_v20 }
 0x14f   : > { %v1944_v58 = vpop.permute.xlu1 %1943 }
 0x150   : > { %v1984_v61 = vsel %vm1188_vm4, %v1968_v57, %v1944_v58 }
 0x151   : > { %2597 = vmatmul.mubr.msk.bf16.gmra.mxu1 %vm1457_vm5, %v1984_v61 }
 0x1c9   : > { %v2558_v46 = vpop.f32.mrf.mxu1 }
 0x1cb   : > { %v1657_v24 = vpop.f32.mrf.mxu1 }
 0x1cd   : > { %v2559_v56 = vpop.f32.mrf.mxu1 }
 0x1cf   : > { %v1660_v39 = vpop.f32.mrf.mxu1 }
 0x1d1   : > { %v2530_v15 = vpop.f32.mrf.mxu0 }
 0x1d2   : > { %v1666_v18 = vadd.f32 %v2558_v46, %v2530_v15 }
 0x1d3   : > { %v1508_v53 = vpop.f32.mrf.mxu0 }
 0x1d4   : > { %v1658_v14 = vadd.f32 %v1657_v24, %v1508_v53 }
 0x1d5   : > { %v2531_v23 = vpop.f32.mrf.mxu0 }
 0x1d6   : > { %v2562_v52 = vpop.f32.mrf.mxu1  ;;  %v1669_v11 = vadd.f32 %v2559_v56, %v2531_v23 }
 0x1d7   : > { %v1511_v17 = vpop.f32.mrf.mxu0 }
 0x1d8   : > { %v1673_v45 = vpop.f32.mrf.mxu1  ;;  %v1661_v25 = vadd.f32 %v1660_v39, %v1511_v17 }
 0x1da   : > { %v2563_v29 = vpop.f32.mrf.mxu1 }
 0x1dc   : > { %v4588_v19 = vpop.f32.mrf.mxu1 }
 0x1dd   : > { %v2534_v27 = vpop.f32.mrf.mxu0 }
 0x1de   : > { %v1682_v10 = vadd.f32 %v2562_v52, %v2534_v27 }
 0x1df   : > { %v1524_v40 = vpop.f32.mrf.mxu0 }
 0x1e0   : > { %v1674_v20 = vadd.f32 %v1673_v45, %v1524_v40 }
 0x1e1   : > { %v2535_v38 = vpop.f32.mrf.mxu0 }
 0x1e2   : > { %v2566_v54 = vpop.f32.mrf.mxu1  ;;  %v1685_v24 = vadd.f32 %v2563_v29, %v2535_v38 }
 0x1e3   : > { %v4590_v30 = vpop.f32.mrf.mxu0 }
 0x1e4   : > { %v1689_v55 = vpop.f32.mrf.mxu1  ;;  %v1677_v45 = vadd.f32 %v4588_v19, %v4590_v30 }
 0x1e6   : > { %v2567_v49 = vpop.f32.mrf.mxu1 }
 0x1e8   : > { %v1692_v33 = vpop.f32.mrf.mxu1 }
 0x1e9   : > { %v2538_v43 = vpop.f32.mrf.mxu0 }
 0x1ea   : > { %v1698_v6 = vadd.f32 %v2566_v54, %v2538_v43 }
 0x1eb   : > { %v1540_v36 = vpop.f32.mrf.mxu0 }
 0x1ec   : > { %v1690_v7 = vadd.f32 %v1689_v55, %v1540_v36 }
 0x1ed   : > { %v2539_v0 = vpop.f32.mrf.mxu0 }
 0x1ee   : > { %v4592_v22 = vpop.f32.mrf.mxu1  ;;  %v1701_v60 = vadd.f32 %v2567_v49, %v2539_v0 }
 0x1ef   : > { %v1543_v41 = vpop.f32.mrf.mxu0 }
 0x1f0   : > { %v4596_v13 = vpop.f32.mrf.mxu1  ;;  %v1693_v34 = vadd.f32 %v1692_v33, %v1543_v41 }
 0x1f2   : > { %v4602_v26 = vpop.f32.mrf.mxu1 }
 0x1f4   : > { %v4611_v37 = vpop.f32.mrf.mxu1 }
 0x1f5   : > { %v4594_v62 = vpop.f32.mrf.mxu0 }
 0x1f6   : > { %v1714_v30 = vadd.f32 %v4592_v22, %v4594_v62 }
 0x1f7   : > { %v4598_v12 = vpop.f32.mrf.mxu0 }
 0x1f8   : > { %v1706_v36 = vadd.f32 %v4596_v13, %v4598_v12 }
 0x1f9   : > { %v4600_v3 = vpop.f32.mrf.mxu0 }
 0x1fa   : > { %v1717_v33 = vadd.f32 %v4602_v26, %v4600_v3 }
 0x1fb   : > { %v4604_v42 = vpop.f32.mrf.mxu0 }
 0x1fc   : > { %v1709_v22 = vadd.f32 %v4611_v37, %v4604_v42 }
 0x1fd   : > { %v2586_v5 = vpop.f32.mrf.mxu0 }
 0x1fe   : > { %v2148_v35 = vadd.f32 %v2586_v5, %v1666_v18 }
 0x1ff   : > { %v2083_v31 = vpop.f32.mrf.mxu0 }
 0x200   : > { %v2171_v48 = vadd.f32 %v4609_v21, %v2148_v35  ;;  %v2146_v44 = vadd.f32 %v2083_v31, %v1658_v14 }
 0x201   : > { %v2587_v8 = vpop.f32.mrf.mxu0  ;;  %v2594_v47 = vpop.f32.mrf.mxu1 }
 0x202   : > { %2187 = vst.msk [vmem:[%s4618_s17 + $0x10] sm:$0xff] %vm1188_vm4, %v2171_v48  ;;  %v2169_v2 = vadd.f32 %v4609_v21, %v2146_v44  ;;  %v2149_v50 = vadd.f32 %v2587_v8, %v1669_v11  ;;  %v2156_v4 = vadd.f32 %v2594_v47, %v1698_v6 }
 0x203   : > { %v2086_v32 = vpop.f32.mrf.mxu0  ;;  %v2115_v9 = vpop.f32.mrf.mxu1 }
 0x204   : > { %2185 = vst.msk [vmem:[%s4618_s17] sm:$0xff] %vm1188_vm4, %v2169_v2  ;;  %v2172_v1 = vadd.f32 %v4609_v21, %v2149_v50  ;;  %v2179_v16 = vadd.f32 %v4609_v21, %v2156_v4  ;;  %v2147_v63 = vadd.f32 %v2086_v32, %v1661_v25  ;;  %v2154_v51 = vadd.f32 %v2115_v9, %v1690_v7 }
 0x205   : > { %v2590_v59 = vpop.f32.mrf.mxu0  ;;  %v2595_v28 = vpop.f32.mrf.mxu1 }
 0x206   : > { %2188 = vst.msk [vmem:[%s4618_s17 + $0x18] sm:$0xff] %vm1188_vm4, %v2172_v1  ;;  %2195 = vst.msk [vmem:[%s4618_s17 + $0x50] sm:$0xff] %vm1188_vm4, %v2179_v16  ;;  %v2170_v57 = vadd.f32 %v4609_v21, %v2147_v63  ;;  %v2177_v58 = vadd.f32 %v4609_v21, %v2154_v51  ;;  %v2152_v61 = vadd.f32 %v2590_v59, %v1682_v10 }
 0x207   : > { %v2157_v46 = vadd.f32 %v2595_v28, %v1701_v60  ;;  %v2099_v56 = vpop.f32.mrf.mxu0  ;;  %v2118_v15 = vpop.f32.mrf.mxu1 }
 0x208   : > { %2186 = vst.msk [vmem:[%s4618_s17 + $0x8] sm:$0xff] %vm1188_vm4, %v2170_v57  ;;  %2193 = vst.msk [vmem:[%s4618_s17 + $0x40] sm:$0xff] %vm1188_vm4, %v2177_v58  ;;  %v2175_v53 = vadd.f32 %v4609_v21, %v2152_v61  ;;  %v2150_v23 = vadd.f32 %v2099_v56, %v1674_v20  ;;  %v2155_v52 = vadd.f32 %v2118_v15, %v1693_v34 }
 0x209   : > { %v2180_v39 = vadd.f32 %v4609_v21, %v2157_v46  ;;  %v2591_v17 = vpop.f32.mrf.mxu0 }
 0x20a   : > { %2191 = vst.msk [vmem:[%s4618_s17 + $0x30] sm:$0xff] %vm1188_vm4, %v2175_v53  ;;  %v2173_v27 = vadd.f32 %v4609_v21, %v2150_v23  ;;  %v2178_v29 = vadd.f32 %v4609_v21, %v2155_v52  ;;  %v2153_v40 = vadd.f32 %v2591_v17, %v1685_v24 }
 0x20b   : > { %2196 = vst.msk [vmem:[%s4618_s17 + $0x58] sm:$0xff] %vm1188_vm4, %v2180_v39  ;;  %v2102_v38 = vpop.f32.mrf.mxu0 }
 0x20c   : > { %2189 = vst.msk [vmem:[%s4618_s17 + $0x20] sm:$0xff] %vm1188_vm4, %v2173_v27  ;;  %2194 = vst.msk [vmem:[%s4618_s17 + $0x48] sm:$0xff] %vm1188_vm4, %v2178_v29  ;;  %v2176_v54 = vadd.f32 %v4609_v21, %v2153_v40  ;;  %v2151_v55 = vadd.f32 %v2102_v38, %v1677_v45 }
 0x20e   : > { %2192 = vst.msk [vmem:[%s4618_s17 + $0x38] sm:$0xff] %vm1188_vm4, %v2176_v54  ;;  %v2174_v19 = vadd.f32 %v4609_v21, %v2151_v55 }
 0x210   : > { %2190 = vst.msk [vmem:[%s4618_s17 + $0x28] sm:$0xff] %vm1188_vm4, %v2174_v19 }
 0x211   : > { %v2598_v43 = vpop.f32.mrf.mxu1 }
 0x212   : > { %v2160_v49 = vadd.f32 %v2598_v43, %v1714_v30 }
 0x213   : > { %v2131_v0 = vpop.f32.mrf.mxu1 }
 0x214   : > { %v2183_v41 = vadd.f32 %v4609_v21, %v2160_v49  ;;  %v2158_v18 = vadd.f32 %v2131_v0, %v1706_v36 }
 0x215   : > { %v2599_v5 = vpop.f32.mrf.mxu1 }
 0x216   : > { %2199 = vst.msk [vmem:[%s4618_s17 + $0x70] sm:$0xff] %vm1188_vm4, %v2183_v41  ;;  %v2181_v62 = vadd.f32 %v4609_v21, %v2158_v18  ;;  %v2161_v14 = vadd.f32 %v2599_v5, %v1717_v33 }
 0x217   : > { %v2134_v35 = vpop.f32.mrf.mxu1 }
 0x218   : > { %2197 = vst.msk [vmem:[%s4618_s17 + $0x60] sm:$0xff] %vm1188_vm4, %v2181_v62  ;;  %v2184_v13 = vadd.f32 %v4609_v21, %v2161_v14  ;;  %v2159_v12 = vadd.f32 %v2134_v35, %v1709_v22 }
 0x21a   : > { %2200 = vst.msk [vmem:[%s4618_s17 + $0x78] sm:$0xff] %vm1188_vm4, %v2184_v13  ;;  %v2182_v3 = vadd.f32 %v4609_v21, %v2159_v12 }
 0x21c   : > { %2198 = vst.msk [vmem:[%s4618_s17 + $0x68] sm:$0xff] %vm1188_vm4, %v2182_v3 }
 0x21d PF: > { %s18_s9 = sadd.s32 1, %s2818_s9   ;;  %s4955_s15 = sld [smem:[#allocation3_spill]] }
 0x21e   : > { %p15_p10 = scmp.ge.s32.totalorder %s18_s9, 6   ;;  %s4956_s27 = smov %s2810_s29 }
 0x21f   : > { %s4957_s28 = smov %s2814_s30  ;;  %s4958_s29 = smov %s4961_s10 }
 0x220   :  { %17 = sbr.rel (!%p15_p10) target bundleno = 3 (0x3), region = 95 }
 0x223   : > { %s4959_s30 = smov %s4955_s15 }

// kernel: residual_block_pallas.3
= control target key start
LH: loop header
LB: loop body
LE: loop exit
PB: predicated region body
PF: predicated region fallthrough
CT: control target
= control target key end

     0   :  { %s5372_s0 = inlined_call_operand.vmem [shape: f32[2,16,16,64], index: 0, kind: input, shape index: {}]   ;;  %s5373_s1 = inlined_call_operand.vmem [shape: f32[4,2,16,64], index: 1, kind: input, shape index: {}]   ;;  %s5374_s2 = inlined_call_operand.vmem [shape: f32[2,1,64], index: 2, kind: input, shape index: {}]   ;;  %s5375_s3 = inlined_call_operand.vmem [shape: f32[2,1,64], index: 3, kind: input, shape index: {}]   ;;  %s5376_s4 = inlined_call_operand.vmem [shape: f32[128,1], index: 4, kind: input, shape index: {}]   ;;  %s5377_s5 = inlined_call_operand.vmem [shape: f32[128,1], index: 5, kind: input, shape index: {}]   ;;  %s5378_s6 = inlined_call_operand.vmem [shape: bf16[576,64], index: 6, kind: input, shape index: {}]   ;;  %s5379_s7 = inlined_call_operand.vmem [shape: f32[1,64], index: 7, kind: input, shape index: {}]   ;;  %s5380_s8 = inlined_call_operand.vmem [shape: f32[2,16,16,32], index: 8, kind: input, shape index: {}]   ;;  %s5381_s9 = inlined_call_operand.vmem [shape: bf16[32,64], index: 9, kind: input, shape index: {}]   ;;  %s5382_s10 = inlined_call_operand.vmem [shape: f32[1,64], index: 10, kind: input, shape index: {}]   ;;  %s5383_s11 = inlined_call_operand.hbm [shape: f32[2,16,16,64], index: 11, kind: output, shape index: {}]  }
   0x1   :  { %5448 = sst [smem:[#allocation101_spill]] %s5383_s11 }
   0x2   :  { %16 = vsyncpa [#allocation4], 0 }
   0x3   :  { %18 = vsyncpa [#allocation4 + $0x1], 0  ;;  %s3351_s17 = smov 0   ;;  %s3353_s18 = smov 0  }
   0x4   :  { %s3355_s19 = smov 0   ;;  %s3357_s20 = smov 0  }
   0x5   :  { %s3359_s21 = smov 0   ;;  %s3361_s22 = smov 0  }
   0x6   :  { %s3363_s23 = smov 0   ;;  %s3365_s24 = smov 0  }
   0x7 LB: > { %5449 = sst [smem:[#allocation6_spill]] %s3256_s17  ;;  %s2733_s25 = sadd.s32 4294967295, %s3284_s24   ;;  %s3284_s24 = sphi %s3365_s24, %s24_s24   ;;  %s3280_s23 = sphi %s3363_s23, %s5706_s23   ;;  %s3276_s22 = sphi %s3361_s22, %s5702_s22   ;;  %s3272_s21 = sphi %s3359_s21, %s5701_s21   ;;  %s3268_s20 = sphi %s3357_s20, %s5700_s20   ;;  %s3264_s19 = sphi %s3355_s19, %s5699_s19   ;;  %s3260_s18 = sphi %s3353_s18, %s5705_s18   ;;  %s3256_s17 = sphi %s3351_s17, %s5704_s17  }
   0x8   : > { %5450 = sst [smem:[#allocation7_spill]] %s3264_s19  ;;  %s2734_s26 = sadd.s32 4294967294, %s3284_s24  }
   0x9   : > { %5451 = sst [smem:[#allocation8_spill]] %s3276_s22  ;;  %s33_s27 = sadd.s32 1, %s3276_s22 }
   0xa   : > { %5452 = sst [smem:[#allocation9_spill]] %s3280_s23  ;;  %p34_p0 = scmp.ge.s32.totalorder %s33_s27, 2 }
   0xb   : > { %5453 = sst [smem:[#allocation10_spill]] %s3284_s24  ;;  %s36_s28 = sadd.s32 1, %s3280_s23 }
   0xc   : > { %p319_p1 = scmp.ne.s32.totalorder %s3264_s19, %s3260_s18  ;;  %p320_p2 = scmp.eq.s32.totalorder %s2733_s25, 3 }
   0xd   : > { %s5708_s27 = smov (%p34_p0, %s33_s27), 0  ;;  %s5710_s28 = smov (!%p34_p0, %s36_s28), %s3280_s23 }
   0xe   : > { %5454 = sst [smem:[#allocation11_spill]] %s5708_s27  ;;  %s305_s29 = ssub.s32 %s3276_s22, %s5708_s27 }
   0xf   : > { %p3402_p3 = por %p320_p2, %p319_p1  ;;  %p38_p4 = scmp.ge.s32.totalorder %s5710_s28, 2 }
  0x10   : > { %p325_p5 = scmp.ne.s32.totalorder %s3260_s18, %s3256_s17  ;;  %p326_p6 = scmp.eq.s32.totalorder %s2734_s26, 3 }
  0x11   : > { %p2739_p7 = scmp.ge.s32.totalorder %s3284_s24, 1  ;;  %s5712_s28 = smov (%p38_p4, %s5710_s28), 0 }
  0x12   : > { %5456 = sst [smem:[#allocation12_spill]] %s5712_s28  ;;  %p3411_p8 = por %p326_p6, %p325_p5 }
  0x13   : > { %p414_p9 = scmp.lt.s32.totalorder %s3284_s24, 5  ;;  %s304_s13 = ssub.s32 %s3280_s23, %s5712_s28 }
  0x14   : > { %s5457_s12 = scalar_select %p3411_p8, 1, 0 }
  0x15   : > { %s309_s14 = sadd.s32 1, %s3264_s19  ;;  %s306_s15 = sor.u32 %s305_s29, %s304_s13 }
  0x16   : > { %5458 = sst [smem:[#allocation13_spill]] %s5457_s12  ;;  %p415_p10 = pnand %p2739_p7, %p414_p9 }
  0x17   : > { %p307_p11 = scmp.eq.s32.totalorder %s306_s15, 0 }
  0x18   : > { %418 = sbr.rel (%p415_p10) target bundleno = 544 (0x220), region = 64 }
  0x19   : > { %s3420_s16 = scalar_select %p307_p11, %s3264_s19, %s309_s14  }
  0x1b   : > { %5459 = sst [smem:[#allocation14_spill]] %s3420_s16 }
  0x1d   : > { %v867_v0 = vld [vmem:[%s5377_s5] sm:$0xff]  ;;  %s2741_s12 = sshll.u32 %s3268_s20, 3  ;;  %p483_p12 = scmp.lt.s32.totalorder %s3272_s21, 1  ;;  %v5394_v2 = vmov 0   ;;  %v868_v3 = vld [vmem:[%s5377_s5 + $0x8] sm:$0xff]  ;;  %v854_v5 = vld [vmem:[%s5376_s4 + $0x18] sm:$0xff] }
  0x1e   : > { %v851_v1 = vld [vmem:[%s5376_s4] sm:$0xff]  ;;  %3043 = vset.pattern.permute.xlu1 %v5394_v2  ;;  %3042 = vset.pattern.permute.xlu0 %v5394_v2  ;;  %p485_p13 = scmp.lt.s32.totalorder %s2741_s12, 15  ;;  %v852_v4 = vld [vmem:[%s5376_s4 + $0x8] sm:$0xff]  ;;  %s2745_s14 = sshll.u32 %s3272_s21, 1  ;;  %v853_v6 = vld [vmem:[%s5376_s4 + $0x10] sm:$0xff]  ;;  %vm765_vm0 = vcmask 519168  }
  0x1f   : > { %1089 = vperm.xlu1 %3043, %v867_v0   ;;  %952 = vperm.xlu0 %3042, %v851_v1   ;;  %s484_s27 = scalar_select %p483_p12, %s3272_s21, 1  ;;  %v870_v9 = vld [vmem:[%s5377_s5 + $0x18] sm:$0xff]  ;;  %v869_v19 = vld [vmem:[%s5377_s5 + $0x10] sm:$0xff]  ;;  %v856_v29 = vld [vmem:[%s5376_s4 + $0x28] sm:$0xff]  ;;  %vm1247_vm3 = vcmask 523264   ;;  %vm2403_vm4 = vcmask 261120  }
  0x20   : > { %s5714_s12 = smov (!%p485_p13, %s2741_s12), 15  ;;  %1584 = vmatprep.subr.bf16.mxu0 %v5394_v2  ;;  %1777 = vmatprep.subr.bf16.mxu1 %v5394_v2  ;;  %s494_s19 = sadd.s32 %s3268_s20, %s2745_s14  ;;  %v855_v30 = vld [vmem:[%s5376_s4 + $0x20] sm:$0xff]  ;;  %v872_v51 = vld [vmem:[%s5377_s5 + $0x28] sm:$0xff] }
  0x21   : > { %s2743_s22 = sshll.u32 %s484_s27, 5  ;;  %s504_s28 = scalar_lea.vmem %s5374_s2, %s484_s27  ;;  %v871_v55 = vld [vmem:[%s5377_s5 + $0x20] sm:$0xff] }
  0x22   : > { %s2742_s23 = sshll.u32 %s5714_s12, 1  ;;  %s507_s29 = scalar_lea.vmem %s5375_s3, %s484_s27  ;;  %v3457_v7 = vld [vmem:[%s504_s28] ss:$0 sm:$0xff] }
  0x23   : > { %1094 = vperm.xlu1 %3043, %v868_v3   ;;  %957 = vperm.xlu0 %3042, %v852_v4   ;;  %s3447_s13 = sadd.s32 %s2743_s22, %s2742_s23  ;;  %v3467_v8 = vld [vmem:[%s507_s29] ss:$0 sm:$0xff]  ;;  %p495_p0 = scmp.lt.s32.totalorder %s494_s19, 3 }
  0x24   : > { %s2744_s12 = sshll.u32 %s3447_s13, 3  ;;  %p703_p1 = scmp.gt.s32.totalorder %s3268_s20, 0 }
  0x25   : > { %s3465_s23 = scalar_lea.vmem %s5372_s0, %s2744_s12  ;;  %s5716_s19 = smov (!%p495_p0, %s494_s19), 3 }
  0x26   : > { %v523_v10 = vld [vmem:[%s3465_s23] sm:$0xff]  ;;  %v524_v11 = vld [vmem:[%s3465_s23 + $0x8] sm:$0xff]  ;;  %v525_v12 = vld [vmem:[%s3465_s23 + $0x10] sm:$0xff]  ;;  %s2891_s22 = sshll.u32 %s5716_s19, 5  ;;  %s3287_s29 = smov 64  }
  0x27   : > { %967 = vperm.xlu1 %3043, %v854_v5   ;;  %962 = vperm.xlu0 %3042, %v853_v6   ;;  %v545_v13 = vmul.f32 %v3457_v7, %v523_v10  ;;  %v546_v14 = vmul.f32 %v3457_v7, %v524_v11  ;;  %v526_v15 = vld [vmem:[%s3465_s23 + $0x18] sm:$0xff]  ;;  %v547_v16 = vmul.f32 %v3457_v7, %v525_v12  ;;  %v527_v17 = vld [vmem:[%s3465_s23 + $0x20] sm:$0xff]  ;;  %v528_v18 = vld [vmem:[%s3465_s23 + $0x28] sm:$0xff]  ;;  %s3518_s16 = scalar_lea.vmem %s5373_s1, %s2891_s22  ;;  %p706_p2 = scmp.lt.s32.totalorder %s3268_s20, 1 }
  0x28   : > { %v548_v20 = vmul.f32 %v3457_v7, %v526_v15  ;;  %v549_v21 = vmul.f32 %v3457_v7, %v527_v17  ;;  %v550_v22 = vmul.f32 %v3457_v7, %v528_v18  ;;  %v529_v23 = vld [vmem:[%s3465_s23 + $0x30] sm:$0xff]  ;;  %v530_v24 = vld [vmem:[%s3465_s23 + $0x38] sm:$0xff]  ;;  %v531_v35 = vld [vmem:[%s3465_s23 + $0x40] sm:$0xff]  ;;  %s3628_s26 = scalar_select %p703_p1, 1, 0 }
  0x29   : > { %v3490_v25 = vadd.f32 %v3467_v8, %v545_v13  ;;  %v3493_v26 = vadd.f32 %v3467_v8, %v546_v14  ;;  %v3496_v27 = vadd.f32 %v3467_v8, %v547_v16  ;;  %v551_v28 = vmul.f32 %v3457_v7, %v529_v23  ;;  %v532_v36 = vld [vmem:[%s3465_s23 + $0x48] sm:$0xff]  ;;  %v533_v44 = vld [vmem:[%s3465_s23 + $0x50] sm:$0xff]  ;;  %v534_v45 = vld [vmem:[%s3465_s23 + $0x58] sm:$0xff]  ;;  %s5092_s25 = scalar_lea.vmem %s5380_s8, %s2744_s12  ;;  %s479_s13 = sand.u32 1, %s3260_s18  }
  0x2a   : > { %v3506_v31 = vadd.f32 %v3467_v8, %v548_v20  ;;  %v3509_v32 = vadd.f32 %v3467_v8, %v549_v21  ;;  %v3512_v33 = vadd.f32 %v3467_v8, %v550_v22  ;;  %v552_v34 = vmul.f32 %v3457_v7, %v530_v24  ;;  %v709_v48 = vld [vmem:[%s3518_s16] sm:$0xff]  ;;  %v710_v49 = vld [vmem:[%s3518_s16 + $0x8] sm:$0xff]  ;;  %v537_v0 = vld [vmem:[%s3465_s23 + $0x70] sm:$0xff]  ;;  %s705_s19 = scvt.s32.f32 %s3628_s26  ;;  %s2912_s11 = sshll.u32 %s3268_s20, 4 }
  0x2b   : > { %1104 = vperm.xlu1 %3043, %v870_v9   ;;  %1099 = vperm.xlu0 %3042, %v869_v19   ;;  %v2754_v37 = vmul.f32 -1.442695, %v3490_v25  ;;  %v2755_v38 = vmul.f32 -1.442695, %v3493_v26  ;;  %v2756_v39 = vmul.f32 -1.442695, %v3496_v27  ;;  %v3526_v40 = vadd.f32 %v3467_v8, %v551_v28 }
  0x2c   : > { %v2757_v41 = vmul.f32 -1.442695, %v3506_v31  ;;  %v2758_v42 = vmul.f32 -1.442695, %v3509_v32  ;;  %v3531_v43 = vadd.f32 %v3467_v8, %v552_v34  ;;  %v2759_v46 = vmul.f32 -1.442695, %v3512_v33 }
  0x2d   : > { %3112 = vpow2.f32 %v2754_v37  ;;  %v2760_v47 = vmul.f32 -1.442695, %v3526_v40  ;;  %v553_v50 = vmul.f32 %v3457_v7, %v531_v35  ;;  %v711_v53 = vmul.f32 %v3457_v7, %v709_v48  ;;  %v535_v59 = vld [vmem:[%s3465_s23 + $0x60] sm:$0xff]  ;;  %v536_v60 = vld [vmem:[%s3465_s23 + $0x68] sm:$0xff]  ;;  %v538_v4 = vld [vmem:[%s3465_s23 + $0x78] sm:$0xff]  ;;  %s2740_s23 = sshll.u32 %s479_s13, 7 }
  0x2e   : > { %3114 = vpow2.f32 %v2755_v38  ;;  %v2761_v52 = vmul.f32 -1.442695, %v3531_v43  ;;  %v712_v54 = vmul.f32 %v3457_v7, %v710_v49  ;;  %v554_v56 = vmul.f32 %v3457_v7, %v532_v36  ;;  %v3050_v5 = vld [vmem:[%s5378_s6 + $0x98] sm:$0xff]   ;;  %v857_v9 = vld [vmem:[%s5376_s4 + $0x30] sm:$0xff]  ;;  %v3055_v38 = vld [vmem:[%s5378_s6 + $0x88] sm:$0xff]   ;;  %s5227_s27 = scalar_lea.vmem [#allocation3], %s2740_s23 }
  0x2f   : > { %977 = vperm.xlu1 %3043, %v856_v29   ;;  %972 = vperm.xlu0 %3042, %v855_v30   ;;  %3116 = vpow2.f32 %v2756_v39  ;;  %v3551_v57 = vadd.f32 %v3467_v8, %v553_v50  ;;  %v555_v58 = vmul.f32 %v3457_v7, %v533_v44  ;;  %v3557_v61 = vadd.f32 %v3467_v8, %v711_v53  ;;  %v858_v6 = vld [vmem:[%s5376_s4 + $0x38] sm:$0xff]  ;;  %v3052_v16 = vld [vmem:[%s5378_s6 + $0x90] sm:$0xff]   ;;  %s2887_s17 = sshll.u32 %s3272_s21, 5  ;;  %s2597_s21 = sshll.u32 %s5227_s27, 4  ;;  %s5312_s21 = int_to_ptr.vmem [resolvable:$true] %s2597_s21 }
  0x30   : > { %3118 = vpow2.f32 %v2757_v41  ;;  %v3560_v62 = vadd.f32 %v3467_v8, %v712_v54  ;;  %v556_v63 = vmul.f32 %v3457_v7, %v534_v45  ;;  %v3565_v1 = vadd.f32 %v3467_v8, %v554_v56  ;;  %v2773_v17 = vld [vmem:[%s3518_s16 + $0x18] sm:$0xff]  ;;  %1585 = vmatpush1.bf16.msra.mxu0 %v3050_v5  ;;  %v873_v36 = vld [vmem:[%s5377_s5 + $0x30] sm:$0xff]  ;;  %v859_v45 = vld [vmem:[%s5376_s4 + $0x40] sm:$0xff]  ;;  %s2594_s24 = sadd.s32 %s2912_s11, %s2887_s17  ;;  %s5694_s28 = sld [smem:[#allocation101_spill]] }
  0x31   : > { %3120 = vpow2.f32 %v2758_v42  ;;  %v3568_v3 = vadd.f32 %v3467_v8, %v555_v58  ;;  %v2770_v10 = vmul.f32 -1.442695, %v3557_v61  ;;  %v2762_v13 = vmul.f32 -1.442695, %v3551_v57  ;;  %1586 = vmatprep.subr.bf16.mxu0 %v5394_v2  ;;  %v874_v24 = vld [vmem:[%s5377_s5 + $0x38] sm:$0xff]  ;;  %v3064_v49 = vld [vmem:[%s5378_s6 + $0x30] sm:$0xff]  }
  0x32   : > { %3122 = vpow2.f32 %v2759_v46  ;;  %v2771_v11 = vmul.f32 -1.442695, %v3560_v62  ;;  %v3583_v12 = vadd.f32 %v3467_v8, %v556_v63  ;;  %v2763_v14 = vmul.f32 -1.442695, %v3565_v1  ;;  %v3062_v39 = vld [vmem:[%s5378_s6 + $0x38] sm:$0xff]   ;;  %s2888_s20 = sshll.u32 %s2594_s24, 7 }
  0x33   : > { %1114 = vperm.xlu1 %3043, %v872_v51   ;;  %1109 = vperm.xlu0 %3042, %v871_v55   ;;  %3124 = vpow2.f32 %v2760_v47  ;;  %v557_v15 = vmul.f32 %v3457_v7, %v535_v59  ;;  %v2764_v18 = vmul.f32 -1.442695, %v3568_v3  ;;  %v558_v19 = vmul.f32 %v3457_v7, %v536_v60  ;;  %v3067_v59 = vld [vmem:[%s5378_s6 + $0x28] sm:$0xff]   ;;  %v3061_v5 = vld [vmem:[%s5378_s6 + $0x78] sm:$0xff]   ;;  %s5321_s22 = scalar_lea.sflag [#allocation4], %s479_s13  ;;  %s3288_s12 = smov [#allocation3]  }
  0x34   : > { %3126 = vpow2.f32 %v2761_v52  ;;  %v559_v20 = vmul.f32 %v3457_v7, %v537_v0  ;;  %v560_v22 = vmul.f32 %v3457_v7, %v538_v4  ;;  %v737_v23 = vmul.f32 %v2773_v17, %v3457_v7  ;;  %1587 = vmatpush1.bf16.msra.mxu0 %v3052_v16  ;;  %1778 = vmatpush1.bf16.msra.mxu1 %v3062_v39  ;;  %v3058_v52 = vld [vmem:[%s5378_s6 + $0x80] sm:$0xff]   ;;  %s3196_s14 = sshll.u32 %s3288_s12, 4  ;;  %s3197_s14 = int_to_ptr.vmem [resolvable:$false] %s3196_s14 }
  0x35   : > { %3128 = vpow2.f32 %v2770_v10  ;;  %v3597_v21 = vadd.f32 %v3467_v8, %v557_v15  ;;  %v2765_v28 = vmul.f32 -1.442695, %v3583_v12  ;;  %v3607_v29 = vadd.f32 %v3467_v8, %v558_v19  ;;  %1588 = vmatprep.subr.bf16.mxu0 %v5394_v2  ;;  %1779 = vmatprep.subr.bf16.mxu1 %v5394_v2  ;;  %v3063_v19 = vld [vmem:[%s5378_s6 + $0x70] sm:$0xff]   ;;  %s3198_s23 = scalar_lea.vmem %s3197_s14, 4096  ;;  %p3199_p7 = scmp.lt.s32.totalorder %s5312_s21, %s3197_s14 }
  0x36   : > { %3130 = vpow2.f32 %v2771_v11  ;;  %v3610_v30 = vadd.f32 %v3467_v8, %v559_v20  ;;  %v3614_v35 = vadd.f32 %v3467_v8, %v560_v22  ;;  %v3634_v42 = vadd.f32 %v3467_v8, %v737_v23 }
  0x37   : > { %987 = vperm.xlu1 %3043, %v858_v6   ;;  %982 = vperm.xlu0 %3042, %v857_v9   ;;  %3132 = vpow2.f32 %v2762_v13  ;;  %v2766_v34 = vmul.f32 -1.442695, %v3597_v21  ;;  %v2767_v37 = vmul.f32 -1.442695, %v3607_v29  ;;  %v931_v10 = vlaneseq }
  0x38   : > { %3134 = vpow2.f32 %v2763_v14  ;;  %v3631_v41 = vmul.f32 -1.442695, %v3610_v30  ;;  %v3641_v46 = vmul.f32 -1.442695, %v3614_v35  ;;  %1589 = vmatpush1.bf16.msra.mxu0 %v3055_v38  ;;  %v3651_v55 = vmul.f32 -1.442695, %v3634_v42  ;;  %1780 = vmatpush1.bf16.msra.mxu1 %v3064_v49 }
  0x39   : > { %3136 = vpow2.f32 %v2764_v18  ;;  %1590 = vmatprep.subr.bf16.mxu0 %v5394_v2  ;;  %1781 = vmatprep.subr.bf16.mxu1 %v5394_v2  ;;  %v3070_v14 = vld [vmem:[%s5378_s6 + $0x20] sm:$0xff]   ;;  %v3669_v23 = vshrl.u32 %v931_v10, 7 }
  0x3a   : > { %v3113_v44 = vpop.eup %3112  ;;  %3138 = vpow2.f32 %v2765_v28 }
  0x3b   : > { %v3115_v47 = vpop.eup %3114  ;;  %1124 = vperm.xlu1 %3043, %v874_v24   ;;  %1119 = vperm.xlu0 %3042, %v873_v36   ;;  %v631_v48 = vadd.f32 1.0, %v3113_v44  ;;  %3140 = vpow2.f32 %v2766_v34  ;;  %v3072_v34 = vld [vmem:[%s5378_s6 + $0x18] sm:$0xff]   ;;  %v3066_v44 = vld [vmem:[%s5378_s6 + $0x68] sm:$0xff]   ;;  %vm933_vm1 = vcmp.lt.s32.totalorder %v3669_v23, 1  ;;  %vm1070_vm2 = vcmp.lt.s32.totalorder %v3669_v23, 7 }
  0x3c   : > { %v3117_v50 = vpop.eup %3116  ;;  %v632_v51 = vadd.f32 1.0, %v3115_v47  ;;  %3142 = vpow2.f32 %v2767_v37  ;;  %1591 = vmatpush1.bf16.msra.mxu0 %v3058_v52  ;;  %1782 = vmatpush1.bf16.msra.mxu1 %v3067_v59 }
  0x3d   : > { %v3119_v53 = vpop.eup %3118  ;;  %3144 = vrcp.f32 %v631_v48  ;;  %v633_v54 = vadd.f32 1.0, %v3117_v50  ;;  %1592 = vmatprep.subr.bf16.mxu0 %v5394_v2  ;;  %1783 = vmatprep.subr.bf16.mxu1 %v5394_v2  ;;  %v3069_v50 = vld [vmem:[%s5378_s6 + $0x60] sm:$0xff]  }
  0x3e   : > { %v3121_v56 = vpop.eup %3120  ;;  %3146 = vrcp.f32 %v632_v51  ;;  %v634_v58 = vadd.f32 1.0, %v3119_v53  ;;  %v3074_v51 = vld [vmem:[%s5378_s6 + $0x10] sm:$0xff]  }
  0x3f   : > { %v3123_v60 = vpop.eup %3122  ;;  %992 = vperm.xlu0 %3042, %v859_v45   ;;  %3148 = vrcp.f32 %v633_v54  ;;  %v635_v63 = vadd.f32 1.0, %v3121_v56 }
  0x40   : > { %v3125_v0 = vpop.eup %3124  ;;  %3150 = vrcp.f32 %v634_v58  ;;  %v636_v4 = vadd.f32 1.0, %v3123_v60  ;;  %1593 = vmatpush1.bf16.msra.mxu0 %v3061_v5  ;;  %1784 = vmatpush1.bf16.msra.mxu1 %v3070_v14  ;;  %v3696_v58 = vstv %s705_s19  ;;  %s3867_s19 = scalar_select %p706_p2, 1, 0 }
  0x41   : > { %v3127_v6 = vpop.eup %3126  ;;  %3152 = vrcp.f32 %v635_v63  ;;  %v637_v9 = vadd.f32 1.0, %v3125_v0  ;;  %1594 = vmatprep.subr.bf16.mxu0 %v5394_v2  ;;  %1785 = vmatprep.subr.bf16.mxu1 %v5394_v2 }
  0x42   : > { %v3129_v11 = vpop.eup %3128  ;;  %3154 = vrcp.f32 %v636_v4  ;;  %v638_v13 = vadd.f32 1.0, %v3127_v6 }
  0x43   : > { %v3131_v15 = vpop.eup %3130  ;;  %3156 = vrcp.f32 %v637_v9  ;;  %v721_v16 = vadd.f32 1.0, %v3129_v11 }
  0x44   : > { %v3133_v17 = vpop.eup %3132  ;;  %3158 = vrcp.f32 %v638_v13  ;;  %v722_v18 = vadd.f32 1.0, %v3131_v15  ;;  %1595 = vmatpush1.bf16.msra.mxu0 %v3063_v19  ;;  %1786 = vmatpush1.bf16.msra.mxu1 %v3072_v34  ;;  %v3071_v15 = vld [vmem:[%s5378_s6 + $0xb8] sm:$0xff]  }
  0x45   : > { %v3135_v20 = vpop.eup %3134  ;;  %3160 = vrcp.f32 %v721_v16  ;;  %v639_v22 = vadd.f32 1.0, %v3133_v17  ;;  %1596 = vmatprep.subr.bf16.mxu0 %v5394_v2  ;;  %1787 = vmatprep.subr.bf16.mxu1 %v5394_v2 }
  0x46   : > { %v3137_v24 = vpop.eup %3136  ;;  %3162 = vrcp.f32 %v722_v18  ;;  %v640_v28 = vadd.f32 1.0, %v3135_v20  ;;  %v3078_v20 = vld [vmem:[%s5378_s6] sm:$0xff]  }
  0x47   : > { %v3139_v36 = vpop.eup %3138  ;;  %3164 = vrcp.f32 %v639_v22  ;;  %v641_v37 = vadd.f32 1.0, %v3137_v24 }
  0x48   : > { %v3141_v38 = vpop.eup %3140  ;;  %3166 = vrcp.f32 %v640_v28  ;;  %v642_v39 = vadd.f32 1.0, %v3139_v36  ;;  %1597 = vmatpush1.bf16.msra.mxu0 %v3066_v44  ;;  %1788 = vmatpush1.bf16.msra.mxu1 %v3074_v51 }
  0x49   : > { %v3143_v45 = vpop.eup %3142  ;;  %3168 = vrcp.f32 %v641_v37  ;;  %v643_v47 = vadd.f32 1.0, %v3141_v38  ;;  %1598 = vmatprep.subr.bf16.mxu0 %v5394_v2  ;;  %1789 = vmatprep.subr.bf16.mxu1 %v5394_v2 }
  0x4a   : > { %v3145_v48 = vpop.eup %3144  ;;  %3170 = vrcp.f32 %v642_v39  ;;  %v644_v49 = vadd.f32 1.0, %v3143_v45 }
  0x4b   : > { %v3147_v52 = vpop.eup %3146  ;;  %v3689_v53 = vmul.f32 %v3145_v48, %v3490_v25  ;;  %3172 = vrcp.f32 %v643_v47  ;;  %v3073_v47 = vld [vmem:[%s5378_s6 + $0xb0] sm:$0xff]  }
  0x4c   : > { %v3149_v54 = vpop.eup %3148  ;;  %v3694_v56 = vmul.f32 %v3147_v52, %v3493_v26  ;;  %v3076_v26 = vld [vmem:[%s5378_s6 + $0x8] sm:$0xff]   ;;  %3174 = vrcp.f32 %v644_v49  ;;  %1599 = vmatpush1.bf16.msra.mxu0 %v3069_v50  ;;  %v2772_v52 = vld [vmem:[%s3518_s16 + $0x10] sm:$0xff]  ;;  %s708_s16 = scvt.s32.f32 %s3867_s19 }
  0x4d   : > { %v3151_v59 = vpop.eup %3150  ;;  %v2896_v60 = vpack.c.bf16 %v3689_v53, %v3689_v53  ;;  %v3701_v63 = vmul.f32 %v3149_v54, %v3496_v27  ;;  %v5398_v25 = vrot.slane %v3689_v53, 7  ;;  %3176 = vpow2.f32 %v3631_v41  ;;  %1608 = vmatprep.subr.bf16.mxu0 %v5394_v2  ;;  %1790 = vmatpush1.bf16.msra.mxu1 %v3076_v26 }
  0x4e   : > { %v3153_v0 = vpop.eup %3152  ;;  %v695_v4 = vpack.c.bf16 %v3694_v56, %v3689_v53  ;;  %v2897_v5 = vpack.c.bf16 %v3694_v56, %v3694_v56  ;;  %v3713_v6 = vmul.f32 %v3151_v59, %v3506_v31  ;;  %v1305_v11 = vrot.slane %v3694_v56, 7  ;;  %1791 = vmatprep.subr.bf16.mxu1 %v5394_v2 }
  0x4f   : > { %v3155_v27 = vpop.eup %3154  ;;  %835 = vst.msk [vmem:[#allocation2 + $0x8] sm:$0xf] %vm765_vm0, %v2896_v60  ;;  %v2898_v9 = vpack.c.bf16 %v3701_v63, %v3701_v63  ;;  %v3719_v10 = vmul.f32 %v3153_v0, %v3509_v32  ;;  %v1306_v41 = vrot.slane %v3701_v63, 7  ;;  %3178 = vpow2.f32 %v3641_v46 }
  0x50   : > { %v3157_v13 = vpop.eup %3156  ;;  %836 = vst.msk [vmem:[#allocation2 + $0xc] sm:$0xf] %vm765_vm0, %v2897_v5  ;;  %1416 = vrot.lane.b32.xlu0 %v695_v4, %s3287_s29  ;;  %v696_v31 = vpack.c.bf16 %v3713_v6, %v3701_v63  ;;  %v2899_v14 = vpack.c.bf16 %v3713_v6, %v3713_v6  ;;  %v3731_v32 = vmul.f32 %v3155_v27, %v3512_v33  ;;  %v5399_v19 = vrot.slane %v3713_v6, 7 }
  0x51   : > { %v3159_v16 = vpop.eup %3158  ;;  %837 = vst.msk [vmem:[#allocation2 + $0x10] sm:$0xf] %vm765_vm0, %v2898_v9  ;;  %v2900_v17 = vpack.c.bf16 %v3719_v10, %v3719_v10  ;;  %v3741_v18 = vmul.f32 %v3157_v13, %v3526_v40  ;;  %v3747_v33 = vsel %vm933_vm1, %v5398_v25, %v1305_v11  ;;  %v3763_v28 = vsel %vm933_vm1, %v1305_v11, %v1306_v41  ;;  %v3075_v11 = vld [vmem:[%s5378_s6 + $0xa8] sm:$0xff]  }
  0x52   : > { %5460 = vst [vmem:[#allocation15_spill] sm:$0xff] %v3747_v33  ;;  %v3161_v22 = vpop.eup %3160  ;;  %838 = vst.msk [vmem:[#allocation2 + $0x14] sm:$0xf] %vm765_vm0, %v2899_v14  ;;  %v2901_v40 = vpack.c.bf16 %v3731_v32, %v3731_v32  ;;  %v3758_v24 = vmul.f32 %v3159_v16, %v3531_v43  ;;  %v3773_v43 = vsel %vm933_vm1, %v1306_v41, %v5399_v19  ;;  %v1363_v46 = vrot.slane %v3713_v6, 1 }
  0x53   : > { %5461 = vst [vmem:[#allocation16_spill] sm:$0xff] %v3763_v28  ;;  %v3163_v34 = vpop.eup %3162  ;;  %839 = vst.msk [vmem:[#allocation2 + $0x18] sm:$0xf] %vm765_vm0, %v2900_v17  ;;  %v2902_v36 = vpack.c.bf16 %v3741_v18, %v3741_v18  ;;  %v727_v37 = vmul.f32 %v3161_v22, %v3557_v61  ;;  %v697_v39 = vpack.c.bf16 %v3731_v32, %v3719_v10  ;;  %v5397_v45 = vrot.slane %v3719_v10, 1  ;;  %v3077_v22 = vld [vmem:[%s5378_s6 + $0xa0] sm:$0xff]  }
  0x54   : > { %5462 = vst [vmem:[#allocation17_spill] sm:$0xff] %v3773_v43  ;;  %v3165_v38 = vpop.eup %3164  ;;  %1418 = vrot.lane.b32.xlu0 %v696_v31, %s3287_s29  ;;  %840 = vst.msk [vmem:[#allocation2 + $0x1c] sm:$0xf] %vm765_vm0, %v2901_v40  ;;  %v2903_v61 = vpack.c.bf16 %v3758_v24, %v3758_v24  ;;  %v728_v44 = vmul.f32 %v3163_v34, %v3560_v62  ;;  %1609 = vmatpush2.bf16.msra.mxu0 %v3071_v15  ;;  %v5396_v51 = vrot.slane %v3701_v63, 1  ;;  %v3080_v15 = vld [vmem:[%s5378_s6 + $0x50] sm:$0xff]  }
  0x55   : > { %v3167_v48 = vpop.eup %3166  ;;  %841 = vst.msk [vmem:[#allocation2 + $0x20] sm:$0xf] %vm765_vm0, %v2902_v36  ;;  %v730_v49 = vmul.f32 %v3696_v58, %v727_v37  ;;  %v3791_v50 = vmul.f32 %v3165_v38, %v3551_v57  ;;  %1610 = vmatprep.subr.bf16.mxu0 %v5394_v2  ;;  %v3805_v60 = vsel %vm1070_vm2, %v1363_v46, %v5397_v45  ;;  %v3079_v57 = vld [vmem:[%s5378_s6 + $0x58] sm:$0xff]   ;;  %3180 = vpow2.f32 %v3651_v55  ;;  %v861_v37 = vld [vmem:[%s5376_s4 + $0x50] sm:$0xff] }
  0x56   : > { %v3169_v62 = vpop.eup %3168  ;;  %842 = vst.msk [vmem:[#allocation2 + $0x24] sm:$0xf] %vm765_vm0, %v2903_v61  ;;  %v731_v54 = vmul.f32 %v3696_v58, %v728_v44  ;;  %v3799_v59 = vmul.f32 %v3167_v48, %v3565_v1  ;;  %5463 = vst [vmem:[#allocation18_spill] sm:$0xff] %v3805_v60  ;;  %1792 = vmatpush1.bf16.msra.mxu1 %v3078_v20  ;;  %v3821_v5 = vsel %vm1070_vm2, %v5396_v51, %v1363_v46  ;;  %v860_v48 = vld [vmem:[%s5376_s4 + $0x48] sm:$0xff]  ;;  %v862_v60 = vld [vmem:[%s5376_s4 + $0x58] sm:$0xff] }
  0x57   : > { %v3171_v26 = vpop.eup %3170  ;;  %v3810_v0 = vld [vmem:[#allocation2 + $0x8] sm:$0xff]   ;;  %v2892_v4 = vpack.c.bf16 %v730_v49, %v730_v49  ;;  %v2904_v1 = vpack.c.bf16 %v3791_v50, %v3791_v50  ;;  %v3815_v58 = vmul.f32 %v3169_v62, %v3568_v3  ;;  %5464 = vst [vmem:[#allocation19_spill] sm:$0xff] %v3821_v5  ;;  %1801 = vmatprep.subr.bf16.mxu1 %v5394_v2  ;;  %v875_v3 = vld [vmem:[%s5377_s5 + $0x40] sm:$0xff]  ;;  %v877_v49 = vld [vmem:[%s5377_s5 + $0x50] sm:$0xff] }
  0x58   : > { %1420 = vrot.lane.b32.xlu0 %v697_v39, %s3287_s29  ;;  %v2893_v27 = vpack.c.bf16 %v731_v54, %v731_v54  ;;  %v736_v9 = vmul.f32 %v2772_v52, %v3457_v7  ;;  %1611 = vmatpush2.bf16.msra.mxu0 %v3073_v47  ;;  %v2905_v31 = vpack.c.bf16 %v3799_v59, %v3799_v59  ;;  %v3173_v14 = vpop.eup %3172  ;;  %v3082_v39 = vld [vmem:[%s5378_s6 + $0x40] sm:$0xff]   ;;  %v902_v47 = vunpack.c.h.bf16 %v3810_v0 }
  0x59   : > { %v3832_v13 = vld [vmem:[#allocation2 + $0x10] sm:$0xff]   ;;  %766 = vst.msk [vmem:[#allocation2] sm:$0xf] %vm765_vm0, %v2892_v4  ;;  %843 = vst.msk [vmem:[#allocation2 + $0x28] sm:$0xf] %vm765_vm0, %v2904_v1  ;;  %v2906_v7 = vpack.c.bf16 %v3815_v58, %v3815_v58  ;;  %1612 = vmatprep.subr.bf16.mxu0 %v5394_v2  ;;  %1233 = vrot.lane.b32.xlu1 %v3810_v0, %s3287_s29  ;;  %v3847_v41 = vmul.f32 %v3171_v26, %v3583_v12  ;;  %v3175_v16 = vpop.eup %3174  ;;  %v3908_v52 = vstv %s708_s16 }
  0x5a   : > { %767 = vst.msk [vmem:[#allocation2 + $0x4] sm:$0xf] %vm765_vm0, %v2893_v27  ;;  %1802 = vmatpush2.bf16.msra.mxu1 %v3079_v57  ;;  %844 = vst.msk [vmem:[#allocation2 + $0x2c] sm:$0xf] %vm765_vm0, %v2905_v31  ;;  %v3177_v55 = vpop.eup %3176  ;;  %v698_v17 = vpack.c.bf16 %v3758_v24, %v3741_v18  ;;  %v3860_v20 = vadd.f32 %v3467_v8, %v736_v9  ;;  %v3081_v8 = vld [vmem:[%s5378_s6 + $0x48] sm:$0xff]   ;;  %v3885_v46 = vmul.f32 %v3173_v14, %v3597_v21  ;;  %v3915_v4 = vld [vmem:[#allocation2 + $0x10] sm:$0xff]  }
  0x5b   : > { %845 = vst.msk [vmem:[#allocation2 + $0x30] sm:$0xf] %vm765_vm0, %v2906_v7  ;;  %1803 = vmatprep.subr.bf16.mxu1 %v5394_v2  ;;  %v2907_v12 = vpack.c.bf16 %v3847_v41, %v3847_v41  ;;  %v645_v38 = vadd.f32 1.0, %v3177_v55  ;;  %v3899_v21 = vmul.f32 %v3175_v16, %v3607_v29  ;;  %v903_v57 = vunpack.c.l.bf16 %v3832_v13  ;;  %v3917_v1 = vld [vmem:[#allocation2 + $0x18] sm:$0xff]  }
  0x5c   : > { %1129 = vperm.xlu0 %3042, %v875_v3   ;;  %1613 = vmatpush2.bf16.msra.mxu0 %v3075_v11  ;;  %v3179_v40 = vpop.eup %3178  ;;  %v2774_v34 = vmul.f32 -1.442695, %v3860_v20  ;;  %v2908_v61 = vpack.c.bf16 %v3885_v46, %v3885_v46  ;;  %v904_v29 = vunpack.c.h.bf16 %v3832_v13  ;;  %v889_v9 = vld [vmem:[#allocation2 + $0x18] sm:$0xff]   ;;  %v1892_v11 = vunpack.c.h.bf16 %v3915_v4 }
  0x5d   : > { %1614 = vmatprep.subr.bf16.mxu0 %v5394_v2  ;;  %1235 = vrot.lane.b32.xlu1 %v3832_v13, %s3287_s29  ;;  %846 = vst.msk [vmem:[#allocation2 + $0x34] sm:$0xf] %vm765_vm0, %v2907_v12  ;;  %v646_v44 = vadd.f32 1.0, %v3179_v40  ;;  %v2909_v26 = vpack.c.bf16 %v3899_v21, %v3899_v21  ;;  %v1893_v3 = vunpack.c.l.bf16 %v3917_v1  ;;  %v3923_v13 = vrot.slane %v902_v47, 7 }
  0x5e   : > { %1804 = vmatpush2.bf16.msra.mxu1 %v3080_v15  ;;  %3182 = vpow2.f32 %v2774_v34  ;;  %847 = vst.msk [vmem:[#allocation2 + $0x38] sm:$0xf] %vm765_vm0, %v2908_v61  ;;  %v3925_v31 = vrot.slane %v902_v47, 1  ;;  %v699_v7 = vpack.c.bf16 %v3799_v59, %v3791_v50  ;;  %v905_v14 = vunpack.c.l.bf16 %v889_v9  ;;  %v876_v15 = vld [vmem:[%s5377_s5 + $0x48] sm:$0xff]  ;;  %v3950_v61 = vld [vmem:[#allocation2 + $0x20] sm:$0xff]  }
  0x5f   : > { %1805 = vmatprep.subr.bf16.mxu1 %v5394_v2  ;;  %3184 = vrcp.f32 %v645_v38  ;;  %5465 = vst [vmem:[#allocation20_spill] sm:$0xff] %v3923_v13  ;;  %848 = vst.msk [vmem:[#allocation2 + $0x3c] sm:$0xf] %vm765_vm0, %v2909_v26  ;;  %v906_v16 = vunpack.c.h.bf16 %v889_v9  ;;  %v3941_v40 = vrot.slane %v903_v57, 1  ;;  %v3943_v34 = vrot.slane %v904_v29, 1  ;;  %v863_v26 = vld [vmem:[%s5376_s4 + $0x60] sm:$0xff] }
  0x60   : > { %1422 = vrot.lane.b32.xlu0 %v698_v17, %s3287_s29  ;;  %1615 = vmatpush2.bf16.msra.mxu0 %v3077_v22  ;;  %3186 = vrcp.f32 %v646_v44  ;;  %5466 = vst [vmem:[#allocation21_spill] sm:$0xff] %v3925_v31  ;;  %v3935_v17 = vrot.slane %v1892_v11, 1  ;;  %v3937_v22 = vrot.slane %v903_v57, 7  ;;  %v1894_v38 = vunpack.c.h.bf16 %v3917_v1 }
  0x61   : > { %v3879_v36 = vld [vmem:[#allocation2] sm:$0xff]   ;;  %2227 = vmatprep.subr.bf16.mxu0 %v5394_v2  ;;  %5468 = vst [vmem:[#allocation23_spill] sm:$0xff] %v3941_v40  ;;  %5469 = vst [vmem:[#allocation24_spill] sm:$0xff] %v3943_v34  ;;  %v3953_v44 = vrot.slane %v905_v14, 7  ;;  %v3960_v57 = vrot.slane %v905_v14, 1  ;;  %v1891_v14 = vunpack.c.l.bf16 %v3915_v4  ;;  %v3980_v27 = vrot.slane %v1893_v3, 7 }
  0x62   : > { %1806 = vmatpush2.bf16.msra.mxu1 %v3081_v8  ;;  %1231 = vrot.lane.b32.xlu1 %v3879_v36, %s3287_s29  ;;  %v3181_v54 = vpop.eup %3180  ;;  %5467 = vst [vmem:[#allocation22_spill] sm:$0xff] %v3937_v22  ;;  %v3939_v8 = vrot.slane %v904_v29, 7  ;;  %v3962_v29 = vrot.slane %v906_v16, 1  ;;  %v3982_v51 = vrot.slane %v1894_v38, 1  ;;  %v4013_v28 = vrot.slane %v1894_v38, 7 }
  0x63   : > { %1807 = vmatprep.subr.bf16.mxu1 %v5394_v2  ;;  %v747_v12 = vadd.f32 1.0, %v3181_v54  ;;  %5471 = vst [vmem:[#allocation26_spill] sm:$0xff] %v3953_v44  ;;  %v3958_v54 = vrot.slane %v906_v16, 7  ;;  %5472 = vst [vmem:[#allocation27_spill] sm:$0xff] %v3960_v57  ;;  %v3978_v16 = vrot.slane %v1892_v11, 7 }
  0x64   : > { %1002 = vperm.xlu0 %3042, %v861_v37   ;;  %v3945_v37 = vld [vmem:[#allocation2 + $0x20] sm:$0xff]   ;;  %5473 = vst [vmem:[#allocation28_spill] sm:$0xff] %v3962_v29  ;;  %5474 = vst [vmem:[#allocation29_spill] sm:$0xff] %v3980_v27 }
  0x65   : > { %3188 = vrcp.f32 %v747_v12  ;;  %v907_v47 = vunpack.c.l.bf16 %v3945_v37  ;;  %5475 = vst [vmem:[#allocation30_spill] sm:$0xff] %v3982_v51  ;;  %5481 = vst [vmem:[#allocation36_spill] sm:$0xff] %v4013_v28  ;;  %v4019_v43 = vsel %vm933_vm1, %v3978_v16, %v3980_v27 }
  0x66   : > { %1808 = vmatpush2.bf16.msra.mxu1 %v3082_v39  ;;  %997 = vperm.xlu1 %3043, %v860_v48   ;;  %v3948_v39 = vrot.slane %v1893_v3, 1  ;;  %v908_v48 = vunpack.c.h.bf16 %v3945_v37  ;;  %5482 = vst [vmem:[#allocation37_spill] sm:$0xff] %v4019_v43  ;;  %v1896_v43 = vunpack.c.h.bf16 %v3950_v61 }
  0x67   : > { %2943 = vmatprep.subr.bf16.mxu1 %v5394_v2  ;;  %v3987_v25 = vrot.slane %v907_v47, 7  ;;  %v3991_v19 = vrot.slane %v907_v47, 1 }
  0x68   : > { %1139 = vperm.xlu0 %3042, %v877_v49   ;;  %5470 = vst [vmem:[#allocation25_spill] sm:$0xff] %v3948_v39  ;;  %v1895_v49 = vunpack.c.l.bf16 %v3950_v61  ;;  %v3989_v55 = vrot.slane %v908_v48, 7  ;;  %v3993_v62 = vrot.slane %v908_v48, 1 }
  0x69   : > { %5477 = vst [vmem:[#allocation32_spill] sm:$0xff] %v3987_v25  ;;  %5478 = vst [vmem:[#allocation33_spill] sm:$0xff] %v3991_v19 }
  0x6a   : > { %1134 = vperm.xlu1 %3043, %v876_v15   ;;  %v3967_v15 = vld [vmem:[#allocation2 + $0x28] sm:$0xff]   ;;  %v3984_v45 = vrot.slane %v1895_v49, 1  ;;  %v4037_v27 = vrot.slane %v1895_v49, 7  ;;  %v5488_v49 = vrot.slane %v3713_v6, 7 }
  0x6b   : > { %v909_v12 = vunpack.c.l.bf16 %v3967_v15  ;;  %v910_v2 = vunpack.c.h.bf16 %v3967_v15  ;;  %v3183_v5 = vpop.eup %3182  ;;  %v4080_v6 = vld [vmem:[#allocation2 + $0x28] sm:$0xff]  }
  0x6c   : > { %1424 = vrot.lane.b32.xlu0 %v699_v7, %s3287_s29  ;;  %v3973_v7 = vsel %vm1070_vm2, %v3935_v17, %v3948_v39  ;;  %5476 = vst [vmem:[#allocation31_spill] sm:$0xff] %v3984_v45  ;;  %v3185_v3 = vpop.eup %3184  ;;  %5485 = vst [vmem:[#allocation40_spill] sm:$0xff] %v4037_v27  ;;  %v746_v33 = vadd.f32 1.0, %v3183_v5  ;;  %v4058_v5 = vsel %vm933_vm1, %v3923_v13, %v3937_v22 }
  0x6d   : > { %v4005_v47 = vrot.slane %v909_v12, 7  ;;  %v4007_v48 = vrot.slane %v910_v2, 7  ;;  %v4009_v39 = vrot.slane %v909_v12, 1  ;;  %v4011_v11 = vrot.slane %v910_v2, 1  ;;  %v3187_v38 = vpop.eup %3186  ;;  %5486 = vst [vmem:[#allocation41_spill] sm:$0xff] %v4058_v5 }
  0x6e   : > { %1237 = vrot.lane.b32.xlu1 %v889_v9, %s3287_s29  ;;  %v879_v9 = vld [vmem:[%s5377_s5 + $0x60] sm:$0xff]  ;;  %v4031_v2 = vsel %vm1070_vm2, %v3982_v51, %v3984_v45  ;;  %v4034_v12 = vmul.f32 %v3185_v3, %v3610_v30  ;;  %v4045_v45 = vrot.slane %v1891_v14, 7  ;;  %v4052_v3 = vld [vmem:[#allocation2 + $0x30] sm:$0xff]   ;;  %3190 = vrcp.f32 %v746_v33 }
  0x6f   : > { %5479 = vst [vmem:[#allocation34_spill] sm:$0xff] %v4005_v47  ;;  %5480 = vst [vmem:[#allocation35_spill] sm:$0xff] %v4009_v39  ;;  %v911_v33 = vunpack.c.l.bf16 %v4052_v3 }
  0x70   : > { %1012 = vperm.xlu0 %3042, %v863_v26   ;;  %v4025_v26 = vsel %vm1070_vm2, %v3925_v31, %v3941_v40  ;;  %5484 = vst [vmem:[#allocation39_spill] sm:$0xff] %v4031_v2  ;;  %v878_v40 = vld [vmem:[%s5377_s5 + $0x58] sm:$0xff]  ;;  %v4047_v2 = vrot.slane %v1891_v14, 1  ;;  %v2910_v30 = vpack.c.bf16 %v4034_v12, %v4034_v12  ;;  %v5500_v31 = vrot.slane %v3719_v10, 1 }
  0x71   : > { %5483 = vst [vmem:[#allocation38_spill] sm:$0xff] %v4025_v26  ;;  %v4043_v26 = vmul.f32 %v3187_v38, %v3614_v35  ;;  %v5487_v35 = vrot.slane %v3719_v10, 7  ;;  %v4093_v38 = vsel %vm933_vm1, %v4013_v28, %v4037_v27  ;;  %v864_v10 = vld [vmem:[%s5376_s4 + $0x68] sm:$0xff] }
  0x72   : > { %1007 = vperm.xlu1 %3043, %v862_v60   ;;  %v5406_v60 = vrot.slane %v3731_v32, 7  ;;  %v3189_v22 = vpop.eup %3188  ;;  %849 = vst.msk [vmem:[#allocation2 + $0x40] sm:$0xf] %vm765_vm0, %v2910_v30  ;;  %5494 = vst [vmem:[#allocation45_spill] sm:$0xff] %v4093_v38  ;;  %v5495_v30 = vrot.slane %v3689_v53, 7  ;;  %v4115_v38 = vsel %vm1070_vm2, %v3943_v34, %v3960_v57  ;;  %v1898_v34 = vunpack.c.h.bf16 %v4080_v6 }
  0x73   : > { %v4066_v14 = vsel %vm933_vm1, %v5488_v49, %v5487_v35  ;;  %v5490_v13 = vmov %v5487_v35  ;;  %v5492_v35 = vpack.c.bf16 %v3847_v41, %v3815_v58  ;;  %v4087_v49 = vrot.slane %v1896_v43, 1  ;;  %5497 = vst [vmem:[#allocation46_spill] sm:$0xff] %v4115_v38 }
  0x74   : > { %1149 = vperm.xlu0 %3042, %v879_v9   ;;  %5489 = vst [vmem:[#allocation42_spill] sm:$0xff] %v4066_v14  ;;  %v2911_v9 = vpack.c.bf16 %v4043_v26, %v4043_v26  ;;  %v4078_v5 = vsel %vm933_vm1, %v5490_v13, %v5406_v60  ;;  %v1897_v13 = vunpack.c.l.bf16 %v4080_v6  ;;  %v5496_v60 = vrot.slane %v4043_v26, 7 }
  0x75   : > { %5491 = vst [vmem:[#allocation43_spill] sm:$0xff] %v4078_v5  ;;  %5493 = vst [vmem:[#allocation44_spill] sm:$0xff] %v4087_v49  ;;  %v4109_v5 = vld [vmem:[#allocation2 + $0x30] sm:$0xff]   ;;  %v4134_v38 = vrot.slane %v1896_v43, 7 }
  0x76   : > { %1144 = vperm.xlu1 %3043, %v878_v40   ;;  %v865_v40 = vld [vmem:[%s5376_s4 + $0x70] sm:$0xff]  ;;  %850 = vst.msk [vmem:[#allocation2 + $0x44] sm:$0xf] %vm765_vm0, %v2911_v9  ;;  %v4107_v14 = vsel %vm933_vm1, %v5496_v60, %v5495_v30  ;;  %v1365_v9 = vrot.slane %v3731_v32, 1  ;;  %v4120_v27 = vrot.slane %v1897_v13, 1  ;;  %v4123_v60 = vrot.slane %v911_v33, 7 }
  0x77   : > { %v1366_v30 = vrot.slane %v3741_v18, 1  ;;  %5502 = vst [vmem:[#allocation50_spill] sm:$0xff] %v4134_v38  ;;  %v4137_v28 = vrot.slane %v1897_v13, 7 }
  0x78   : > { %1426 = vrot.lane.b32.xlu0 %v5492_v35, %s3287_s29  ;;  %v753_v35 = vmul.f32 %v3189_v22, %v3634_v42  ;;  %v912_v42 = vunpack.c.h.bf16 %v4052_v3  ;;  %v1899_v22 = vunpack.c.l.bf16 %v4109_v5  ;;  %5498 = vst [vmem:[#allocation47_spill] sm:$0xff] %v4120_v27  ;;  %5499 = vst [vmem:[#allocation48_spill] sm:$0xff] %v4123_v60  ;;  %v4130_v57 = vsel %vm1070_vm2, %v5500_v31, %v1365_v9  ;;  %v881_v31 = vld [vmem:[%s5377_s5 + $0x70] sm:$0xff] }
  0x79   : > { %5501 = vst [vmem:[#allocation49_spill] sm:$0xff] %v4130_v57  ;;  %5503 = vst [vmem:[#allocation51_spill] sm:$0xff] %v4137_v28  ;;  %v4155_v13 = vsel %vm1070_vm2, %v1365_v9, %v1366_v30  ;;  %v4173_v9 = vsel %vm933_vm1, %v3939_v8, %v3953_v44 }
  0x7a   : > { %v756_v51 = vmul.f32 %v3908_v52, %v753_v35  ;;  %1239 = vrot.lane.b32.xlu1 %v3945_v37, %s3287_s29  ;;  %v4143_v35 = vsel %vm1070_vm2, %v4087_v49, %v4120_v27  ;;  %v4151_v37 = vrot.slane %v911_v33, 1  ;;  %5506 = vst [vmem:[#allocation54_spill] sm:$0xff] %v4155_v13  ;;  %v4159_v57 = vrot.slane %v912_v42, 1  ;;  %5510 = vst [vmem:[#allocation58_spill] sm:$0xff] %v4173_v9 }
  0x7b   : > { %5504 = vst [vmem:[#allocation52_spill] sm:$0xff] %v4143_v35  ;;  %v4161_v27 = vrot.slane %v1899_v22, 1  ;;  %v4163_v35 = vrot.slane %v1898_v34, 1  ;;  %v1900_v49 = vunpack.c.h.bf16 %v4109_v5  ;;  %v1311_v33 = vrot.slane %v3758_v24, 7 }
  0x7c   : > { %1022 = vperm.xlu0 %3042, %v865_v40   ;;  %v2895_v43 = vpack.c.bf16 %v756_v51, %v756_v51  ;;  %5505 = vst [vmem:[#allocation53_spill] sm:$0xff] %v4151_v37  ;;  %v4157_v40 = vrot.slane %v912_v42, 7  ;;  %v1310_v51 = vrot.slane %v3741_v18, 7  ;;  %v4175_v42 = vld [vmem:[#allocation2 + $0x38] sm:$0xff]   ;;  %v4187_v18 = vsel %vm1070_vm2, %v3962_v29, %v3991_v19 }
  0x7d   : > { %5508 = vst [vmem:[#allocation56_spill] sm:$0xff] %v4161_v27  ;;  %5509 = vst [vmem:[#allocation57_spill] sm:$0xff] %v4163_v35  ;;  %v1367_v13 = vrot.slane %v3758_v24, 1  ;;  %v1368_v9 = vrot.slane %v3791_v50, 1  ;;  %v4201_v44 = vrot.slane %v1899_v22, 7  ;;  %v5516_v19 = vrot.slane %v3731_v32, 7 }
  0x7e   : > { %5507 = vst [vmem:[#allocation55_spill] sm:$0xff] %v4157_v40  ;;  %777 = vst.msk [vmem:[#allocation2 + $0x4c] sm:$0xf] %vm765_vm0, %v2895_v43  ;;  %1017 = vperm.xlu1 %3043, %v864_v10   ;;  %v4181_v43 = vsel %vm933_vm1, %v4134_v38, %v4137_v28  ;;  %v880_v10 = vld [vmem:[%s5377_s5 + $0x68] sm:$0xff]  ;;  %v4197_v28 = vsel %vm933_vm1, %v1310_v51, %v1311_v33  ;;  %v4217_v29 = vsel %vm1070_vm2, %v4163_v35, %v4161_v27  ;;  %v4238_v35 = vld [vmem:[#allocation2 + $0x40] sm:$0xff]  }
  0x7f   : > { %5511 = vst [vmem:[#allocation59_spill] sm:$0xff] %v4181_v43  ;;  %5512 = vst [vmem:[#allocation60_spill] sm:$0xff] %v4187_v18  ;;  %v4199_v43 = vld [vmem:[#allocation2 + $0x38] sm:$0xff]   ;;  %v4207_v24 = vsel %vm933_vm1, %v5516_v19, %v1310_v51  ;;  %v4211_v18 = vsel %vm1070_vm2, %v1367_v13, %v1368_v9  ;;  %v702_v22 = vpack.c.bf16 %v4043_v26, %v4034_v12  ;;  %v4222_v38 = vrot.slane %v1900_v49, 7 }
  0x80   : > { %1159 = vperm.xlu0 %3042, %v881_v31   ;;  %v1901_v31 = vunpack.c.l.bf16 %v4175_v42  ;;  %5513 = vst [vmem:[#allocation61_spill] sm:$0xff] %v4197_v28  ;;  %5514 = vst [vmem:[#allocation62_spill] sm:$0xff] %v4199_v43  ;;  %v3191_v28 = vpop.eup %3190  ;;  %v4224_v19 = vrot.slane %v1900_v49, 1  ;;  %v5520_v51 = vpack.c.bf16 %v3899_v21, %v3885_v46  ;;  %v4231_v27 = vrot.slane %v1898_v34, 7 }
  0x81   : > { %5515 = vst [vmem:[#allocation63_spill] sm:$0xff] %v4201_v44  ;;  %5517 = vst [vmem:[#allocation64_spill] sm:$0xff] %v4207_v24  ;;  %v1902_v49 = vunpack.c.h.bf16 %v4175_v42  ;;  %v1361_v24 = vrot.slane %v3694_v56, 1  ;;  %v1903_v34 = vunpack.c.l.bf16 %v4238_v35  ;;  %v5523_v32 = vrot.slane %v3701_v63, 1 }
  0x82   : > { %5518 = vst [vmem:[#allocation65_spill] sm:$0xff] %v4211_v18  ;;  %5519 = vst [vmem:[#allocation66_spill] sm:$0xff] %v4217_v29  ;;  %1154 = vperm.xlu1 %3043, %v880_v10   ;;  %v752_v18 = vmul.f32 %v3191_v28, %v3860_v20  ;;  %v4235_v29 = vsel %vm1070_vm2, %v1366_v30, %v1367_v13  ;;  %v4241_v10 = vrot.slane %v1901_v31, 7  ;;  %v1312_v13 = vrot.slane %v3791_v50, 7 }
  0x83   : > { %v4248_v28 = vsel %vm933_vm1, %v3958_v54, %v3987_v25  ;;  %v5524_v25 = vrot.slane %v3689_v53, 1  ;;  %v1369_v50 = vrot.slane %v3799_v59, 1  ;;  %v4278_v56 = vrot.slane %v1902_v49, 7 }
  0x84   : > { %1428 = vrot.lane.b32.xlu0 %v5520_v51, %s3287_s29  ;;  %5521 = vst [vmem:[#allocation67_spill] sm:$0xff] %v4241_v10  ;;  %5522 = vst [vmem:[#allocation68_spill] sm:$0xff] %v4248_v28  ;;  %v755_v30 = vmul.f32 %v3908_v52, %v752_v18  ;;  %v4259_v51 = vsel %vm933_vm1, %v4231_v27, %v4201_v44  ;;  %v4266_v28 = vsel %vm1070_vm2, %v1361_v24, %v5523_v32 }
  0x85   : > { %v4250_v20 = vld [vmem:[#allocation2 + $0x4c] sm:$0xf]  ;;  %v4272_v52 = vsel %vm1070_vm2, %v5524_v25, %v1361_v24  ;;  %v4282_v63 = vsel %vm933_vm1, %v1311_v33, %v1312_v13  ;;  %v1313_v32 = vrot.slane %v3799_v59, 7  ;;  %v866_v25 = vld [vmem:[%s5376_s4 + $0x78] sm:$0xff]  ;;  %v4300_v33 = vsel %vm933_vm1, %v3989_v55, %v4005_v47 }
  0x86   : > { %1241 = vrot.lane.b32.xlu1 %v3967_v15, %s3287_s29  ;;  %v2894_v18 = vpack.c.bf16 %v755_v30, %v755_v30  ;;  %v5525_v24 = vunpack.c.l.bf16 %v4250_v20  ;;  %v4294_v15 = vsel %vm1070_vm2, %v1368_v9, %v1369_v50  ;;  %5527 = vst [vmem:[#allocation70_spill] sm:$0xff] %v4300_v33  ;;  %v1314_v59 = vrot.slane %v3815_v58, 7 }
  0x87   : > { %5526 = vst [vmem:[#allocation69_spill] sm:$0xff] %v4294_v15  ;;  %v4306_v30 = vrot.slane %v1901_v31, 1  ;;  %v4312_v9 = vsel %vm933_vm1, %v4222_v38, %v4241_v10  ;;  %v1371_v33 = vrot.slane %v3847_v41, 1  ;;  %v4339_v15 = vsel %vm1070_vm2, %v3993_v62, %v4009_v39 }
  0x88   : > { %1430 = vrot.lane.b32.xlu0 %v702_v22, %s3287_s29  ;;  %v4290_v44 = vrot.slane %v5525_v24, 7  ;;  %v4303_v22 = vrot.slane %v1903_v34, 7  ;;  %776 = vst.msk [vmem:[#allocation2 + $0x48] sm:$0xf] %vm765_vm0, %v2894_v18  ;;  %v4316_v24 = vsel %vm933_vm1, %v1312_v13, %v1313_v32  ;;  %v4327_v31 = vsel %vm933_vm1, %v1313_v32, %v1314_v59  ;;  %5531 = vst [vmem:[#allocation73_spill] sm:$0xff] %v4339_v15 }
  0x89   : > { %5529 = vst [vmem:[#allocation72_spill] sm:$0xff] %v4327_v31  ;;  %v1370_v18 = vrot.slane %v3815_v58, 1  ;;  %v5530_v13 = vunpack.c.l.bf16 %v4199_v43  ;;  %v4345_v58 = vsel %vm1070_vm2, %v4224_v19, %v4306_v30  ;;  %v1316_v31 = vrot.slane %v3885_v46, 7 }
  0x8a   : > { %5528 = vst [vmem:[#allocation71_spill] sm:$0xff] %v4303_v22  ;;  %v4323_v47 = vsel %vm933_vm1, %v4290_v44, %v4045_v45  ;;  %1027 = vperm.xlu1 %3043, %v866_v25   ;;  %5532 = vst [vmem:[#allocation74_spill] sm:$0xff] %v4345_v58  ;;  %v4358_v25 = vsel %vm933_vm1, %v4007_v48, %v4123_v60  ;;  %v4362_v39 = vrot.slane %v1903_v34, 1  ;;  %v4364_v58 = vrot.slane %v1902_v49, 1 }
  0x8b   : > { %v929_v10 = vrot.slane %v5530_v13, 7  ;;  %v4352_v32 = vsel %vm1070_vm2, %v1369_v50, %v1370_v18  ;;  %5533 = vst [vmem:[#allocation75_spill] sm:$0xff] %v4358_v25  ;;  %v1315_v13 = vrot.slane %v3847_v41, 7  ;;  %v4368_v15 = vsel %vm1070_vm2, %v1370_v18, %v1371_v33 }
  0x8c   : > { %2059 = vrot.lane.b32.xlu0 %v3915_v4, %s3287_s29  ;;  %v882_v4 = vld [vmem:[%s5377_s5 + $0x78] sm:$0xff]  ;;  %5534 = vst [vmem:[#allocation76_spill] sm:$0xff] %v4362_v39  ;;  %v4374_v50 = vsel %vm933_vm1, %v4278_v56, %v4303_v22  ;;  %v1904_v25 = vunpack.c.h.bf16 %v4238_v35  ;;  %v1372_v34 = vrot.slane %v3885_v46, 1  ;;  %v1373_v18 = vrot.slane %v3899_v21, 1 }
  0x8d   : > { %5535 = vst [vmem:[#allocation77_spill] sm:$0xff] %v4374_v50  ;;  %v4379_v41 = vsel %vm933_vm1, %v1315_v13, %v1316_v31  ;;  %v4383_v49 = vsel %vm933_vm1, %v1314_v59, %v1315_v13  ;;  %v4393_v50 = vsel %vm1070_vm2, %v4011_v11, %v4151_v37  ;;  %v4399_v59 = vsel %vm1070_vm2, %v4364_v58, %v4362_v39 }
  0x8e   : > { %5536 = vst [vmem:[#allocation78_spill] sm:$0xff] %v4379_v41  ;;  %1164 = vperm.xlu1 %3043, %v882_v4   ;;  %5537 = vst [vmem:[#allocation79_spill] sm:$0xff] %v4393_v50  ;;  %v4403_v46 = vsel %vm1070_vm2, %v1371_v33, %v1372_v34  ;;  %v1317_v4 = vrot.slane %v3899_v21, 7  ;;  %v1318_v37 = vrot.slane %v4034_v12, 7  ;;  %v5541_v41 = vunpack.c.h.bf16 %v4199_v43 }
  0x8f   : > { %5538 = vst [vmem:[#allocation80_spill] sm:$0xff] %v4399_v59  ;;  %v1889_v13 = vld [vmem:[#allocation2 + $0x48] sm:$0xf]  ;;  %5539 = vst [vmem:[#allocation81_spill] sm:$0xff] %v4403_v46  ;;  %v4416_v39 = vrot.slane %v1904_v25, 7  ;;  %v4420_v33 = vsel %vm1070_vm2, %v1372_v34, %v1373_v18  ;;  %v5543_v59 = vunpack.c.l.bf16 %v4199_v43 }
  0x90   : > { %2061 = vrot.lane.b32.xlu0 %v3917_v1, %s3287_s29  ;;  %v4408_v1 = vsel %vm933_vm1, %v4157_v40, %v929_v10  ;;  %v4414_v22 = vrot.slane %v5541_v41, 7  ;;  %v1905_v60 = vunpack.c.l.bf16 %v1889_v13  ;;  %5542 = vst [vmem:[#allocation83_spill] sm:$0xff] %v4420_v33  ;;  %v4430_v21 = vsel %vm933_vm1, %v1317_v4, %v1318_v37 }
  0x91   : > { %5540 = vst [vmem:[#allocation82_spill] sm:$0xff] %v4408_v1  ;;  %v4424_v46 = vrot.slane %v5543_v59, 1  ;;  %v4426_v1 = vrot.slane %v1904_v25, 1  ;;  %5545 = vst [vmem:[#allocation85_spill] sm:$0xff] %v4430_v21  ;;  %v4434_v41 = vsel %vm933_vm1, %v1316_v31, %v1317_v4  ;;  %v1374_v59 = vrot.slane %v4034_v12, 1 }
  0x92   : > { %1243 = vrot.lane.b32.xlu1 %v4052_v3, %s3287_s29  ;;  %v1921_v34 = vrot.slane %v1905_v60, 7  ;;  %v1977_v33 = vrot.slane %v1905_v60, 1  ;;  %v1375_v25 = vrot.slane %v4043_v26, 1  ;;  %v5546_v40 = vunpack.c.l.bf16 %v3879_v36 }
  0x93   : > { %5544 = vst [vmem:[#allocation84_spill] sm:$0xff] %v4424_v46  ;;  %v5548_v21 = vunpack.c.l.bf16 %v4250_v20  ;;  %v4452_v3 = vsel %vm1070_vm2, %v4159_v57, %v4424_v46  ;;  %v5602_v46 = vld [vmem:[#allocation49_spill] sm:$0xff] }
  0x94   : > { %2063 = vrot.lane.b32.xlu0 %v3950_v61, %s3287_s29  ;;  %v4444_v50 = vrot.slane %v5546_v40, 1  ;;  %5549 = vst [vmem:[#allocation87_spill] sm:$0xff] %v4452_v3  ;;  %v4457_v61 = vsel %vm933_vm1, %v929_v10, %v4414_v22  ;;  %v4462_v12 = vsel %vm933_vm1, %v4416_v39, %v1921_v34  ;;  %v4466_v60 = vsel %vm1070_vm2, %v1374_v59, %v1375_v25 }
  0x95   : > { %v1978_v31 = vrot.slane %v5548_v21, 1  ;;  %5550 = vst [vmem:[#allocation88_spill] sm:$0xff] %v4457_v61  ;;  %5551 = vst [vmem:[#allocation89_spill] sm:$0xff] %v4462_v12  ;;  %v4470_v40 = vsel %vm1070_vm2, %v1373_v18, %v1374_v59  ;;  %v4475_v4 = vsel %vm1070_vm2, %v4426_v1, %v1977_v33  ;;  %v5555_v10 = vunpack.c.h.bf16 %v3879_v36 }
  0x96   : > { %5547 = vst [vmem:[#allocation86_spill] sm:$0xff] %v4444_v50  ;;  %5552 = vst [vmem:[#allocation90_spill] sm:$0xff] %v4466_v60  ;;  %v5557_v12 = vrot.slane %v4043_v26, 7  ;;  %v4492_v18 = vsel %vm933_vm1, %v1921_v34, %v4290_v44  ;;  %v1993_v59 = vsel %vm1070_vm2, %v4047_v2, %v3935_v17  ;;  %1245 = vrot.lane.b32.xlu1 %v4199_v43, %s3287_s29  ;;  %v5560_v26 = vrot.slane %v3689_v53, 1 }
  0x97   : > { %5553 = vst [vmem:[#allocation91_spill] sm:$0xff] %v4470_v40  ;;  %5554 = vst [vmem:[#allocation92_spill] sm:$0xff] %v4475_v4  ;;  %v1055_v21 = vrot.slane %v5555_v10, 1  ;;  %v4481_v61 = vsel %vm1070_vm2, %v1977_v33, %v1978_v31  ;;  %v4511_v44 = vsel %vm1070_vm2, %v1978_v31, %v4047_v2  ;;  %v5563_v17 = vunpack.c.l.bf16 %v3810_v0  ;;  %v5617_v40 = vld [vmem:[#allocation66_spill] sm:$0xff] }
  0x98   : > { %5556 = vst [vmem:[#allocation93_spill] sm:$0xff] %v4481_v61  ;;  %v4487_v60 = vsel %vm933_vm1, %v1318_v37, %v5557_v12  ;;  %5559 = vst [vmem:[#allocation95_spill] sm:$0xff] %v4492_v18  ;;  %2067 = vrot.lane.b32.xlu0 %v4109_v5, %s3287_s29  ;;  %v4506_v37 = vsel %vm1070_vm2, %v1375_v25, %v5560_v26  ;;  %v1937_v2 = vsel %vm933_vm1, %v4045_v45, %v3978_v16  ;;  %v5567_v16 = vld [vmem:[#allocation15_spill] sm:$0xff]  ;;  %v5592_v61 = vld [vmem:[#allocation45_spill] sm:$0xff] }
  0x99   : > { %5558 = vst [vmem:[#allocation94_spill] sm:$0xff] %v4487_v60  ;;  %5561 = vst [vmem:[#allocation96_spill] sm:$0xff] %v4506_v37  ;;  %v1056_v12 = vrot.slane %v5563_v17, 1  ;;  %v1085_v5 = vsel %vm1070_vm2, %v4444_v50, %v1055_v21  ;;  %v2851_v25 = vcombine.low %v1889_v13, %v4250_v20  ;;  %v5570_v13 = vld [vmem:[#allocation29_spill] sm:$0xff]  ;;  %v5600_v18 = vld [vmem:[#allocation52_spill] sm:$0xff] }
  0x9a   : > { %5562 = vst [vmem:[#allocation97_spill] sm:$0xff] %v4511_v44  ;;  %v1090_v33 = vpop.permute.xlu1 %1089  ;;  %v4513_v34 = vpop.permute.xlu0 %952  ;;  %2071 = vrot.lane.b32.xlu1 %v4238_v35, %s3287_s29 }
  0x9b   : > { %v4517_v10 = vmul.f32 %v1993_v59, %v1090_v33  ;;  %v4521_v53 = vmul.f32 %v4323_v47, %v4513_v34  ;;  %v4535_v31 = vmul.f32 %v4107_v14, %v4513_v34  ;;  %v1084_v47 = vsel %vm1070_vm2, %v1055_v21, %v1056_v12  ;;  %v5569_v14 = vld [vmem:[#allocation36_spill] sm:$0xff] }
  0x9c   : > { %v1392_v17 = vmul.f32 %v4272_v52, %v1090_v33  ;;  %v1167_v44 = vmul.f32 %v1090_v33, %v1085_v5  ;;  %v1935_v21 = vsel %vm933_vm1, %v5570_v13, %v5569_v14 }
  0x9d   : > { %5564 = vst [vmem:[#allocation98_spill] sm:$0xff] %v4517_v10  ;;  %5565 = vst [vmem:[#allocation99_spill] sm:$0xff] %v4521_v53  ;;  %v5576_v53 = vld [vmem:[#allocation21_spill] sm:$0xff] }
  0x9e   : > { %v1095_v59 = vpop.permute.xlu1 %1094  ;;  %v4539_v26 = vpop.permute.xlu0 %957  ;;  %2073 = vrot.lane.b32.xlu1 %v2851_v25, %s3287_s29  ;;  %v5571_v25 = vld [vmem:[#allocation17_spill] sm:$0xff] }
  0x9f   : > { %v4543_v45 = vmul.f32 %v3973_v7, %v1095_v59  ;;  %v4547_v35 = vmul.f32 %v5567_v16, %v4539_v26  ;;  %v4550_v20 = vmul.f32 %v1937_v2, %v4539_v26  ;;  %v1393_v52 = vmul.f32 %v4266_v28, %v1095_v59  ;;  %v5574_v2 = vld [vmem:[#allocation37_spill] sm:$0xff] }
  0xa0   : > { %v1168_v33 = vmul.f32 %v1095_v59, %v1084_v47  ;;  %v5573_v59 = vld [vmem:[#allocation16_spill] sm:$0xff] }
  0xa1   : > { %5566 = vst [vmem:[#allocation100_spill] sm:$0xff] %v4543_v45  ;;  %5568 = vst [vmem:[#allocation15_spill] sm:$0xff] %v4550_v20  ;;  %v1408_v14 = vpack.c.bf16 %v1393_v52, %v1392_v17  ;;  %v1083_v17 = vsel %vm1070_vm2, %v1056_v12, %v5576_v53  ;;  %v5579_v53 = vld [vmem:[#allocation38_spill] sm:$0xff]  ;;  %v5581_v20 = vld [vmem:[#allocation39_spill] sm:$0xff] }
  0xa2   : > { %v4564_v16 = vpop.permute.xlu1 %967  ;;  %v4566_v37 = vpop.permute.xlu0 %962  ;;  %v1183_v13 = vpack.c.bf16 %v1168_v33, %v1167_v44  ;;  %2065 = vrot.lane.b32.xlu1 %v4080_v6, %s3287_s29  ;;  %v5577_v44 = vld [vmem:[#allocation30_spill] sm:$0xff] }
  0xa3   : > { %v4570_v28 = vmul.f32 %v5571_v25, %v4564_v16  ;;  %v4573_v47 = vmul.f32 %v1935_v21, %v4564_v16  ;;  %v4577_v7 = vmul.f32 %v5573_v59, %v4566_v37  ;;  %v4581_v5 = vmul.f32 %v5574_v2, %v4566_v37  ;;  %2816 = vmatprep.mubr.msk.bf16.mxu0 %vm1247_vm3, %v1408_v14  ;;  %v5578_v21 = vld [vmem:[#allocation25_spill] sm:$0xff]  ;;  %v5580_v6 = vld [vmem:[#allocation18_spill] sm:$0xff] }
  0xa4   : > { %v1991_v52 = vsel %vm1070_vm2, %v5578_v21, %v5577_v44  ;;  %2836 = vmatprep.mubr.msk.bf16.mxu1 %vm1247_vm3, %v1183_v13  ;;  %v5583_v13 = vld [vmem:[#allocation19_spill] sm:$0xff]  ;;  %v5585_v2 = vld [vmem:[#allocation22_spill] sm:$0xff] }
  0xa5   : > { %5572 = vst [vmem:[#allocation36_spill] sm:$0xff] %v4573_v47  ;;  %5575 = vst [vmem:[#allocation29_spill] sm:$0xff] %v4581_v5  ;;  %v944_v5 = vsel %vm933_vm1, %v5585_v2, %v3939_v8  ;;  %v5587_v47 = vld [vmem:[#allocation40_spill] sm:$0xff]  ;;  %v5588_v2 = vld [vmem:[#allocation43_spill] sm:$0xff] }
  0xa6   : > { %v1105_v25 = vpop.permute.xlu1 %1104  ;;  %v1100_v12 = vpop.permute.xlu0 %1099  ;;  %2069 = vrot.lane.b32.xlu1 %v4175_v42, %s3287_s29  ;;  %v5591_v45 = vld [vmem:[#allocation42_spill] sm:$0xff]  ;;  %s5310_s29 = scalar_lea.hbm %s5694_s28, %s2888_s20 }
  0xa7   : > { %v4599_v59 = vmul.f32 %v1105_v25, %v5579_v53  ;;  %v4602_v14 = vmul.f32 %v5580_v6, %v1105_v25  ;;  %v4605_v10 = vmul.f32 %v5581_v20, %v1105_v25  ;;  %v4607_v44 = vmul.f32 %v1100_v12, %v1083_v17  ;;  %v5586_v53 = vld [vmem:[#allocation50_spill] sm:$0xff] }
  0xa8   : > { %v4610_v21 = vmul.f32 %v5583_v13, %v1100_v12  ;;  %v4612_v33 = vmul.f32 %v1991_v52, %v1100_v12  ;;  %v1933_v6 = vsel %vm933_vm1, %v5587_v47, %v5586_v53  ;;  %v5590_v53 = vld [vmem:[#allocation41_spill] sm:$0xff]  ;;  %v5595_v52 = vld [vmem:[#allocation23_spill] sm:$0xff] }
  0xa9   : > { %5582 = vst [vmem:[#allocation17_spill] sm:$0xff] %v4605_v10  ;;  %v5598_v10 = vld [vmem:[#allocation46_spill] sm:$0xff] }
  0xaa   : > { %5584 = vst [vmem:[#allocation16_spill] sm:$0xff] %v4612_v33  ;;  %v1409_v17 = vpack.c.bf16 %v4602_v14, %v4610_v21  ;;  %v978_v25 = vpop.permute.xlu1 %977  ;;  %v973_v12 = vpop.permute.xlu0 %972  ;;  %v5594_v21 = vld [vmem:[#allocation24_spill] sm:$0xff] }
  0xab   : > { %v4630_v8 = vmul.f32 %v978_v25, %v944_v5  ;;  %v4633_v13 = vmul.f32 %v5588_v2, %v978_v25  ;;  %v4635_v47 = vmul.f32 %v1933_v6, %v978_v25  ;;  %v4638_v42 = vmul.f32 %v973_v12, %v5590_v53  ;;  %v5596_v33 = vld [vmem:[#allocation44_spill] sm:$0xff]  ;;  %v5597_v6 = vld [vmem:[#allocation31_spill] sm:$0xff] }
  0xac   : > { %v4641_v20 = vmul.f32 %v5591_v45, %v973_v12  ;;  %v4644_v14 = vmul.f32 %v5592_v61, %v973_v12  ;;  %v1081_v5 = vsel %vm1070_vm2, %v5595_v52, %v5594_v21  ;;  %v1989_v25 = vsel %vm1070_vm2, %v5597_v6, %v5596_v33  ;;  %v5599_v52 = vld [vmem:[#allocation54_spill] sm:$0xff] }
  0xad   : > { %5589 = vst [vmem:[#allocation37_spill] sm:$0xff] %v4635_v47  ;;  %v5604_v45 = vld [vmem:[#allocation26_spill] sm:$0xff] }
  0xae   : > { %5593 = vst [vmem:[#allocation21_spill] sm:$0xff] %v4644_v14  ;;  %v1115_v12 = vpop.permute.xlu1 %1114  ;;  %v1110_v53 = vpop.permute.xlu0 %1109  ;;  %v942_v61 = vsel %vm933_vm1, %v5604_v45, %v3958_v54  ;;  %v5605_v14 = vld [vmem:[#allocation51_spill] sm:$0xff]  ;;  %v5607_v45 = vld [vmem:[#allocation58_spill] sm:$0xff] }
  0xaf   : > { %v4661_v50 = vmul.f32 %v1115_v12, %v5598_v10  ;;  %v1397_v21 = vmul.f32 %v5599_v52, %v1115_v12  ;;  %v4665_v2 = vmul.f32 %v5600_v18, %v1115_v12  ;;  %v4667_v60 = vmul.f32 %v1110_v53, %v1081_v5  ;;  %v5606_v52 = vld [vmem:[#allocation61_spill] sm:$0xff]  ;;  %v5609_v18 = vld [vmem:[#allocation59_spill] sm:$0xff] }
  0xb0   : > { %v1396_v33 = vmul.f32 %v5602_v46, %v1110_v53  ;;  %v4670_v6 = vmul.f32 %v1989_v25, %v1110_v53  ;;  %v1931_v10 = vsel %vm933_vm1, %v5605_v14, %v4231_v27  ;;  %v5608_v27 = vld [vmem:[#allocation64_spill] sm:$0xff]  ;;  %v5612_v5 = vld [vmem:[#allocation27_spill] sm:$0xff] }
  0xb1   : > { %5601 = vst [vmem:[#allocation30_spill] sm:$0xff] %v4665_v2  ;;  %v5615_v2 = vld [vmem:[#allocation60_spill] sm:$0xff] }
  0xb2   : > { %5603 = vst [vmem:[#allocation25_spill] sm:$0xff] %v4670_v6  ;;  %v1410_v12 = vpack.c.bf16 %v1397_v21, %v1396_v33  ;;  %v988_v46 = vpop.permute.xlu1 %987  ;;  %v983_v25 = vpop.permute.xlu0 %982  ;;  %v5611_v33 = vld [vmem:[#allocation28_spill] sm:$0xff]  ;;  %v5613_v6 = vld [vmem:[#allocation57_spill] sm:$0xff] }
  0xb3   : > { %v4684_v53 = vmul.f32 %v988_v46, %v942_v61  ;;  %v4687_v47 = vmul.f32 %v5606_v52, %v988_v46  ;;  %v4689_v54 = vmul.f32 %v1931_v10, %v988_v46  ;;  %v4692_v43 = vmul.f32 %v983_v25, %v5607_v45  ;;  %v5614_v10 = vld [vmem:[#allocation47_spill] sm:$0xff] }
  0xb4   : > { %v4695_v14 = vmul.f32 %v5608_v27, %v983_v25  ;;  %v4698_v21 = vmul.f32 %v5609_v18, %v983_v25  ;;  %v1079_v61 = vsel %vm1070_vm2, %v5612_v5, %v5611_v33  ;;  %v1987_v46 = vsel %vm1070_vm2, %v5614_v10, %v5613_v6  ;;  %v5616_v5 = vld [vmem:[#allocation65_spill] sm:$0xff] }
  0xb6   : > { %5610 = vst [vmem:[#allocation38_spill] sm:$0xff] %v4698_v21  ;;  %v1125_v25 = vpop.permute.xlu1 %1124  ;;  %v1120_v27 = vpop.permute.xlu0 %1119  ;;  %v4764_v21 = vld [vmem:[%s5378_s6 + $0xe0] sm:$0xff]  }
  0xb7   : > { %v4715_v4 = vmul.f32 %v1125_v25, %v5615_v2  ;;  %v1399_v33 = vmul.f32 %v5616_v5, %v1125_v25  ;;  %v4719_v52 = vmul.f32 %v5617_v40, %v1125_v25  ;;  %v4721_v3 = vmul.f32 %v1120_v27, %v1079_v61  ;;  %v3083_v40 = vld [vmem:[%s5378_s6 + $0xf8] sm:$0xff]   ;;  %v3084_v25 = vld [vmem:[%s5378_s6 + $0xf0] sm:$0xff]  }
  0xb8   : > { %v1398_v6 = vmul.f32 %v4235_v29, %v1120_v27  ;;  %v4724_v10 = vmul.f32 %v1987_v46, %v1120_v27  ;;  %v5618_v61 = vpack.c.bf16 %v4547_v35, %v4535_v31  ;;  %v5620_v31 = vunpack.c.l.bf16 %v3879_v36 }
  0xb9   : > { %v1186_v45 = vpack.c.bf16 %v4715_v4, %v4721_v3 }
  0xba   : > { %v1411_v18 = vpack.c.bf16 %v1399_v33, %v1398_v6  ;;  %v4730_v2 = vpop.permute.xlu0 %992  ;;  %v3085_v33 = vld [vmem:[%s5378_s6 + $0xe8] sm:$0xff]   ;;  %v915_v35 = vrot.slane %v5620_v31, 7  ;;  %v5621_v6 = vunpack.c.h.bf16 %v3879_v36 }
  0xbb   : > { %v4734_v5 = vmul.f32 %v4259_v51, %v4730_v2  ;;  %v5619_v51 = vmov 0  }
  0xbc   : > { %v949_v36 = vsel %vm933_vm1, %v4414_v22, %v915_v35  ;;  %v5623_v22 = vunpack.c.l.bf16 %v3810_v0  ;;  %v5626_v0 = vld [vmem:[#allocation20_spill] sm:$0xff] }
  0xc2   : > { %v1417_v29 = vpop.permute.xlu0 %1416 }
  0xc3   : > { %v1434_v46 = vsel %vm1247_vm3, %v5618_v61, %v1417_v29  ;;  %v916_v29 = vrot.slane %v5621_v6, 7  ;;  %v4780_v6 = vld [vmem:[%s5378_s6 + $0xd8] sm:$0xff]  }
  0xc4   : > { %1617 = vmatmul.mubr.bf16.vlgmr.msra.gmra.mxu0 %v1434_v46 }
  0xc5   : > { %2817 = vmatprep.mubr.msk.bf16.mxu0 %vm1247_vm3, %v1409_v17  ;;  %2228 = vmatpush1.bf16.msra.mxu0 %v3083_v40  ;;  %v5622_v17 = vpack.c.bf16 %v4570_v28, %v4577_v7  ;;  %v948_v31 = vsel %vm933_vm1, %v915_v35, %v916_v29  ;;  %v5624_v35 = vpack.c.bf16 %v4633_v13, %v4641_v20 }
  0xc6   : > { %2229 = vmatprep.subr.bf16.mxu0 %v5619_v51  ;;  %v1419_v27 = vpop.permute.xlu0 %1418 }
  0xc7   : > { %v1438_v61 = vsel %vm1247_vm3, %v5622_v17, %v1419_v27  ;;  %v1031_v27 = vmul.f32 %v4539_v26, %v948_v31  ;;  %v917_v17 = vrot.slane %v5623_v22, 7  ;;  %v5625_v26 = vld [vmem:[#allocation56_spill] sm:$0xff] }
  0xc9   : > { %2230 = vmatpush1.bf16.msra.mxu0 %v3084_v25  ;;  %v946_v31 = vsel %vm933_vm1, %v917_v17, %v5626_v0  ;;  %v947_v20 = vsel %vm933_vm1, %v916_v29, %v917_v17  ;;  %v5627_v29 = vpack.c.bf16 %v4599_v59, %v4607_v44  ;;  %v4820_v17 = vld [vmem:[%s5378_s6 + $0xc8] sm:$0xff]   ;;  %v4832_v44 = vld [vmem:[%s5378_s6 + $0xc0] sm:$0xff]  }
  0xca   : > { %2231 = vmatprep.subr.bf16.mxu0 %v5619_v51  ;;  %v1421_v7 = vpop.permute.xlu0 %1420  ;;  %v1032_v22 = vmul.f32 %v4566_v37, %v947_v20  ;;  %v5628_v37 = vpack.c.bf16 %v4687_v47, %v4695_v14  ;;  %v5629_v14 = vpack.c.bf16 %v4661_v50, %v4667_v60  ;;  %v4863_v50 = vld [vmem:[%s5378_s6 + $0x118] sm:$0xff]  }
  0xcb   : > { %v1234_v46 = vpop.permute.xlu1 %1233 }
  0xcc   : > { %1625 = vmatmul.mubr.bf16.gmra.mxu0 %v1438_v61  ;;  %v1442_v61 = vsel %vm1247_vm3, %v5624_v35, %v1421_v7 }
  0xcd   : > { %2818 = vmatprep.mubr.msk.bf16.mxu0 %vm1247_vm3, %v1410_v12  ;;  %2232 = vmatpush1.bf16.msra.mxu0 %v3085_v33  ;;  %v1030_v12 = vmul.f32 %v4513_v34, %v949_v36  ;;  %v1985_v36 = vsel %vm1070_vm2, %v5625_v26, %v4224_v19 }
  0xce   : > { %2233 = vmatprep.subr.bf16.mxu0 %v5619_v51 }
  0xcf   : > { %v4772_v28 = vpop.permute.xlu1 %1235  ;;  %v1046_v34 = vpack.c.bf16 %v1031_v27, %v1030_v12  ;;  %v1033_v27 = vmul.f32 %v4564_v16, %v946_v31 }
  0xd1   : > { %2234 = vmatpush1.bf16.msra.mxu0 %v4764_v21  ;;  %v1047_v59 = vpack.c.bf16 %v1033_v27, %v1032_v22 }
  0xd2   : > { %2235 = vmatprep.subr.bf16.mxu0 %v5619_v51 }
  0xd4   : > { %1633 = vmatmul.mubr.bf16.gmra.mxu0 %v1442_v61  ;;  %v1232_v13 = vpop.permute.xlu1 %1231 }
  0xd5   : > { %2819 = vmatprep.mubr.msk.bf16.mxu0 %vm1247_vm3, %v1411_v18  ;;  %2236 = vmatpush1.bf16.msra.mxu0 %v4780_v6  ;;  %v4804_v18 = vld [vmem:[%s5378_s6 + $0xd0] sm:$0xff]   ;;  %v1250_v7 = vsel %vm1247_vm3, %v1046_v34, %v1232_v13 }
  0xd6   : > { %2237 = vmatprep.subr.bf16.mxu0 %v5619_v51  ;;  %1810 = vmatmul.mubr.bf16.vlgmr.msra.gmra.mxu1 %v1250_v7 }
  0xd7   : > { %v1130_v19 = vpop.permute.xlu0 %1129  ;;  %2837 = vmatprep.mubr.msk.bf16.mxu1 %vm1247_vm3, %v5627_v29  ;;  %2955 = vmatpush1.bf16.msra.mxu1 %v3083_v40  ;;  %v1254_v40 = vsel %vm1247_vm3, %v1047_v59, %v1234_v46  ;;  %v5631_v46 = vld [vmem:[#allocation63_spill] sm:$0xff] }
  0xd8   : > { %v4807_v12 = vmul.f32 %v1985_v36, %v1130_v19  ;;  %2944 = vmatprep.subr.bf16.mxu1 %v5619_v51  ;;  %v1929_v26 = vsel %vm933_vm1, %v5631_v46, %v4222_v38  ;;  %v5633_v38 = vld [vmem:[#allocation33_spill] sm:$0xff] }
  0xd9   : > { %2238 = vmatpush1.bf16.msra.mxu0 %v4804_v18 }
  0xda   : > { %2239 = vmatprep.subr.bf16.mxu0 %v5619_v51 }
  0xdb   : > { %v1423_v35 = vpop.permute.xlu0 %1422  ;;  %2956 = vmatpush1.bf16.msra.mxu1 %v3084_v25  ;;  %v5630_v25 = vld [vmem:[#allocation32_spill] sm:$0xff] }
  0xdc   : > { %v1446_v16 = vsel %vm1247_vm3, %v5628_v37, %v1423_v35  ;;  %2945 = vmatprep.subr.bf16.mxu1 %v5619_v51  ;;  %v940_v34 = vsel %vm933_vm1, %v5630_v25, %v3989_v55  ;;  %v5632_v55 = vld [vmem:[#allocation68_spill] sm:$0xff]  ;;  %v5635_v35 = vld [vmem:[#allocation69_spill] sm:$0xff] }
  0xdd   : > { %1641 = vmatmul.mubr.bf16.gmra.mxu0 %v1446_v16  ;;  %v4867_v60 = vmul.f32 %v4730_v2, %v5632_v55  ;;  %v1400_v37 = vmul.f32 %v5635_v35, %v1130_v19  ;;  %v5636_v16 = vld [vmem:[#allocation73_spill] sm:$0xff] }
  0xde   : > { %2240 = vmatpush1.bf16.msra.mxu0 %v4820_v17  ;;  %1818 = vmatmul.mubr.bf16.gmra.mxu1 %v1254_v40  ;;  %v5645_v35 = vld [vmem:[#allocation81_spill] sm:$0xff] }
  0xdf   : > { %v4835_v61 = vpop.permute.xlu0 %1002  ;;  %2241 = vmatprep.subr.bf16.mxu0 %v5619_v51  ;;  %2838 = vmatprep.mubr.msk.bf16.mxu1 %vm1247_vm3, %v5629_v14  ;;  %v5637_v14 = vld [vmem:[#allocation74_spill] sm:$0xff] }
  0xe0   : > { %v4840_v47 = vmul.f32 %v4312_v9, %v4835_v61  ;;  %2957 = vmatpush1.bf16.msra.mxu1 %v3085_v33  ;;  %v1983_v9 = vsel %vm1070_vm2, %v4306_v30, %v4364_v58  ;;  %v1077_v33 = vsel %vm1070_vm2, %v5633_v38, %v3993_v62  ;;  %v1344_v58 = vmul.f32 %v4282_v63, %v4730_v2  ;;  %v4896_v63 = vld [vmem:[%s5378_s6 + $0x110] sm:$0xff]  }
  0xe1   : > { %2946 = vmatprep.subr.bf16.mxu1 %v5619_v51  ;;  %v998_v36 = vpop.permute.xlu1 %997 }
  0xe2   : > { %2242 = vmatpush1.bf16.msra.mxu0 %v4832_v44  ;;  %v4878_v0 = vmul.f32 %v998_v36, %v940_v34  ;;  %v1345_v31 = vmul.f32 %v4316_v24, %v998_v36  ;;  %v4881_v20 = vmul.f32 %v1929_v26, %v998_v36  ;;  %v1175_v24 = vmul.f32 %v1130_v19, %v1077_v33  ;;  %v5639_v34 = vld [vmem:[#allocation67_spill] sm:$0xff]  ;;  %v4941_v26 = vld [vmem:[%s5378_s6 + $0x100] sm:$0xff]  }
  0xe3   : > { %v4873_v30 = vpop.permute.xlu0 %1139  ;;  %2251 = vmatprep.subr.bf16.mxu0 %v5619_v51  ;;  %v1927_v46 = vsel %vm933_vm1, %v5639_v34, %v4278_v56 }
  0xe4   : > { %v4884_v13 = vmul.f32 %v1983_v9, %v4873_v30  ;;  %2958 = vmatpush1.bf16.msra.mxu1 %v4764_v21  ;;  %v1050_v62 = vpack.c.bf16 %v4878_v0, %v4867_v60  ;;  %v1356_v7 = vpack.c.bf16 %v1345_v31, %v1344_v58  ;;  %v1959_v27 = vpack.c.bf16 %v4881_v20, %v4734_v5  ;;  %v5640_v9 = vld [vmem:[#allocation70_spill] sm:$0xff]  ;;  %v5643_v58 = vld [vmem:[#allocation72_spill] sm:$0xff] }
  0xe5   : > { %2947 = vmatprep.subr.bf16.mxu1 %v5619_v51  ;;  %v1135_v2 = vpop.permute.xlu1 %1134  ;;  %v5634_v21 = vpack.c.bf16 %v4630_v8, %v4638_v42  ;;  %v4945_v55 = vmul.f32 %v4835_v61, %v5640_v9  ;;  %v1346_v31 = vmul.f32 %v5643_v58, %v4835_v61  ;;  %v5651_v0 = vld [vmem:[#allocation78_spill] sm:$0xff]  ;;  %v5652_v9 = vld [vmem:[#allocation53_spill] sm:$0xff] }
  0xe6   : > { %2252 = vmatpush2.bf16.msra.mxu0 %v4863_v50  ;;  %v1176_v59 = vmul.f32 %v1135_v2, %v5636_v16  ;;  %v1401_v40 = vmul.f32 %v4352_v32, %v1135_v2  ;;  %v4908_v25 = vmul.f32 %v5637_v14, %v1135_v2  ;;  %v4922_v32 = vld [vmem:[%s5378_s6 + $0x108] sm:$0xff]   ;;  %v5646_v16 = vld [vmem:[#allocation80_spill] sm:$0xff] }
  0xe7   : > { %v1258_v22 = vsel %vm1247_vm3, %v5634_v21, %v4772_v28  ;;  %v1425_v29 = vpop.permute.xlu0 %1424  ;;  %2253 = vmatprep.subr.bf16.mxu0 %v5619_v51 }
  0xe8   : > { %1826 = vmatmul.mubr.bf16.gmra.mxu1 %v1258_v22  ;;  %v1187_v8 = vpack.c.bf16 %v1176_v59, %v1175_v24  ;;  %v1412_v42 = vpack.c.bf16 %v1401_v40, %v1400_v37  ;;  %v2015_v28 = vpack.c.bf16 %v4908_v25, %v4807_v12  ;;  %v1450_v4 = vsel %vm1247_vm3, %v1356_v7, %v1425_v29  ;;  %v5644_v29 = vld [vmem:[#allocation79_spill] sm:$0xff]  ;;  %v2374_v25 = vld [vmem:[%s5092_s25 + $0x58] sm:$0xff] }
  0xe9   : > { %2839 = vmatprep.mubr.msk.bf16.mxu1 %vm1247_vm3, %v1186_v45  ;;  %2959 = vmatpush1.bf16.msra.mxu1 %v4780_v6  ;;  %v1238_v19 = vpop.permute.xlu1 %1237  ;;  %v5638_v45 = vld [vmem:[#allocation34_spill] sm:$0xff]  ;;  %v1402_v22 = vmul.f32 %v4368_v15, %v4873_v30  ;;  %v2373_v12 = vld [vmem:[%s5092_s25 + $0x50] sm:$0xff] }
  0xea   : > { %2948 = vmatprep.subr.bf16.mxu1 %v5619_v51  ;;  %2254 = vmatpush2.bf16.msra.mxu0 %v4896_v63  ;;  %v938_v6 = vsel %vm933_vm1, %v5638_v45, %v4007_v48  ;;  %v5641_v48 = vld [vmem:[#allocation35_spill] sm:$0xff]  ;;  %v2384_v5 = vpack.c.bf16 %v2374_v25, %v2373_v12 }
  0xeb   : > { %v1013_v3 = vpop.permute.xlu0 %1012  ;;  %2255 = vmatprep.subr.bf16.mxu0 %v5619_v51  ;;  %2820 = vmatprep.mubr.msk.bf16.mxu0 %vm1247_vm3, %v1412_v42  ;;  %v1075_v56 = vsel %vm1070_vm2, %v5641_v48, %v4011_v11  ;;  %v1073_v48 = vsel %vm1070_vm2, %v5652_v9, %v4159_v57  ;;  %v5664_v9 = vld [vmem:[#allocation89_spill] sm:$0xff] }
  0xec   : > { %1649 = vmatmul.mubr.bf16.gmra.mxu0 %v1450_v4  ;;  %v5648_v4 = vld [vmem:[#allocation48_spill] sm:$0xff] }
  0xed   : > { %2960 = vmatpush1.bf16.msra.mxu1 %v4804_v18  ;;  %v1008_v38 = vpop.permute.xlu1 %1007  ;;  %v5642_v18 = vpack.c.bf16 %v4684_v53, %v4692_v43 }
  0xee   : > { %2949 = vmatprep.subr.bf16.mxu1 %v5619_v51  ;;  %2256 = vmatpush2.bf16.msra.mxu0 %v4922_v32  ;;  %v4958_v7 = vmul.f32 %v1008_v38, %v938_v6  ;;  %v1347_v24 = vmul.f32 %v4383_v49, %v1008_v38  ;;  %v4961_v2 = vmul.f32 %v1927_v46, %v1008_v38  ;;  %v5649_v6 = vld [vmem:[#allocation71_spill] sm:$0xff] }
  0xef   : > { %v1262_v33 = vsel %vm1247_vm3, %v5642_v18, %v1238_v19  ;;  %v1150_v36 = vpop.permute.xlu0 %1149  ;;  %2257 = vmatprep.subr.bf16.mxu0 %v5619_v51  ;;  %v1177_v49 = vmul.f32 %v4873_v30, %v1075_v56  ;;  %v1925_v34 = vsel %vm933_vm1, %v5649_v6, %v4416_v39  ;;  %v5650_v46 = vld [vmem:[#allocation75_spill] sm:$0xff]  ;;  %v5653_v18 = vld [vmem:[#allocation77_spill] sm:$0xff] }
  0xf0   : > { %1834 = vmatmul.mubr.bf16.gmra.mxu1 %v1262_v33  ;;  %v1051_v11 = vpack.c.bf16 %v4958_v7, %v4945_v55  ;;  %v1357_v43 = vpack.c.bf16 %v1347_v24, %v1346_v31  ;;  %v1960_v53 = vpack.c.bf16 %v4961_v2, %v4840_v47  ;;  %v5000_v60 = vmul.f32 %v1013_v3, %v5650_v46  ;;  %v5654_v31 = vld [vmem:[#allocation76_spill] sm:$0xff] }
  0xf1   : > { %2840 = vmatprep.mubr.msk.bf16.mxu1 %vm1247_vm3, %v1187_v8  ;;  %2961 = vmatpush1.bf16.msra.mxu1 %v4820_v17  ;;  %v1145_v61 = vpop.permute.xlu1 %1144  ;;  %v5009_v39 = vmul.f32 %v5653_v18, %v1013_v3  ;;  %v1981_v24 = vsel %vm1070_vm2, %v5654_v31, %v4426_v1  ;;  %v5658_v1 = vld [vmem:[#allocation92_spill] sm:$0xff]  ;;  %v5667_v18 = vld [vmem:[#allocation95_spill] sm:$0xff] }
  0xf2   : > { %2950 = vmatprep.subr.bf16.mxu1 %v5619_v51  ;;  %2258 = vmatpush2.bf16.msra.mxu0 %v4941_v26  ;;  %v1178_v17 = vmul.f32 %v1145_v61, %v5644_v29  ;;  %v1403_v37 = vmul.f32 %v5645_v35, %v1145_v61  ;;  %v4977_v59 = vmul.f32 %v5646_v16, %v1145_v61  ;;  %v5655_v61 = vld [vmem:[#allocation83_spill] sm:$0xff]  ;;  %v5665_v7 = vld [vmem:[#allocation88_spill] sm:$0xff] }
  0xf3   : > { %v1427_v21 = vpop.permute.xlu0 %1426  ;;  %v5656_v29 = vld [vmem:[#allocation87_spill] sm:$0xff] }
  0xf4   : > { %v1188_v40 = vpack.c.bf16 %v1178_v17, %v1177_v49  ;;  %v1413_v14 = vpack.c.bf16 %v1403_v37, %v1402_v22  ;;  %v2016_v8 = vpack.c.bf16 %v4977_v59, %v4884_v13  ;;  %v1454_v15 = vsel %vm1247_vm3, %v1357_v43, %v1427_v21  ;;  %v5657_v35 = vld [vmem:[#allocation91_spill] sm:$0xff]  ;;  %v2378_v59 = vld [vmem:[%s5092_s25 + $0x78] sm:$0xff] }
  0xf5   : > { %2962 = vmatpush1.bf16.msra.mxu1 %v4832_v44  ;;  %v1240_v42 = vpop.permute.xlu1 %1239  ;;  %v5647_v44 = vld [vmem:[#allocation55_spill] sm:$0xff]  ;;  %v1404_v21 = vmul.f32 %v5655_v61, %v1150_v36  ;;  %v5669_v61 = vld [vmem:[#allocation90_spill] sm:$0xff] }
  0xf6   : > { %2951 = vmatprep.subr.bf16.mxu1 %v5619_v51  ;;  %2821 = vmatprep.mubr.msk.bf16.mxu0 %vm1247_vm3, %v1413_v14  ;;  %v1266_v30 = vsel %vm1247_vm3, %v1050_v62, %v1240_v42  ;;  %v936_v45 = vsel %vm933_vm1, %v5648_v4, %v5647_v44  ;;  %v1348_v62 = vmul.f32 %v5651_v0, %v1013_v3  ;;  %v2377_v13 = vld [vmem:[%s5092_s25 + $0x70] sm:$0xff] }
  0xf7   : > { %v1023_v19 = vpop.permute.xlu0 %1022  ;;  %1657 = vmatmul.mubr.bf16.gmra.mxu0 %v1454_v15  ;;  %v1179_v3 = vmul.f32 %v1150_v36, %v1073_v48  ;;  %v5666_v48 = vld [vmem:[#allocation94_spill] sm:$0xff] }
  0xf8   : > { %1842 = vmatmul.mubr.bf16.gmra.mxu1 %v1266_v30  ;;  %v1953_v55 = vmul.f32 %v5664_v9, %v1023_v19 }
  0xf9   : > { %2841 = vmatprep.mubr.msk.bf16.mxu1 %vm1247_vm3, %v1188_v40  ;;  %2963 = vmatpush2.bf16.msra.mxu1 %v4863_v50  ;;  %v1018_v56 = vpop.permute.xlu1 %1017 }
  0xfa   : > { %2952 = vmatprep.subr.bf16.mxu1 %v5619_v51  ;;  %v1043_v33 = vmul.f32 %v1018_v56, %v936_v45  ;;  %v1349_v50 = vmul.f32 %v4434_v41, %v1018_v56  ;;  %v5012_v58 = vmul.f32 %v1925_v34, %v1018_v56  ;;  %v2007_v41 = vmul.f32 %v1981_v24, %v1150_v36  ;;  %v3095_v36 = vld [vmem:[%s5381_s9 + $0x8] sm:$0xff]   ;;  %v5662_v34 = vld [vmem:[#allocation85_spill] sm:$0xff] }
  0xfb   : > { %v1160_v38 = vpop.permute.xlu0 %1159  ;;  %v1350_v46 = vmul.f32 %v5662_v34, %v1023_v19 }
  0xfc   : > { %v1052_v43 = vpack.c.bf16 %v1043_v33, %v5000_v60  ;;  %v1358_v57 = vpack.c.bf16 %v1349_v50, %v1348_v62  ;;  %v1961_v49 = vpack.c.bf16 %v5012_v58, %v5009_v39  ;;  %v5663_v60 = vld [vmem:[#allocation84_spill] sm:$0xff]  ;;  %v5668_v50 = vld [vmem:[#allocation86_spill] sm:$0xff]  ;;  %v5686_v39 = vld [vmem:[#allocation25_spill] sm:$0xff] }
  0xfd   : > { %2964 = vmatpush2.bf16.msra.mxu1 %v4896_v63  ;;  %v1155_v22 = vpop.permute.xlu1 %1154  ;;  %v5659_v63 = vld [vmem:[#allocation62_spill] sm:$0xff] }
  0xfe   : > { %2953 = vmatprep.subr.bf16.mxu1 %v5619_v51  ;;  %v1180_v17 = vmul.f32 %v1155_v22, %v5656_v29  ;;  %v1405_v37 = vmul.f32 %v5657_v35, %v1155_v22  ;;  %v2008_v16 = vmul.f32 %v5658_v1, %v1155_v22  ;;  %v5660_v30 = vunpack.c.h.bf16 %v5659_v63 }
  0xff   : > { %v1429_v40 = vpop.permute.xlu0 %1428 }
 0x100   : > { %v1189_v14 = vpack.c.bf16 %v1180_v17, %v1179_v3  ;;  %v1414_v42 = vpack.c.bf16 %v1405_v37, %v1404_v21  ;;  %v2017_v15 = vpack.c.bf16 %v2008_v16, %v2007_v41  ;;  %v1069_v44 = vrot.slane %v5660_v30, 1  ;;  %v5670_v41 = vld [vmem:[#allocation93_spill] sm:$0xff]  ;;  %v5671_v17 = vld [vmem:[#allocation96_spill] sm:$0xff] }
 0x101   : > { %2965 = vmatpush2.bf16.msra.mxu1 %v4922_v32  ;;  %v1242_v4 = vpop.permute.xlu1 %1241  ;;  %v1458_v45 = vsel %vm1247_vm3, %v1358_v57, %v1429_v40  ;;  %v1406_v21 = vmul.f32 %v5669_v61, %v1160_v38  ;;  %v2009_v29 = vmul.f32 %v5670_v41, %v1160_v38  ;;  %v5672_v37 = vld [vmem:[#allocation97_spill] sm:$0xff]  ;;  %v5691_v41 = vpack.c.bf16 %v4719_v52, %v4724_v10  ;;  %v2369_v52 = vld [vmem:[%s5092_s25 + $0x30] sm:$0xff]  ;;  %v2370_v10 = vld [vmem:[%s5092_s25 + $0x38] sm:$0xff] }
 0x102   : > { %2954 = vmatprep.subr.bf16.mxu1 %v5619_v51  ;;  %2822 = vmatprep.mubr.msk.bf16.mxu0 %vm1247_vm3, %v1414_v42  ;;  %v1270_v6 = vsel %vm1247_vm3, %v1051_v11, %v1242_v4  ;;  %v5661_v51 = vld [vmem:[#allocation82_spill] sm:$0xff]  ;;  %v1071_v0 = vsel %vm1070_vm2, %v5663_v60, %v1069_v44 }
 0x103   : > { %1665 = vmatmul.mubr.bf16.gmra.mxu0 %v1458_v45  ;;  %1850 = vmatmul.mubr.bf16.gmra.mxu1 %v1270_v6  ;;  %v1044_v32 = vmul.f32 %v1023_v19, %v5661_v51  ;;  %v1181_v3 = vmul.f32 %v1160_v38, %v1071_v0  ;;  %v1431_v42 = vpop.permute.xlu0 %1430  ;;  %v5673_v38 = vld [vmem:[#allocation100_spill] sm:$0xff]  ;;  %v5676_v51 = vld [vmem:[#allocation15_spill] sm:$0xff] }
 0x104   : > { %2842 = vmatprep.mubr.msk.bf16.mxu1 %vm1247_vm3, %v1189_v14  ;;  %v5680_v0 = vld [vmem:[#allocation16_spill] sm:$0xff] }
 0x105   : > { %2966 = vmatpush2.bf16.msra.mxu1 %v4941_v26  ;;  %v1028_v62 = vpop.permute.xlu1 %1027  ;;  %v1086_v26 = vsel %vm1070_vm2, %v1069_v44, %v5668_v50  ;;  %v5674_v44 = vld [vmem:[#allocation98_spill] sm:$0xff] }
 0x106   : > { %2923 = vmatprep.subr.bf16.mxu1 %v3095_v36  ;;  %v1045_v11 = vmul.f32 %v1028_v62, %v5665_v7  ;;  %v1351_v56 = vmul.f32 %v5666_v48, %v1028_v62  ;;  %v1954_v33 = vmul.f32 %v5667_v18, %v1028_v62  ;;  %v5675_v4 = vpack.c.bf16 %v5673_v38, %v5674_v44  ;;  %v3096_v7 = vld [vmem:[%s5381_s9] sm:$0xff]   ;;  %v5682_v48 = vld [vmem:[#allocation36_spill] sm:$0xff]  ;;  %v2364_v50 = vld [vmem:[%s5092_s25 + $0x8] sm:$0xff] }
 0x107   : > { %v2060_v45 = vpop.permute.xlu0 %2059  ;;  %v2376_v44 = vld [vmem:[%s5092_s25 + $0x68] sm:$0xff] }
 0x108   : > { %v1053_v31 = vpack.c.bf16 %v1045_v11, %v1044_v32  ;;  %v1359_v24 = vpack.c.bf16 %v1351_v56, %v1350_v46  ;;  %v1962_v57 = vpack.c.bf16 %v1954_v33, %v1953_v55  ;;  %v5677_v32 = vld [vmem:[#allocation99_spill] sm:$0xff]  ;;  %v5683_v56 = vld [vmem:[#allocation29_spill] sm:$0xff] }
 0x109   : > { %v1165_v22 = vpop.permute.xlu1 %1164  ;;  %v5678_v34 = vpack.c.bf16 %v5676_v51, %v5677_v32  ;;  %v5684_v18 = vpack.c.bf16 %v5682_v48, %v5683_v56 }
 0x10a   : > { %v1182_v19 = vmul.f32 %v1165_v22, %v1086_v26  ;;  %v1407_v35 = vmul.f32 %v5671_v17, %v1165_v22  ;;  %v2010_v1 = vmul.f32 %v5672_v37, %v1165_v22  ;;  %v1462_v63 = vsel %vm1247_vm3, %v1359_v24, %v1431_v42  ;;  %v2367_v17 = vld [vmem:[%s5092_s25 + $0x20] sm:$0xff] }
 0x10b   : > { %v2077_v46 = vsel %vm1247_vm3, %v5678_v34, %v2060_v45  ;;  %v2062_v9 = vpop.permute.xlu0 %2061  ;;  %v2371_v42 = vld [vmem:[%s5092_s25 + $0x40] sm:$0xff] }
 0x10c   : > { %v1190_v16 = vpack.c.bf16 %v1182_v19, %v1181_v3  ;;  %v1415_v40 = vpack.c.bf16 %v1407_v35, %v1406_v21  ;;  %v2018_v14 = vpack.c.bf16 %v2010_v1, %v2009_v29  ;;  %v2081_v33 = vsel %vm1247_vm3, %v5684_v18, %v2062_v9  ;;  %v5689_v3 = vld [vmem:[#allocation21_spill] sm:$0xff]  ;;  %v2365_v29 = vld [vmem:[%s5092_s25 + $0x10] sm:$0xff]  ;;  %v2366_v19 = vld [vmem:[%s5092_s25 + $0x18] sm:$0xff] }
 0x10d   : > { %v1244_v23 = vpop.permute.xlu1 %1243  ;;  %v2368_v35 = vld [vmem:[%s5092_s25 + $0x28] sm:$0xff]  ;;  %v2380_v1 = vpack.c.bf16 %v2366_v19, %v2365_v29 }
 0x10e   : > { %2823 = vmatprep.mubr.msk.bf16.mxu0 %vm1247_vm3, %v1415_v40  ;;  %v1274_v30 = vsel %vm1247_vm3, %v1052_v43, %v1244_v23  ;;  %v5679_v43 = vld [vmem:[#allocation17_spill] sm:$0xff] }
 0x10f   : > { %1673 = vmatmul.mubr.bf16.gmra.mxu0 %v1462_v63  ;;  %1858 = vmatmul.mubr.bf16.gmra.mxu1 %v1274_v30  ;;  %v5681_v62 = vpack.c.bf16 %v5679_v43, %v5680_v0  ;;  %v2064_v26 = vpop.permute.xlu0 %2063  ;;  %v2382_v63 = vpack.c.bf16 %v2370_v10, %v2369_v52 }
 0x110   : > { %2843 = vmatprep.mubr.msk.bf16.mxu1 %vm1247_vm3, %v1190_v16  ;;  %2864 = vmatprep.mubr.msk.bf16.mxu0 %vm1247_vm3, %v5675_v4  ;;  %v5692_v16 = vld [vmem:[#allocation38_spill] sm:$0xff] }
 0x111   : > { %v1246_v6 = vpop.permute.xlu1 %1245  ;;  %v5693_v40 = vpack.c.bf16 %v4689_v54, %v5692_v16  ;;  %v2372_v54 = vld [vmem:[%s5092_s25 + $0x48] sm:$0xff] }
 0x112   : > { %v1278_v60 = vsel %vm1247_vm3, %v1053_v31, %v1246_v6  ;;  %v2383_v30 = vpack.c.bf16 %v2372_v54, %v2371_v42 }
 0x113   : > { %v2068_v23 = vpop.permute.xlu0 %2067 }
 0x114   : > { %v2093_v38 = vsel %vm1247_vm3, %v1959_v27, %v2068_v23 }
 0x115   : > { %v2072_v55 = vpop.permute.xlu1 %2071 }
 0x116   : > { %v2101_v11 = vsel %vm1247_vm3, %v1961_v49, %v2072_v55  ;;  %v2363_v49 = vld [vmem:[%s5092_s25] sm:$0xff] }
 0x117   : > { %1866 = vmatmul.mubr.bf16.gmra.mxu1 %v1278_v60  ;;  %2260 = vmatmul.mubr.bf16.vlgmr.msra.gmra.mxu0 %v2077_v46  ;;  %v2379_v24 = vpack.c.bf16 %v2364_v50, %v2363_v49 }
 0x118   : > { %2865 = vmatprep.mubr.msk.bf16.mxu0 %vm1247_vm3, %v5681_v62  ;;  %2870 = vmatprep.mubr.msk.bf16.mxu1 %vm1247_vm3, %v2017_v15  ;;  %v5685_v15 = vld [vmem:[#allocation30_spill] sm:$0xff] }
 0x119   : > { %v5687_v58 = vpack.c.bf16 %v5685_v15, %v5686_v39  ;;  %v2074_v31 = vpop.permute.xlu1 %2073 }
 0x11a   : > { %v2105_v22 = vsel %vm1247_vm3, %v1962_v57, %v2074_v31  ;;  %v2381_v57 = vpack.c.bf16 %v2368_v35, %v2367_v17 }
 0x11d   : > { %v2066_v37 = vpop.permute.xlu1 %2065 }
 0x11f   : > { %2268 = vmatmul.mubr.bf16.gmra.mxu0 %v2081_v33  ;;  %2308 = vmatmul.mubr.bf16.vlgmr.msra.gmra.mxu1 %v2101_v11 }
 0x120   : > { %2924 = vmatpush3.bf16.msra.mxu1 %v3095_v36  ;;  %2866 = vmatprep.mubr.msk.bf16.mxu0 %vm1247_vm3, %v5687_v58  ;;  %v5688_v36 = vld [vmem:[#allocation37_spill] sm:$0xff] }
 0x121   : > { %2871 = vmatprep.mubr.msk.bf16.mxu1 %vm1247_vm3, %v2018_v14  ;;  %2925 = vmatprep.subr.bf16.mxu1 %v3096_v7  ;;  %v5690_v61 = vpack.c.bf16 %v5688_v36, %v5689_v3  ;;  %v2089_v14 = vsel %vm1247_vm3, %v5693_v40, %v2066_v37  ;;  %v2070_v4 = vpop.permute.xlu1 %2069 }
 0x122   : > { %v2097_v27 = vsel %vm1247_vm3, %v1960_v53, %v2070_v4 }
 0x123   : > { %v2085_v21 = vsel %vm1247_vm3, %v5690_v61, %v2064_v26 }
 0x124   : > { %2926 = vmatpush3.bf16.msra.mxu1 %v3096_v7 }
 0x127   : > { %2276 = vmatmul.mubr.bf16.gmra.mxu0 %v2085_v21  ;;  %2316 = vmatmul.mubr.bf16.gmra.mxu1 %v2105_v22 }
 0x128   : > { %2867 = vmatprep.mubr.msk.bf16.mxu0 %vm1247_vm3, %v5691_v41  ;;  %2927 = vmatprep.mubr.msk.bf16.mxu1 %vm2403_vm4, %v2379_v24 }
 0x12f   : > { %2284 = vmatmul.mubr.bf16.gmra.mxu0 %v2089_v14  ;;  %2928 = vmatmul.mubr.msk.bf16.vlgmr.msra.gmra.mxu1 %vm2403_vm4, %v2380_v1 }
 0x130   : > { %2868 = vmatprep.mubr.msk.bf16.mxu0 %vm1247_vm3, %v2015_v28  ;;  %2931 = vmatprep.mubr.msk.bf16.mxu1 %vm2403_vm4, %v2381_v57  ;;  %v2375_v28 = vld [vmem:[%s5092_s25 + $0x60] sm:$0xff]  ;;  %s3192_s25 = scalar_lea.vmem %s5312_s21, 2048 }
 0x131   : > { %v2385_v20 = vpack.c.bf16 %v2376_v44, %v2375_v28  ;;  %p3193_p4 = scmp.ne.s32.totalorder %s5312_s21, %s3192_s25  ;;  %p3200_p9 = scmp.lt.s32.totalorder %s3198_s23, %s3192_s25 }
 0x133   : > { %p3194_p5 = pnand %p3193_p4, %p3402_p3  ;;  %p3201_p10 = por %p3200_p9, %p3199_p7 }
 0x135   : > { %p3195_p6 = pneg %p3194_p5 }
 0x137   : > { %2292 = vmatmul.mubr.bf16.gmra.mxu0 %v2093_v38  ;;  %2932 = vmatmul.mubr.msk.bf16.gmra.mxu1 %vm2403_vm4, %v2382_v63  ;;  %p3202_p11 = pnand %p3201_p10, %p3195_p6 }
 0x138   : > { %2869 = vmatprep.mubr.msk.bf16.mxu0 %vm1247_vm3, %v2016_v8  ;;  %2935 = vmatprep.mubr.msk.bf16.mxu1 %vm2403_vm4, %v2383_v30  ;;  %v2386_v8 = vpack.c.bf16 %v2378_v59, %v2377_v13 }
 0x13f   : > { %2300 = vmatmul.mubr.bf16.gmra.mxu0 %v2097_v27  ;;  %2936 = vmatmul.mubr.msk.bf16.gmra.mxu1 %vm2403_vm4, %v2384_v5 }
 0x140   : > { %2939 = vmatprep.mubr.msk.bf16.mxu1 %vm2403_vm4, %v2385_v20 }
 0x147   : > { %2940 = vmatmul.mubr.msk.bf16.gmra.mxu1 %vm2403_vm4, %v2386_v8 }
 0x184   : > { %v1618_v45 = vpop.f32.mrf.mxu0 }
 0x186   : > { %v1620_v6 = vpop.f32.mrf.mxu0 }
 0x188   : > { %v1621_v51 = vpop.f32.mrf.mxu0 }
 0x18a   : > { %v1623_v32 = vpop.f32.mrf.mxu0 }
 0x18c   : > { %v1626_v34 = vpop.f32.mrf.mxu0 }
 0x18e   : > { %v1628_v46 = vpop.f32.mrf.mxu0 }
 0x190   : > { %v1629_v60 = vpop.f32.mrf.mxu0 }
 0x192   : > { %v1631_v47 = vpop.f32.mrf.mxu0 }
 0x194   : > { %v1634_v2 = vpop.f32.mrf.mxu0 }
 0x196   : > { %v1636_v53 = vpop.f32.mrf.mxu0  ;;  %v1811_v43 = vpop.f32.mrf.mxu1 }
 0x197   : > { %v5152_v62 = vadd.f32 %v1811_v43, %v1618_v45 }
 0x198   : > { %v1637_v0 = vpop.f32.mrf.mxu0  ;;  %v1813_v9 = vpop.f32.mrf.mxu1 }
 0x19a   : > { %v1639_v55 = vpop.f32.mrf.mxu0  ;;  %v1814_v7 = vpop.f32.mrf.mxu1 }
 0x19b   : > { %v5154_v11 = vadd.f32 %v1814_v7, %v1621_v51 }
 0x19c   : > { %v1816_v56 = vpop.f32.mrf.mxu1 }
 0x19d   : > { %v1642_v48 = vpop.f32.mrf.mxu0 }
 0x19e   : > { %v1819_v33 = vpop.f32.mrf.mxu1 }
 0x19f   : > { %v1644_v18 = vpop.f32.mrf.mxu0  ;;  %v5156_v15 = vadd.f32 %v1819_v33, %v1626_v34 }
 0x1a0   : > { %v1821_v58 = vpop.f32.mrf.mxu1 }
 0x1a1   : > { %v1645_v39 = vpop.f32.mrf.mxu0 }
 0x1a2   : > { %v1822_v50 = vpop.f32.mrf.mxu1 }
 0x1a3   : > { %v1647_v49 = vpop.f32.mrf.mxu0  ;;  %v5158_v26 = vadd.f32 %v1822_v50, %v1629_v60 }
 0x1a4   : > { %v1824_v31 = vpop.f32.mrf.mxu1 }
 0x1a8   : > { %v1827_v24 = vpop.f32.mrf.mxu1 }
 0x1a9   : > { %v5160_v36 = vadd.f32 %v1827_v24, %v1634_v2 }
 0x1aa   : > { %v1829_v3 = vpop.f32.mrf.mxu1 }
 0x1ac   : > { %v1830_v61 = vpop.f32.mrf.mxu1  ;;  %v1650_v22 = vpop.f32.mrf.mxu0 }
 0x1ad   : > { %v5162_v21 = vadd.f32 %v1830_v61, %v1637_v0 }
 0x1ae   : > { %v1832_v41 = vpop.f32.mrf.mxu1  ;;  %v1652_v29 = vpop.f32.mrf.mxu0 }
 0x1b0   : > { %v1835_v19 = vpop.f32.mrf.mxu1  ;;  %v1653_v35 = vpop.f32.mrf.mxu0 }
 0x1b1   : > { %v5164_v17 = vadd.f32 %v1835_v19, %v1642_v48 }
 0x1b2   : > { %v1837_v37 = vpop.f32.mrf.mxu1  ;;  %v1655_v1 = vpop.f32.mrf.mxu0 }
 0x1b3   : > { %v5210_v37 = vld [vmem:[%s5379_s7] ss:$0 sm:$0xff] }
 0x1b4   : > { %v1838_v57 = vpop.f32.mrf.mxu1 }
 0x1b5   : > { %v5166_v16 = vadd.f32 %v1838_v57, %v1645_v39 }
 0x1b6   : > { %v1840_v40 = vpop.f32.mrf.mxu1 }
 0x1b7   : > { %v5168_v14 = vpop.f32.mrf.mxu0 }
 0x1b8   : > { %v1843_v52 = vpop.f32.mrf.mxu1 }
 0x1b9   : > { %v5170_v10 = vadd.f32 %v1843_v52, %v1650_v22  ;;  %v1660_v42 = vpop.f32.mrf.mxu0  ;;  %v5219_v52 = vld [vmem:[%s5382_s10] ss:$0 sm:$0xff] }
 0x1ba   : > { %v1845_v54 = vpop.f32.mrf.mxu1 }
 0x1bb   : > { %v5172_v23 = vpop.f32.mrf.mxu0 }
 0x1bc   : > { %v1846_v63 = vpop.f32.mrf.mxu1 }
 0x1bd   : > { %v5174_v30 = vadd.f32 %v1846_v63, %v1653_v35  ;;  %v1663_v38 = vpop.f32.mrf.mxu0 }
 0x1be   : > { %v1848_v12 = vpop.f32.mrf.mxu1 }
 0x1c3   : > { %v5176_v25 = vpop.f32.mrf.mxu0  ;;  %v5178_v28 = vpop.f32.mrf.mxu1 }
 0x1c5   : > { %v1668_v44 = vpop.f32.mrf.mxu0  ;;  %v1853_v4 = vpop.f32.mrf.mxu1 }
 0x1c7   : > { %v5180_v5 = vpop.f32.mrf.mxu0  ;;  %v5182_v20 = vpop.f32.mrf.mxu1 }
 0x1c9   : > { %v1671_v27 = vpop.f32.mrf.mxu0  ;;  %v1856_v13 = vpop.f32.mrf.mxu1 }
 0x1cf   : > { %v5184_v59 = vpop.f32.mrf.mxu0  ;;  %v5186_v8 = vpop.f32.mrf.mxu1 }
 0x1d1   : > { %v1676_v45 = vpop.f32.mrf.mxu0  ;;  %v1861_v6 = vpop.f32.mrf.mxu1 }
 0x1d3   : > { %v5188_v51 = vpop.f32.mrf.mxu0  ;;  %v5190_v32 = vpop.f32.mrf.mxu1 }
 0x1d5   : > { %v1679_v34 = vpop.f32.mrf.mxu0  ;;  %v1864_v46 = vpop.f32.mrf.mxu1 }
 0x1d7   : > { %v5192_v60 = vpop.f32.mrf.mxu1  ;;  %v2261_v47 = vpop.f32.mrf.mxu0 }
 0x1d8   : > { %v2324_v29 = vadd.f32 %v2261_v47, %v5152_v62 }
 0x1d9   : > { %v1869_v2 = vpop.f32.mrf.mxu1  ;;  %v2263_v53 = vpop.f32.mrf.mxu0 }
 0x1da   : > { %v2347_v54 = vadd.f32 %v5210_v37, %v2324_v29 }
 0x1db   : > { %v5194_v43 = vpop.f32.mrf.mxu1  ;;  %v2264_v0 = vpop.f32.mrf.mxu0 }
 0x1dc   : > { %v2325_v62 = vadd.f32 %v2264_v0, %v5154_v11 }
 0x1dd   : > { %v1872_v9 = vpop.f32.mrf.mxu1  ;;  %v2266_v55 = vpop.f32.mrf.mxu0 }
 0x1df   : > { %v2269_v7 = vpop.f32.mrf.mxu0  ;;  %v5196_v48 = vpop.f32.mrf.mxu1 }
 0x1e0   : > { %v2326_v61 = vadd.f32 %v2269_v7, %v5156_v15 }
 0x1e1   : > { %v2271_v56 = vpop.f32.mrf.mxu0  ;;  %v2311_v18 = vpop.f32.mrf.mxu1 }
 0x1e2   : > { %v2349_v57 = vadd.f32 %v5210_v37, %v2326_v61 }
 0x1e3   : > { %v2272_v33 = vpop.f32.mrf.mxu0  ;;  %v5198_v39 = vpop.f32.mrf.mxu1 }
 0x1e4   : > { %v2327_v1 = vadd.f32 %v2272_v33, %v5158_v26 }
 0x1e5   : > { %v2274_v58 = vpop.f32.mrf.mxu0  ;;  %v2314_v49 = vpop.f32.mrf.mxu1 }
 0x1e6   : > { %v2350_v4 = vadd.f32 %v5210_v37, %v2327_v1  ;;  %v1852_v1 = vadd.f32 %v5178_v28, %v5168_v14  ;;  %v1860_v28 = vadd.f32 %v5186_v8, %v5176_v25 }
 0x1e7   : > { %v2277_v50 = vpop.f32.mrf.mxu0  ;;  %v5200_v31 = vpop.f32.mrf.mxu1 }
 0x1e8   : > { %v2328_v45 = vadd.f32 %v2277_v50, %v5160_v36 }
 0x1e9   : > { %v2279_v24 = vpop.f32.mrf.mxu0  ;;  %v2319_v3 = vpop.f32.mrf.mxu1 }
 0x1ea   : > { %v2351_v18 = vadd.f32 %v5210_v37, %v2328_v45 }
 0x1eb   : > { %v2280_v22 = vpop.f32.mrf.mxu0  ;;  %v5203_v41 = vpop.f32.mrf.mxu1 }
 0x1ec   : > { %v2329_v55 = vadd.f32 %v2280_v22, %v5162_v21 }
 0x1ed   : > { %v2282_v19 = vpop.f32.mrf.mxu0  ;;  %v2322_v35 = vpop.f32.mrf.mxu1 }
 0x1ee   : > { %v2352_v29 = vadd.f32 %v5210_v37, %v2329_v55 }
 0x1ef   : > { %v2285_v15 = vpop.f32.mrf.mxu0  ;;  %v2929_v40 = vpop.f32.mrf.mxu1 }
 0x1f0   : > { %v2527_v42 = vadd.f32 %v2929_v40, %v2349_v57  ;;  %v2330_v26 = vadd.f32 %v2285_v15, %v5164_v17  ;;  %v2348_v17 = vadd.f32 %v5210_v37, %v2325_v62 }
 0x1f1   : > { %v2287_v63 = vpop.f32.mrf.mxu0  ;;  %v2462_v38 = vpop.f32.mrf.mxu1 }
 0x1f2   : > { %v2550_v12 = vadd.f32 %v5219_v52, %v2527_v42  ;;  %v2525_v44 = vadd.f32 %v2462_v38, %v2347_v54  ;;  %v2353_v53 = vadd.f32 %v5210_v37, %v2330_v26 }
 0x1f3   : > { %v2288_v27 = vpop.f32.mrf.mxu0  ;;  %v2930_v13 = vpop.f32.mrf.mxu1 }
 0x1f4   : > { %2566 = vst.msk [vmem:[%s5227_s27 + $0x10] sm:$0xff] %vm1247_vm3, %v2550_v12  ;;  %v2548_v11 = vadd.f32 %v5219_v52, %v2525_v44  ;;  %v2528_v6 = vadd.f32 %v2930_v13, %v2350_v4  ;;  %v2331_v47 = vadd.f32 %v2288_v27, %v5166_v16  ;;  %v1871_v44 = vadd.f32 %v5194_v43, %v5188_v51 }
 0x1f5   : > { %v2290_v34 = vpop.f32.mrf.mxu0  ;;  %v2465_v46 = vpop.f32.mrf.mxu1  ;;  %v2336_v4 = vadd.f32 %v5196_v48, %v1860_v28 }
 0x1f6   : > { %2564 = vst.msk [vmem:[%s5227_s27] sm:$0xff] %vm1247_vm3, %v2548_v11  ;;  %v2551_v36 = vadd.f32 %v5219_v52, %v2528_v6  ;;  %v2526_v2 = vadd.f32 %v2465_v46, %v2348_v17  ;;  %v2354_v50 = vadd.f32 %v5210_v37, %v2331_v47  ;;  %v2339_v43 = vadd.f32 %v5203_v41, %v1871_v44 }
 0x1f7   : > { %v2293_v0 = vpop.f32.mrf.mxu0  ;;  %v2933_v9 = vpop.f32.mrf.mxu1 }
 0x1f8   : > { %2567 = vst.msk [vmem:[%s5227_s27 + $0x18] sm:$0xff] %vm1247_vm3, %v2551_v36  ;;  %v2549_v7 = vadd.f32 %v5219_v52, %v2526_v2  ;;  %v2531_v56 = vadd.f32 %v2933_v9, %v2353_v53  ;;  %v2332_v21 = vadd.f32 %v2293_v0, %v5170_v10  ;;  %v1868_v10 = vadd.f32 %v5192_v60, %v5184_v59 }
 0x1f9   : > { %v2295_v33 = vpop.f32.mrf.mxu0  ;;  %v2478_v16 = vpop.f32.mrf.mxu1  ;;  %v1855_v59 = vadd.f32 %v5182_v20, %v5172_v23  ;;  %v1863_v20 = vadd.f32 %v5190_v32, %v5180_v5  ;;  %v2359_v5 = vadd.f32 %v5210_v37, %v2336_v4 }
 0x1fa   : > { %2565 = vst.msk [vmem:[%s5227_s27 + $0x8] sm:$0xff] %vm1247_vm3, %v2549_v7  ;;  %v2554_v58 = vadd.f32 %v5219_v52, %v2531_v56  ;;  %v2529_v49 = vadd.f32 %v2478_v16, %v2351_v18  ;;  %v2355_v14 = vadd.f32 %v5210_v37, %v2332_v21  ;;  %v2338_v38 = vadd.f32 %v5200_v31, %v1868_v10 }
 0x1fb   : > { %v2296_v24 = vpop.f32.mrf.mxu0  ;;  %v2934_v3 = vpop.f32.mrf.mxu1  ;;  %v2337_v32 = vadd.f32 %v5198_v39, %v1863_v20  ;;  %v2362_v39 = vadd.f32 %v5210_v37, %v2339_v43 }
 0x1fc   : > { %2570 = vst.msk [vmem:[%s5227_s27 + $0x30] sm:$0xff] %vm1247_vm3, %v2554_v58  ;;  %v2552_v61 = vadd.f32 %v5219_v52, %v2529_v49  ;;  %v2532_v22 = vadd.f32 %v2934_v3, %v2354_v50  ;;  %v2333_v42 = vadd.f32 %v2296_v24, %v5174_v30  ;;  %v2361_v51 = vadd.f32 %v5210_v37, %v2338_v38 }
 0x1fd   : > { %v2298_v19 = vpop.f32.mrf.mxu0  ;;  %v2481_v35 = vpop.f32.mrf.mxu1  ;;  %v2360_v56 = vadd.f32 %v5210_v37, %v2337_v32 }
 0x1fe   : > { %2568 = vst.msk [vmem:[%s5227_s27 + $0x20] sm:$0xff] %vm1247_vm3, %v2552_v61  ;;  %v2555_v57 = vadd.f32 %v5219_v52, %v2532_v22  ;;  %v2530_v15 = vadd.f32 %v2481_v35, %v2352_v29  ;;  %v2356_v23 = vadd.f32 %v5210_v37, %v2333_v42 }
 0x1ff   : > { %v2301_v40 = vpop.f32.mrf.mxu0  ;;  %v2937_v62 = vpop.f32.mrf.mxu1 }
 0x200   : > { %2571 = vst.msk [vmem:[%s5227_s27 + $0x38] sm:$0xff] %vm1247_vm3, %v2555_v57  ;;  %v2553_v54 = vadd.f32 %v5219_v52, %v2530_v15  ;;  %v2334_v63 = vadd.f32 %v2301_v40, %v1852_v1 }
 0x201   : > { %v2303_v26 = vpop.f32.mrf.mxu0  ;;  %v2494_v12 = vpop.f32.mrf.mxu1 }
 0x202   : > { %2569 = vst.msk [vmem:[%s5227_s27 + $0x28] sm:$0xff] %vm1247_vm3, %v2553_v54  ;;  %v2357_v30 = vadd.f32 %v5210_v37, %v2334_v63  ;;  %v2533_v60 = vadd.f32 %v2494_v12, %v2355_v14 }
 0x203   : > { %v2304_v25 = vpop.f32.mrf.mxu0  ;;  %v2938_v8 = vpop.f32.mrf.mxu1 }
 0x204   : > { %v2535_v31 = vadd.f32 %v2937_v62, %v2357_v30  ;;  %v2556_v27 = vadd.f32 %v5219_v52, %v2533_v60  ;;  %v2335_v13 = vadd.f32 %v2304_v25, %v1855_v59 }
 0x205   : > { %v2306_v45 = vpop.f32.mrf.mxu0  ;;  %v2497_v11 = vpop.f32.mrf.mxu1 }
 0x206   : > { %v2558_v48 = vadd.f32 %v5219_v52, %v2535_v31  ;;  %2572 = vst.msk [vmem:[%s5227_s27 + $0x40] sm:$0xff] %vm1247_vm3, %v2556_v27  ;;  %v2358_v6 = vadd.f32 %v5210_v37, %v2335_v13  ;;  %v2534_v17 = vadd.f32 %v2497_v11, %v2356_v23 }
 0x207   : > { %v2941_v34 = vpop.f32.mrf.mxu1 }
 0x208   : > { %2574 = vst.msk [vmem:[%s5227_s27 + $0x50] sm:$0xff] %vm1247_vm3, %v2558_v48  ;;  %v2536_v41 = vadd.f32 %v2938_v8, %v2358_v6  ;;  %v2557_v46 = vadd.f32 %v5219_v52, %v2534_v17  ;;  %v2539_v47 = vadd.f32 %v2941_v34, %v2361_v51 }
 0x209   : > { %v2510_v36 = vpop.f32.mrf.mxu1 }
 0x20a   : > { %v2559_v2 = vadd.f32 %v5219_v52, %v2536_v41  ;;  %2573 = vst.msk [vmem:[%s5227_s27 + $0x48] sm:$0xff] %vm1247_vm3, %v2557_v46  ;;  %v2562_v53 = vadd.f32 %v5219_v52, %v2539_v47  ;;  %v2537_v0 = vadd.f32 %v2510_v36, %v2359_v5 }
 0x20b   : > { %v2942_v9 = vpop.f32.mrf.mxu1 }
 0x20c   : > { %2575 = vst.msk [vmem:[%s5227_s27 + $0x58] sm:$0xff] %vm1247_vm3, %v2559_v2  ;;  %2578 = vst.msk [vmem:[%s5227_s27 + $0x70] sm:$0xff] %vm1247_vm3, %v2562_v53  ;;  %v2560_v55 = vadd.f32 %v5219_v52, %v2537_v0  ;;  %v2540_v7 = vadd.f32 %v2942_v9, %v2362_v39 }
 0x20d   : > { %v2513_v18 = vpop.f32.mrf.mxu1 }
 0x20e   : > { %2576 = vst.msk [vmem:[%s5227_s27 + $0x60] sm:$0xff] %vm1247_vm3, %v2560_v55  ;;  %v2563_v33 = vadd.f32 %v5219_v52, %v2540_v7  ;;  %v2538_v16 = vadd.f32 %v2513_v18, %v2360_v56 }
 0x210   : > { %2579 = vst.msk [vmem:[%s5227_s27 + $0x78] sm:$0xff] %vm1247_vm3, %v2563_v33  ;;  %v2561_v37 = vadd.f32 %v5219_v52, %v2538_v16 }
 0x212   : > { %2577 = vst.msk [vmem:[%s5227_s27 + $0x68] sm:$0xff] %vm1247_vm3, %v2561_v37 }
 0x213   : > { %3205 = shalt.err (!%p3202_p11)
}
 0x214   : > { %s3206_s13 = scalar_lea.hbm %s5310_s29, 2048  ;;  %s3210_s27 = scalar_lea.hbm %s5694_s28, 8192 }
 0x215   : > { %p3207_p12 = scmp.ne.s32.totalorder %s5310_s29, %s3206_s13  ;;  %p3211_p1 = scmp.lt.s32.totalorder %s5310_s29, %s5694_s28 }
 0x216   : > { %p3212_p2 = scmp.lt.s32.totalorder %s3210_s27, %s3206_s13 }
 0x217   : > { %p3208_p13 = pnand %p3207_p12, %p3402_p3 }
 0x218   : > { %p3213_p4 = por %p3212_p2, %p3211_p1 }
 0x219   : > { %p3209_p0 = pneg %p3208_p13 }
 0x21b   : > { %p3214_p5 = pnand %p3213_p4, %p3209_p0 }
 0x21d   : > { %3217 = shalt.err (!%p3214_p5)
}
 0x21e   : > { %s3289_s24 = smov 128   ;;  %s3290_s20 = smov 8  }
 0x21f   : > { %2967 = dma.vmem_to_hbm [thread:$0]  (%p3402_p3), %s5312_s21, 2048, %s5310_s29, %s5321_s22, %s3289_s24, %s3289_s24, %s3290_s20  }
 0x220 PF: > { %s5695_s16 = sld [smem:[#allocation10_spill]] }
 0x221   : > { %s5696_s26 = sld [smem:[#allocation6_spill]] }
 0x226   : > { %p2973_p6 = scmp.ge.s32.totalorder %s5695_s16, 2 }
 0x227   : > { %s2612_s12 = sand.u32 1, %s5696_s26  }
 0x228   : > { %p2970_p7 = pnand %p2973_p6, %p3411_p8  ;;  %s2613_s14 = scalar_lea.sflag [#allocation4], %s2612_s12 }
 0x22a   : > { %p2971_p9 = pneg %p2970_p7 }
 0x22c   : > { %3251 = dma.done.wait (%p2971_p9), %s2613_s14, 2048  }
 0x22d   : > { %3253 = vsyncadd (%p2971_p9), %s2613_s14, 4294965248  ;;  %s24_s24 = sadd.s32 1, %s5695_s16   ;;  %s5698_s23 = sld [smem:[#allocation7_spill]] }
 0x22e   : > { %p21_p10 = scmp.ge.s32.totalorder %s24_s24, 6   ;;  %s5699_s19 = sld [smem:[#allocation14_spill]] }
 0x22f   : > { %s5700_s20 = sld [smem:[#allocation8_spill]]  ;;  %s5704_s17 = smov %s3260_s18 }
 0x230   : > { %s5701_s21 = sld [smem:[#allocation9_spill]] }
 0x231   : > { %s5702_s22 = sld [smem:[#allocation11_spill]] }
 0x232   : > { %s5703_s30 = sld [smem:[#allocation12_spill]] }
 0x233   : > { %s5705_s18 = smov %s5698_s23 }
 0x234   :  { %23 = sbr.rel (!%p21_p10) target bundleno = 7 (0x7), region = 115 }
 0x238   : > { %s5706_s23 = smov %s5703_s30 }
 0x239   :  { %2618 = vsyncpa [#allocation4], 1 }
 0x23a   :  { %2620 = vsyncpa [#allocation4 + $0x1], 1 }

</bundles_post_ra>
